<compile_context>
chip_gen: v5e
topology: v5e:2x2
jax: 0.10.0
libtpu: 0.0.40
codegen_flags: <defaults>
</compile_context>

<pallas_src>
import jax
import jax.numpy as jnp
from jax.experimental import pallas as pl
from jax.experimental.pallas import tpu as pltpu

B = 2              # batch
N_POINTS = 128     # points per cloud (AE.input_size)
BNECK = 128        # bottleneck size
DEC_HIDDEN = 256
OUT_DIM = 3 * N_POINTS


def _vmem():
    # Whole-array blocks resident in VMEM (total footprint < 1 MiB).
    return pl.BlockSpec(memory_space=pltpu.MemorySpace.VMEM)


# ---------------------------------------------------------------------------
# Fused kernel: encode(sample), encode(model), decode(model enc), cosine(X, Y)
# ---------------------------------------------------------------------------
def dense_fused_kernel(sample_ref, model_ref,
                       ew1t_ref, eb1_ref, ew2t_ref, eb2_ref, ew3t_ref, eb3_ref,
                       dw1_ref, db1_ref, dw2_ref, db2_ref, dw3_ref, db3_ref,
                       sim_ref, yflat_ref):
    batch = sample_ref.shape[0]
    f32 = jnp.float32
    bf16 = jnp.bfloat16

    # ---- encoder weights, loaded once and resident for all 2B clouds --------
    w1c0 = ew1t_ref[:, 0:1]          # (64, 1) f32  (layer-1 stays on the VPU)
    w1c1 = ew1t_ref[:, 1:2]
    w1c2 = ew1t_ref[:, 2:3]
    b1 = eb1_ref[...]                # (64, 1) f32
    w2 = ew2t_ref[...]               # (128, 64)   bf16
    b2 = eb2_ref[...]                # (128, 1)    f32
    w3 = ew3t_ref[...]               # (BNECK,128) bf16
    b3 = eb3_ref[...]                # (BNECK, 1)  f32

    def encode_one(x):
        # x: (3, N) f32 -- channels on sublanes, N=128 points on the lane axis.
        # Layer 1 (3->64): K=3 contraction as 3 broadcast FMAs (VPU), bias
        # broadcast along lanes.
        h = w1c0 * x[0:1, :] + w1c1 * x[1:2, :] + w1c2 * x[2:3, :] + b1   # (64, N)
        h = jnp.maximum(h, 0.0)
        # Layer 2 (64->128): MXU, bf16 operands, f32 accumulation.
        h = jnp.dot(w2, h.astype(bf16), preferred_element_type=f32) + b2  # (128, N)
        h = jnp.maximum(h, 0.0)
        # Layer 3 (128->BNECK): MXU.
        h = jnp.dot(w3, h.astype(bf16), preferred_element_type=f32) + b3  # (BNECK, N)
        # Symmetric max-pool over points: aligned 128x128 transpose (XLU) then a
        # sublane reduce -> lane-dense (1, BNECK) row for the decoder / cosine.
        return jnp.max(jnp.transpose(h), axis=0, keepdims=True)           # (1, BNECK)

    x_rows = [encode_one(sample_ref[b]) for b in range(batch)]   # X = encode(sample)
    y_rows = [encode_one(model_ref[b]) for b in range(batch)]    # Y = encode(model)

    # ---- cosine similarity along the feature axis (f32, rsqrt on the EUP) ---
    # torch semantics: dot / (max(||x||, eps) * max(||y||, eps)), eps = 1e-8,
    # expressed as dot * rsqrt(max(||x||^2, eps^2) * max(||y||^2, eps^2)).
    eps2 = 1e-16
    for b in range(batch):
        xr, yr = x_rows[b], y_rows[b]
        dot = jnp.sum(xr * yr, axis=-1, keepdims=True)            # (1, 1)
        nx2 = jnp.sum(xr * xr, axis=-1, keepdims=True)
        ny2 = jnp.sum(yr * yr, axis=-1, keepdims=True)
        denom2 = jnp.maximum(nx2, eps2) * jnp.maximum(ny2, eps2)
        sim_ref[b:b + 1, :] = dot * jax.lax.rsqrt(denom2)

    # ---- decoder on the model encodings (Y_AE = AE.forward(model_PC)) -------
    dw1 = dw1_ref[...]; db1 = db1_ref[...]
    dw2 = dw2_ref[...]; db2 = db2_ref[...]
    dw3 = dw3_ref[...]; db3 = db3_ref[...]
    for b in range(batch):
        h = jnp.dot(y_rows[b].astype(bf16), dw1, preferred_element_type=f32) + db1
        h = jnp.maximum(h, 0.0)                                   # (1, 256)
        h = jnp.dot(h.astype(bf16), dw2, preferred_element_type=f32) + db2
        h = jnp.maximum(h, 0.0)                                   # (1, 256)
        out = jnp.dot(h.astype(bf16), dw3, preferred_element_type=f32) + db3
        yflat_ref[b:b + 1, :] = out                               # (1, 3*N), lane-dense


# ---------------------------------------------------------------------------
# Parameters (deterministic, synthetic), stored in the kernel-friendly layout:
#   encoder convs as (Cout, Cin) matrices with (Cout, 1) biases (channel-major),
#   decoder linears as (Cin, Cout) matrices with (1, Cout) biases (row-major).
#   Matmul weights in bf16 (f32 accumulation in-kernel); VPU/bias params in f32.
# ---------------------------------------------------------------------------
def init_params(key):
    ks = jax.random.split(key, 12)
    s = 0.1
    bf16 = jnp.bfloat16

    def w(k, shape, dtype=jnp.float32):
        return (jax.random.normal(k, shape, dtype=jnp.float32) * s).astype(dtype)

    return {
        # encoder
        "e_w1t": w(ks[0], (64, 3)),                       "e_b1": w(ks[1], (64, 1)),
        "e_w2t": w(ks[2], (128, 64), bf16),               "e_b2": w(ks[3], (128, 1)),
        "e_w3t": w(ks[4], (BNECK, 128), bf16),            "e_b3": w(ks[5], (BNECK, 1)),
        # decoder
        "d_w1": w(ks[6], (BNECK, DEC_HIDDEN), bf16),      "d_b1": w(ks[7], (1, DEC_HIDDEN)),
        "d_w2": w(ks[8], (DEC_HIDDEN, DEC_HIDDEN), bf16), "d_b2": w(ks[9], (1, DEC_HIDDEN)),
        "d_w3": w(ks[10], (DEC_HIDDEN, OUT_DIM), bf16),   "d_b3": w(ks[11], (1, OUT_DIM)),
    }
    # TODO(synk): self.score = nn.Linear(256, 1) is declared in __init__ but never
    # used in forward(); it is intentionally not instantiated here.


# ---------------------------------------------------------------------------
# DenseModel.forward (the `not cfg.RPN.ENABLED and cfg.RCNN.ENABLED` branch)
# ---------------------------------------------------------------------------
@jax.jit
def dense_model_forward(sample_PC, model_PC, target, params):
    # sample_PC / model_PC: (B, 3, N) PyTorch NCW layout, consumed directly.
    b, _, n = sample_PC.shape
    sim2d, y_flat = pl.pallas_call(
        dense_fused_kernel,
        out_shape=(jax.ShapeDtypeStruct((b, 1), jnp.float32),        # Sim
                   jax.ShapeDtypeStruct((b, 3 * n), jnp.float32)),   # Y_AE (flat)
        in_specs=[_vmem()] * 14,
        out_specs=(_vmem(), _vmem()),
    )(sample_PC.astype(jnp.float32), model_PC.astype(jnp.float32),
      params["e_w1t"], params["e_b1"], params["e_w2t"], params["e_b2"],
      params["e_w3t"], params["e_b3"],
      params["d_w1"], params["d_b1"], params["d_w2"], params["d_b2"],
      params["d_w3"], params["d_b3"])

    Sim = sim2d[:, 0]                       # (B,)
    Y_AE = y_flat.reshape(b, 3, n)          # row-major view, matches torch .view(B,3,N)
    return {"Sim": Sim, "Y_AE": Y_AE, "target": target, "model_PC": model_PC}


if __name__ == "__main__":
    key = jax.random.PRNGKey(0)
    k_par, k_s, k_m, k_t = jax.random.split(key, 4)

    params = init_params(k_par)
    sample_PC = jax.random.normal(k_s, (B, 3, N_POINTS), dtype=jnp.float32)
    model_PC = jax.random.normal(k_m, (B, 3, N_POINTS), dtype=jnp.float32)
    target = jax.random.normal(k_t, (B, 3, N_POINTS), dtype=jnp.float32)

    out = dense_model_forward(sample_PC, model_PC, target, params)
    jax.block_until_ready(out)

    assert out["Sim"].shape == (B,)
    assert out["Y_AE"].shape == (B, 3, N_POINTS)
    print("KERNEL_OK")
</pallas_src>

<mosaic_0001>
module attributes {stable_mosaic.version = 11 : i64} {
  func.func @dense_fused_kernel(%arg0: memref<2x3x128xf32, #tpu.memory_space<vmem>>, %arg1: memref<2x3x128xf32, #tpu.memory_space<vmem>>, %arg2: memref<64x3xf32, #tpu.memory_space<vmem>>, %arg3: memref<64x1xf32, #tpu.memory_space<vmem>>, %arg4: memref<128x64xbf16, #tpu.memory_space<vmem>>, %arg5: memref<128x1xf32, #tpu.memory_space<vmem>>, %arg6: memref<128x128xbf16, #tpu.memory_space<vmem>>, %arg7: memref<128x1xf32, #tpu.memory_space<vmem>>, %arg8: memref<128x256xbf16, #tpu.memory_space<vmem>>, %arg9: memref<1x256xf32, #tpu.memory_space<vmem>>, %arg10: memref<256x256xbf16, #tpu.memory_space<vmem>>, %arg11: memref<1x256xf32, #tpu.memory_space<vmem>>, %arg12: memref<256x384xbf16, #tpu.memory_space<vmem>>, %arg13: memref<1x384xf32, #tpu.memory_space<vmem>>, %arg14: memref<2x1xf32, #tpu.memory_space<vmem>>, %arg15: memref<2x384xf32, #tpu.memory_space<vmem>>) attributes {dimension_semantics = [], scalar_prefetch = 0 : i64, scratch_operands = 0 : i64, tpu.core_type = #tpu.core_type<tc>} {
    %c0 = arith.constant 0 : index
    %c0_0 = arith.constant 0 : index
    %0 = vector.load %arg2[%c0, %c0_0] : memref<64x3xf32, #tpu.memory_space<vmem>>, vector<64x1xf32>
    %c0_1 = arith.constant 0 : index
    %c1 = arith.constant 1 : index
    %1 = vector.load %arg2[%c0_1, %c1] : memref<64x3xf32, #tpu.memory_space<vmem>>, vector<64x1xf32>
    %c0_2 = arith.constant 0 : index
    %c2 = arith.constant 2 : index
    %2 = vector.load %arg2[%c0_2, %c2] : memref<64x3xf32, #tpu.memory_space<vmem>>, vector<64x1xf32>
    %c0_3 = arith.constant 0 : index
    %c0_4 = arith.constant 0 : index
    %3 = vector.load %arg3[%c0_3, %c0_4] : memref<64x1xf32, #tpu.memory_space<vmem>>, vector<64x1xf32>
    %c0_5 = arith.constant 0 : index
    %c0_6 = arith.constant 0 : index
    %4 = vector.load %arg4[%c0_5, %c0_6] : memref<128x64xbf16, #tpu.memory_space<vmem>>, vector<128x64xbf16>
    %c0_7 = arith.constant 0 : index
    %c0_8 = arith.constant 0 : index
    %5 = vector.load %arg5[%c0_7, %c0_8] : memref<128x1xf32, #tpu.memory_space<vmem>>, vector<128x1xf32>
    %c0_9 = arith.constant 0 : index
    %c0_10 = arith.constant 0 : index
    %6 = vector.load %arg6[%c0_9, %c0_10] : memref<128x128xbf16, #tpu.memory_space<vmem>>, vector<128x128xbf16>
    %c0_11 = arith.constant 0 : index
    %c0_12 = arith.constant 0 : index
    %7 = vector.load %arg7[%c0_11, %c0_12] : memref<128x1xf32, #tpu.memory_space<vmem>>, vector<128x1xf32>
    %c0_13 = arith.constant 0 : index
    %c0_14 = arith.constant 0 : index
    %c0_15 = arith.constant 0 : index
    %8 = vector.load %arg0[%c0_13, %c0_14, %c0_15] : memref<2x3x128xf32, #tpu.memory_space<vmem>>, vector<1x3x128xf32>
    %9 = vector.shape_cast %8 : vector<1x3x128xf32> to vector<3x128xf32>
    %10 = vector.extract_strided_slice %9 {offsets = [0, 0], sizes = [1, 128], strides = [1, 1]} : vector<3x128xf32> to vector<1x128xf32>
    %11 = vector.broadcast %0 : vector<64x1xf32> to vector<64x128xf32>
    %12 = vector.broadcast %10 : vector<1x128xf32> to vector<64x128xf32>
    %13 = arith.mulf %11, %12 : vector<64x128xf32>
    %14 = vector.extract_strided_slice %9 {offsets = [1, 0], sizes = [1, 128], strides = [1, 1]} : vector<3x128xf32> to vector<1x128xf32>
    %15 = vector.broadcast %1 : vector<64x1xf32> to vector<64x128xf32>
    %16 = vector.broadcast %14 : vector<1x128xf32> to vector<64x128xf32>
    %17 = arith.mulf %15, %16 : vector<64x128xf32>
    %18 = arith.addf %13, %17 : vector<64x128xf32>
    %19 = vector.extract_strided_slice %9 {offsets = [2, 0], sizes = [1, 128], strides = [1, 1]} : vector<3x128xf32> to vector<1x128xf32>
    %20 = vector.broadcast %2 : vector<64x1xf32> to vector<64x128xf32>
    %21 = vector.broadcast %19 : vector<1x128xf32> to vector<64x128xf32>
    %22 = arith.mulf %20, %21 : vector<64x128xf32>
    %23 = arith.addf %18, %22 : vector<64x128xf32>
    %24 = vector.broadcast %3 : vector<64x1xf32> to vector<64x128xf32>
    %25 = arith.addf %23, %24 : vector<64x128xf32>
    %cst = arith.constant 0.000000e+00 : f32
    %26 = vector.broadcast %cst : f32 to vector<64x128xf32>
    %27 = arith.maximumf %25, %26 : vector<64x128xf32>
    %28 = arith.truncf %27 : vector<64x128xf32> to vector<64x128xbf16>
    %cst_16 = arith.constant dense<0.000000e+00> : vector<128x128xf32>
    %29 = tpu.matmul %4, %28, %cst_16 {dimension_numbers = #tpu.dot_dimension_numbers<[1], [0], [0], [1], [0, 0, 1, 1], [], []>} : vector<128x64xbf16>, vector<64x128xbf16>, vector<128x128xf32> -> vector<128x128xf32>
    %30 = vector.broadcast %5 : vector<128x1xf32> to vector<128x128xf32>
    %31 = arith.addf %29, %30 : vector<128x128xf32>
    %cst_17 = arith.constant 0.000000e+00 : f32
    %32 = vector.broadcast %cst_17 : f32 to vector<128x128xf32>
    %33 = arith.maximumf %31, %32 : vector<128x128xf32>
    %34 = arith.truncf %33 : vector<128x128xf32> to vector<128x128xbf16>
    %cst_18 = arith.constant dense<0.000000e+00> : vector<128x128xf32>
    %35 = tpu.matmul %6, %34, %cst_18 {dimension_numbers = #tpu.dot_dimension_numbers<[1], [0], [0], [1], [0, 0, 1, 1], [], []>} : vector<128x128xbf16>, vector<128x128xbf16>, vector<128x128xf32> -> vector<128x128xf32>
    %36 = vector.broadcast %7 : vector<128x1xf32> to vector<128x128xf32>
    %37 = arith.addf %35, %36 : vector<128x128xf32>
    %38 = tpu.transpose %37, [1, 0] : vector<128x128xf32> -> vector<128x128xf32>
    %cst_19 = arith.constant dense<0xFF800000> : vector<128xf32>
    %39 = vector.multi_reduction <maximumf>, %38, %cst_19 [0] : vector<128x128xf32> to vector<128xf32>
    %40 = vector.shape_cast %39 : vector<128xf32> to vector<1x128xf32>
    %c1_20 = arith.constant 1 : index
    %c0_21 = arith.constant 0 : index
    %c0_22 = arith.constant 0 : index
    %41 = vector.load %arg0[%c1_20, %c0_21, %c0_22] : memref<2x3x128xf32, #tpu.memory_space<vmem>>, vector<1x3x128xf32>
    %42 = vector.shape_cast %41 : vector<1x3x128xf32> to vector<3x128xf32>
    %43 = vector.extract_strided_slice %42 {offsets = [0, 0], sizes = [1, 128], strides = [1, 1]} : vector<3x128xf32> to vector<1x128xf32>
    %44 = vector.broadcast %0 : vector<64x1xf32> to vector<64x128xf32>
    %45 = vector.broadcast %43 : vector<1x128xf32> to vector<64x128xf32>
    %46 = arith.mulf %44, %45 : vector<64x128xf32>
    %47 = vector.extract_strided_slice %42 {offsets = [1, 0], sizes = [1, 128], strides = [1, 1]} : vector<3x128xf32> to vector<1x128xf32>
    %48 = vector.broadcast %1 : vector<64x1xf32> to vector<64x128xf32>
    %49 = vector.broadcast %47 : vector<1x128xf32> to vector<64x128xf32>
    %50 = arith.mulf %48, %49 : vector<64x128xf32>
    %51 = arith.addf %46, %50 : vector<64x128xf32>
    %52 = vector.extract_strided_slice %42 {offsets = [2, 0], sizes = [1, 128], strides = [1, 1]} : vector<3x128xf32> to vector<1x128xf32>
    %53 = vector.broadcast %2 : vector<64x1xf32> to vector<64x128xf32>
    %54 = vector.broadcast %52 : vector<1x128xf32> to vector<64x128xf32>
    %55 = arith.mulf %53, %54 : vector<64x128xf32>
    %56 = arith.addf %51, %55 : vector<64x128xf32>
    %57 = vector.broadcast %3 : vector<64x1xf32> to vector<64x128xf32>
    %58 = arith.addf %56, %57 : vector<64x128xf32>
    %cst_23 = arith.constant 0.000000e+00 : f32
    %59 = vector.broadcast %cst_23 : f32 to vector<64x128xf32>
    %60 = arith.maximumf %58, %59 : vector<64x128xf32>
    %61 = arith.truncf %60 : vector<64x128xf32> to vector<64x128xbf16>
    %cst_24 = arith.constant dense<0.000000e+00> : vector<128x128xf32>
    %62 = tpu.matmul %4, %61, %cst_24 {dimension_numbers = #tpu.dot_dimension_numbers<[1], [0], [0], [1], [0, 0, 1, 1], [], []>} : vector<128x64xbf16>, vector<64x128xbf16>, vector<128x128xf32> -> vector<128x128xf32>
    %63 = vector.broadcast %5 : vector<128x1xf32> to vector<128x128xf32>
    %64 = arith.addf %62, %63 : vector<128x128xf32>
    %cst_25 = arith.constant 0.000000e+00 : f32
    %65 = vector.broadcast %cst_25 : f32 to vector<128x128xf32>
    %66 = arith.maximumf %64, %65 : vector<128x128xf32>
    %67 = arith.truncf %66 : vector<128x128xf32> to vector<128x128xbf16>
    %cst_26 = arith.constant dense<0.000000e+00> : vector<128x128xf32>
    %68 = tpu.matmul %6, %67, %cst_26 {dimension_numbers = #tpu.dot_dimension_numbers<[1], [0], [0], [1], [0, 0, 1, 1], [], []>} : vector<128x128xbf16>, vector<128x128xbf16>, vector<128x128xf32> -> vector<128x128xf32>
    %69 = vector.broadcast %7 : vector<128x1xf32> to vector<128x128xf32>
    %70 = arith.addf %68, %69 : vector<128x128xf32>
    %71 = tpu.transpose %70, [1, 0] : vector<128x128xf32> -> vector<128x128xf32>
    %cst_27 = arith.constant dense<0xFF800000> : vector<128xf32>
    %72 = vector.multi_reduction <maximumf>, %71, %cst_27 [0] : vector<128x128xf32> to vector<128xf32>
    %73 = vector.shape_cast %72 : vector<128xf32> to vector<1x128xf32>
    %c0_28 = arith.constant 0 : index
    %c0_29 = arith.constant 0 : index
    %c0_30 = arith.constant 0 : index
    %74 = vector.load %arg1[%c0_28, %c0_29, %c0_30] : memref<2x3x128xf32, #tpu.memory_space<vmem>>, vector<1x3x128xf32>
    %75 = vector.shape_cast %74 : vector<1x3x128xf32> to vector<3x128xf32>
    %76 = vector.extract_strided_slice %75 {offsets = [0, 0], sizes = [1, 128], strides = [1, 1]} : vector<3x128xf32> to vector<1x128xf32>
    %77 = vector.broadcast %0 : vector<64x1xf32> to vector<64x128xf32>
    %78 = vector.broadcast %76 : vector<1x128xf32> to vector<64x128xf32>
    %79 = arith.mulf %77, %78 : vector<64x128xf32>
    %80 = vector.extract_strided_slice %75 {offsets = [1, 0], sizes = [1, 128], strides = [1, 1]} : vector<3x128xf32> to vector<1x128xf32>
    %81 = vector.broadcast %1 : vector<64x1xf32> to vector<64x128xf32>
    %82 = vector.broadcast %80 : vector<1x128xf32> to vector<64x128xf32>
    %83 = arith.mulf %81, %82 : vector<64x128xf32>
    %84 = arith.addf %79, %83 : vector<64x128xf32>
    %85 = vector.extract_strided_slice %75 {offsets = [2, 0], sizes = [1, 128], strides = [1, 1]} : vector<3x128xf32> to vector<1x128xf32>
    %86 = vector.broadcast %2 : vector<64x1xf32> to vector<64x128xf32>
    %87 = vector.broadcast %85 : vector<1x128xf32> to vector<64x128xf32>
    %88 = arith.mulf %86, %87 : vector<64x128xf32>
    %89 = arith.addf %84, %88 : vector<64x128xf32>
    %90 = vector.broadcast %3 : vector<64x1xf32> to vector<64x128xf32>
    %91 = arith.addf %89, %90 : vector<64x128xf32>
    %cst_31 = arith.constant 0.000000e+00 : f32
    %92 = vector.broadcast %cst_31 : f32 to vector<64x128xf32>
    %93 = arith.maximumf %91, %92 : vector<64x128xf32>
    %94 = arith.truncf %93 : vector<64x128xf32> to vector<64x128xbf16>
    %cst_32 = arith.constant dense<0.000000e+00> : vector<128x128xf32>
    %95 = tpu.matmul %4, %94, %cst_32 {dimension_numbers = #tpu.dot_dimension_numbers<[1], [0], [0], [1], [0, 0, 1, 1], [], []>} : vector<128x64xbf16>, vector<64x128xbf16>, vector<128x128xf32> -> vector<128x128xf32>
    %96 = vector.broadcast %5 : vector<128x1xf32> to vector<128x128xf32>
    %97 = arith.addf %95, %96 : vector<128x128xf32>
    %cst_33 = arith.constant 0.000000e+00 : f32
    %98 = vector.broadcast %cst_33 : f32 to vector<128x128xf32>
    %99 = arith.maximumf %97, %98 : vector<128x128xf32>
    %100 = arith.truncf %99 : vector<128x128xf32> to vector<128x128xbf16>
    %cst_34 = arith.constant dense<0.000000e+00> : vector<128x128xf32>
    %101 = tpu.matmul %6, %100, %cst_34 {dimension_numbers = #tpu.dot_dimension_numbers<[1], [0], [0], [1], [0, 0, 1, 1], [], []>} : vector<128x128xbf16>, vector<128x128xbf16>, vector<128x128xf32> -> vector<128x128xf32>
    %102 = vector.broadcast %7 : vector<128x1xf32> to vector<128x128xf32>
    %103 = arith.addf %101, %102 : vector<128x128xf32>
    %104 = tpu.transpose %103, [1, 0] : vector<128x128xf32> -> vector<128x128xf32>
    %cst_35 = arith.constant dense<0xFF800000> : vector<128xf32>
    %105 = vector.multi_reduction <maximumf>, %104, %cst_35 [0] : vector<128x128xf32> to vector<128xf32>
    %106 = vector.shape_cast %105 : vector<128xf32> to vector<1x128xf32>
    %c1_36 = arith.constant 1 : index
    %c0_37 = arith.constant 0 : index
    %c0_38 = arith.constant 0 : index
    %107 = vector.load %arg1[%c1_36, %c0_37, %c0_38] : memref<2x3x128xf32, #tpu.memory_space<vmem>>, vector<1x3x128xf32>
    %108 = vector.shape_cast %107 : vector<1x3x128xf32> to vector<3x128xf32>
    %109 = vector.extract_strided_slice %108 {offsets = [0, 0], sizes = [1, 128], strides = [1, 1]} : vector<3x128xf32> to vector<1x128xf32>
    %110 = vector.broadcast %0 : vector<64x1xf32> to vector<64x128xf32>
    %111 = vector.broadcast %109 : vector<1x128xf32> to vector<64x128xf32>
    %112 = arith.mulf %110, %111 : vector<64x128xf32>
    %113 = vector.extract_strided_slice %108 {offsets = [1, 0], sizes = [1, 128], strides = [1, 1]} : vector<3x128xf32> to vector<1x128xf32>
    %114 = vector.broadcast %1 : vector<64x1xf32> to vector<64x128xf32>
    %115 = vector.broadcast %113 : vector<1x128xf32> to vector<64x128xf32>
    %116 = arith.mulf %114, %115 : vector<64x128xf32>
    %117 = arith.addf %112, %116 : vector<64x128xf32>
    %118 = vector.extract_strided_slice %108 {offsets = [2, 0], sizes = [1, 128], strides = [1, 1]} : vector<3x128xf32> to vector<1x128xf32>
    %119 = vector.broadcast %2 : vector<64x1xf32> to vector<64x128xf32>
    %120 = vector.broadcast %118 : vector<1x128xf32> to vector<64x128xf32>
    %121 = arith.mulf %119, %120 : vector<64x128xf32>
    %122 = arith.addf %117, %121 : vector<64x128xf32>
    %123 = vector.broadcast %3 : vector<64x1xf32> to vector<64x128xf32>
    %124 = arith.addf %122, %123 : vector<64x128xf32>
    %cst_39 = arith.constant 0.000000e+00 : f32
    %125 = vector.broadcast %cst_39 : f32 to vector<64x128xf32>
    %126 = arith.maximumf %124, %125 : vector<64x128xf32>
    %127 = arith.truncf %126 : vector<64x128xf32> to vector<64x128xbf16>
    %cst_40 = arith.constant dense<0.000000e+00> : vector<128x128xf32>
    %128 = tpu.matmul %4, %127, %cst_40 {dimension_numbers = #tpu.dot_dimension_numbers<[1], [0], [0], [1], [0, 0, 1, 1], [], []>} : vector<128x64xbf16>, vector<64x128xbf16>, vector<128x128xf32> -> vector<128x128xf32>
    %129 = vector.broadcast %5 : vector<128x1xf32> to vector<128x128xf32>
    %130 = arith.addf %128, %129 : vector<128x128xf32>
    %cst_41 = arith.constant 0.000000e+00 : f32
    %131 = vector.broadcast %cst_41 : f32 to vector<128x128xf32>
    %132 = arith.maximumf %130, %131 : vector<128x128xf32>
    %133 = arith.truncf %132 : vector<128x128xf32> to vector<128x128xbf16>
    %cst_42 = arith.constant dense<0.000000e+00> : vector<128x128xf32>
    %134 = tpu.matmul %6, %133, %cst_42 {dimension_numbers = #tpu.dot_dimension_numbers<[1], [0], [0], [1], [0, 0, 1, 1], [], []>} : vector<128x128xbf16>, vector<128x128xbf16>, vector<128x128xf32> -> vector<128x128xf32>
    %135 = vector.broadcast %7 : vector<128x1xf32> to vector<128x128xf32>
    %136 = arith.addf %134, %135 : vector<128x128xf32>
    %137 = tpu.transpose %136, [1, 0] : vector<128x128xf32> -> vector<128x128xf32>
    %cst_43 = arith.constant dense<0xFF800000> : vector<128xf32>
    %138 = vector.multi_reduction <maximumf>, %137, %cst_43 [0] : vector<128x128xf32> to vector<128xf32>
    %139 = vector.shape_cast %138 : vector<128xf32> to vector<1x128xf32>
    %140 = arith.mulf %40, %106 : vector<1x128xf32>
    %cst_44 = arith.constant dense<0.000000e+00> : vector<1xf32>
    %141 = vector.multi_reduction <add>, %140, %cst_44 [1] : vector<1x128xf32> to vector<1xf32>
    %142 = vector.shape_cast %141 : vector<1xf32> to vector<1x1xf32>
    %143 = arith.mulf %40, %40 : vector<1x128xf32>
    %cst_45 = arith.constant dense<0.000000e+00> : vector<1xf32>
    %144 = vector.multi_reduction <add>, %143, %cst_45 [1] : vector<1x128xf32> to vector<1xf32>
    %145 = vector.shape_cast %144 : vector<1xf32> to vector<1x1xf32>
    %146 = arith.mulf %106, %106 : vector<1x128xf32>
    %cst_46 = arith.constant dense<0.000000e+00> : vector<1xf32>
    %147 = vector.multi_reduction <add>, %146, %cst_46 [1] : vector<1x128xf32> to vector<1xf32>
    %148 = vector.shape_cast %147 : vector<1xf32> to vector<1x1xf32>
    %cst_47 = arith.constant 1.000000e-16 : f32
    %149 = vector.broadcast %cst_47 : f32 to vector<1x1xf32>
    %150 = arith.maximumf %145, %149 : vector<1x1xf32>
    %cst_48 = arith.constant 1.000000e-16 : f32
    %151 = vector.broadcast %cst_48 : f32 to vector<1x1xf32>
    %152 = arith.maximumf %148, %151 : vector<1x1xf32>
    %153 = arith.mulf %150, %152 : vector<1x1xf32>
    %154 = math.rsqrt %153 : vector<1x1xf32>
    %155 = arith.mulf %142, %154 : vector<1x1xf32>
    %c0_49 = arith.constant 0 : index
    %c0_50 = arith.constant 0 : index
    %156 = vector.load %arg14[%c0_49, %c0_50] : memref<2x1xf32, #tpu.memory_space<vmem>>, vector<1x1xf32>
    tpu.vector_store %arg14[%c0_49, %c0_50], %155 {strides = array<i32>} : memref<2x1xf32, #tpu.memory_space<vmem>>, vector<1x1xf32>,
    %157 = arith.mulf %73, %139 : vector<1x128xf32>
    %cst_51 = arith.constant dense<0.000000e+00> : vector<1xf32>
    %158 = vector.multi_reduction <add>, %157, %cst_51 [1] : vector<1x128xf32> to vector<1xf32>
    %159 = vector.shape_cast %158 : vector<1xf32> to vector<1x1xf32>
    %160 = arith.mulf %73, %73 : vector<1x128xf32>
    %cst_52 = arith.constant dense<0.000000e+00> : vector<1xf32>
    %161 = vector.multi_reduction <add>, %160, %cst_52 [1] : vector<1x128xf32> to vector<1xf32>
    %162 = vector.shape_cast %161 : vector<1xf32> to vector<1x1xf32>
    %163 = arith.mulf %139, %139 : vector<1x128xf32>
    %cst_53 = arith.constant dense<0.000000e+00> : vector<1xf32>
    %164 = vector.multi_reduction <add>, %163, %cst_53 [1] : vector<1x128xf32> to vector<1xf32>
    %165 = vector.shape_cast %164 : vector<1xf32> to vector<1x1xf32>
    %cst_54 = arith.constant 1.000000e-16 : f32
    %166 = vector.broadcast %cst_54 : f32 to vector<1x1xf32>
    %167 = arith.maximumf %162, %166 : vector<1x1xf32>
    %cst_55 = arith.constant 1.000000e-16 : f32
    %168 = vector.broadcast %cst_55 : f32 to vector<1x1xf32>
    %169 = arith.maximumf %165, %168 : vector<1x1xf32>
    %170 = arith.mulf %167, %169 : vector<1x1xf32>
    %171 = math.rsqrt %170 : vector<1x1xf32>
    %172 = arith.mulf %159, %171 : vector<1x1xf32>
    %c1_56 = arith.constant 1 : index
    %c0_57 = arith.constant 0 : index
    %173 = vector.load %arg14[%c1_56, %c0_57] : memref<2x1xf32, #tpu.memory_space<vmem>>, vector<1x1xf32>
    tpu.vector_store %arg14[%c1_56, %c0_57], %172 {strides = array<i32>} : memref<2x1xf32, #tpu.memory_space<vmem>>, vector<1x1xf32>,
    %c0_58 = arith.constant 0 : index
    %c0_59 = arith.constant 0 : index
    %174 = vector.load %arg8[%c0_58, %c0_59] : memref<128x256xbf16, #tpu.memory_space<vmem>>, vector<128x256xbf16>
    %c0_60 = arith.constant 0 : index
    %c0_61 = arith.constant 0 : index
    %175 = vector.load %arg9[%c0_60, %c0_61] : memref<1x256xf32, #tpu.memory_space<vmem>>, vector<1x256xf32>
    %c0_62 = arith.constant 0 : index
    %c0_63 = arith.constant 0 : index
    %176 = vector.load %arg10[%c0_62, %c0_63] : memref<256x256xbf16, #tpu.memory_space<vmem>>, vector<256x256xbf16>
    %c0_64 = arith.constant 0 : index
    %c0_65 = arith.constant 0 : index
    %177 = vector.load %arg11[%c0_64, %c0_65] : memref<1x256xf32, #tpu.memory_space<vmem>>, vector<1x256xf32>
    %c0_66 = arith.constant 0 : index
    %c0_67 = arith.constant 0 : index
    %178 = vector.load %arg12[%c0_66, %c0_67] : memref<256x384xbf16, #tpu.memory_space<vmem>>, vector<256x384xbf16>
    %c0_68 = arith.constant 0 : index
    %c0_69 = arith.constant 0 : index
    %179 = vector.load %arg13[%c0_68, %c0_69] : memref<1x384xf32, #tpu.memory_space<vmem>>, vector<1x384xf32>
    %180 = arith.truncf %106 : vector<1x128xf32> to vector<1x128xbf16>
    %cst_70 = arith.constant dense<0.000000e+00> : vector<1x256xf32>
    %181 = tpu.matmul %180, %174, %cst_70 {dimension_numbers = #tpu.dot_dimension_numbers<[1], [0], [0], [1], [0, 0, 1, 1], [], []>} : vector<1x128xbf16>, vector<128x256xbf16>, vector<1x256xf32> -> vector<1x256xf32>
    %182 = arith.addf %181, %175 : vector<1x256xf32>
    %cst_71 = arith.constant 0.000000e+00 : f32
    %183 = vector.broadcast %cst_71 : f32 to vector<1x256xf32>
    %184 = arith.maximumf %182, %183 : vector<1x256xf32>
    %185 = arith.truncf %184 : vector<1x256xf32> to vector<1x256xbf16>
    %cst_72 = arith.constant dense<0.000000e+00> : vector<1x256xf32>
    %186 = tpu.matmul %185, %176, %cst_72 {dimension_numbers = #tpu.dot_dimension_numbers<[1], [0], [0], [1], [0, 0, 1, 1], [], []>} : vector<1x256xbf16>, vector<256x256xbf16>, vector<1x256xf32> -> vector<1x256xf32>
    %187 = arith.addf %186, %177 : vector<1x256xf32>
    %cst_73 = arith.constant 0.000000e+00 : f32
    %188 = vector.broadcast %cst_73 : f32 to vector<1x256xf32>
    %189 = arith.maximumf %187, %188 : vector<1x256xf32>
    %190 = arith.truncf %189 : vector<1x256xf32> to vector<1x256xbf16>
    %cst_74 = arith.constant dense<0.000000e+00> : vector<1x384xf32>
    %191 = tpu.matmul %190, %178, %cst_74 {dimension_numbers = #tpu.dot_dimension_numbers<[1], [0], [0], [1], [0, 0, 1, 1], [], []>} : vector<1x256xbf16>, vector<256x384xbf16>, vector<1x384xf32> -> vector<1x384xf32>
    %192 = arith.addf %191, %179 : vector<1x384xf32>
    %c0_75 = arith.constant 0 : index
    %c0_76 = arith.constant 0 : index
    %193 = vector.load %arg15[%c0_75, %c0_76] : memref<2x384xf32, #tpu.memory_space<vmem>>, vector<1x384xf32>
    tpu.vector_store %arg15[%c0_75, %c0_76], %192 {strides = array<i32>} : memref<2x384xf32, #tpu.memory_space<vmem>>, vector<1x384xf32>,
    %194 = arith.truncf %139 : vector<1x128xf32> to vector<1x128xbf16>
    %cst_77 = arith.constant dense<0.000000e+00> : vector<1x256xf32>
    %195 = tpu.matmul %194, %174, %cst_77 {dimension_numbers = #tpu.dot_dimension_numbers<[1], [0], [0], [1], [0, 0, 1, 1], [], []>} : vector<1x128xbf16>, vector<128x256xbf16>, vector<1x256xf32> -> vector<1x256xf32>
    %196 = arith.addf %195, %175 : vector<1x256xf32>
    %cst_78 = arith.constant 0.000000e+00 : f32
    %197 = vector.broadcast %cst_78 : f32 to vector<1x256xf32>
    %198 = arith.maximumf %196, %197 : vector<1x256xf32>
    %199 = arith.truncf %198 : vector<1x256xf32> to vector<1x256xbf16>
    %cst_79 = arith.constant dense<0.000000e+00> : vector<1x256xf32>
    %200 = tpu.matmul %199, %176, %cst_79 {dimension_numbers = #tpu.dot_dimension_numbers<[1], [0], [0], [1], [0, 0, 1, 1], [], []>} : vector<1x256xbf16>, vector<256x256xbf16>, vector<1x256xf32> -> vector<1x256xf32>
    %201 = arith.addf %200, %177 : vector<1x256xf32>
    %cst_80 = arith.constant 0.000000e+00 : f32
    %202 = vector.broadcast %cst_80 : f32 to vector<1x256xf32>
    %203 = arith.maximumf %201, %202 : vector<1x256xf32>
    %204 = arith.truncf %203 : vector<1x256xf32> to vector<1x256xbf16>
    %cst_81 = arith.constant dense<0.000000e+00> : vector<1x384xf32>
    %205 = tpu.matmul %204, %178, %cst_81 {dimension_numbers = #tpu.dot_dimension_numbers<[1], [0], [0], [1], [0, 0, 1, 1], [], []>} : vector<1x256xbf16>, vector<256x384xbf16>, vector<1x384xf32> -> vector<1x384xf32>
    %206 = arith.addf %205, %179 : vector<1x384xf32>
    %c1_82 = arith.constant 1 : index
    %c0_83 = arith.constant 0 : index
    %207 = vector.load %arg15[%c1_82, %c0_83] : memref<2x384xf32, #tpu.memory_space<vmem>>, vector<1x384xf32>
    tpu.vector_store %arg15[%c1_82, %c0_83], %206 {strides = array<i32>} : memref<2x384xf32, #tpu.memory_space<vmem>>, vector<1x384xf32>,
    return
  }
}

</mosaic_0001>

<bundles_post_ra>
// kernel: dense_model_forward.1
= control target key start
LH: loop header
LB: loop body
LE: loop exit
PB: predicated region body
PF: predicated region fallthrough
CT: control target
= control target key end

     0   :  { %21 = vsyncpa [#allocation3], 0  ;;  %s5009_s0 = inlined_call_operand.vmem [shape: f32[2,3,128], index: 0, kind: input, shape index: {}]   ;;  %s5010_s1 = inlined_call_operand.vmem [shape: f32[2,3,128], index: 1, kind: input, shape index: {}]   ;;  %s5011_s2 = inlined_call_operand.vmem [shape: f32[64,3], index: 2, kind: input, shape index: {}]   ;;  %s5012_s3 = inlined_call_operand.vmem [shape: f32[64,1], index: 3, kind: input, shape index: {}]   ;;  %s5013_s4 = inlined_call_operand.vmem [shape: bf16[128,64], index: 4, kind: input, shape index: {}]   ;;  %s5014_s5 = inlined_call_operand.vmem [shape: f32[128,1], index: 5, kind: input, shape index: {}]   ;;  %s5015_s6 = inlined_call_operand.vmem [shape: bf16[128,128], index: 6, kind: input, shape index: {}]   ;;  %s5016_s7 = inlined_call_operand.vmem [shape: f32[128,1], index: 7, kind: input, shape index: {}]   ;;  %s5017_s8 = inlined_call_operand.vmem [shape: bf16[128,256], index: 8, kind: input, shape index: {}]   ;;  %s5018_s9 = inlined_call_operand.vmem [shape: f32[1,256], index: 9, kind: input, shape index: {}]   ;;  %s5019_s10 = inlined_call_operand.hbm [shape: bf16[256,256], index: 10, kind: input, shape index: {}]   ;;  %s5020_s11 = inlined_call_operand.vmem [shape: f32[1,256], index: 11, kind: input, shape index: {}]   ;;  %s5021_s12 = inlined_call_operand.hbm [shape: bf16[256,384], index: 12, kind: input, shape index: {}]   ;;  %s5022_s13 = inlined_call_operand.vmem [shape: f32[1,384], index: 13, kind: input, shape index: {}]   ;;  %s5023_s14 = inlined_call_operand.vmem [shape: f32[2,1], index: 14, kind: output, shape index: {0}]   ;;  %s5024_s15 = inlined_call_operand.hbm [shape: f32[2,384], index: 15, kind: output, shape index: {1}]  }
   0x1   :  { %22 = vsyncpa [#allocation6], 0 }
   0x2   :  { %23 = vsyncpa [#allocation4], 0  ;;  %s48_s20 = sshll.u32 %s5019_s10, 4  ;;  %s3299_s21 = smov [#allocation2]   ;;  %s49_s20 = int_to_ptr.hbm [resolvable:$true] %s48_s20 }
   0x3   :  { %s50_s22 = sshll.u32 %s3299_s21, 4  ;;  %s63_s25 = sshll.u32 %s5021_s12, 4  ;;  %s51_s22 = int_to_ptr.vmem [resolvable:$true] %s50_s22  ;;  %s64_s25 = int_to_ptr.hbm [resolvable:$true] %s63_s25 }
   0x4   :  { %s3300_s26 = smov 128   ;;  %s3301_s27 = smov 8  }
   0x5   :  { %56 = dma.hbm_to_vmem [thread:$0]  %s49_s20, 4096, %s51_s22, [#allocation3], %s3300_s26, %s3300_s26, %s3301_s27  }
   0x6   :  { %s3302_s28 = smov [#allocation5]   ;;  %s3303_s30 = smov 192  }
   0x7   :  { %s65_s29 = sshll.u32 %s3302_s28, 4  ;;  %s3304_s16 = smov 12   ;;  %s66_s29 = int_to_ptr.vmem [resolvable:$true] %s65_s29 }
   0x8   :  { %71 = dma.hbm_to_vmem [thread:$0]  %s64_s25, 6144, %s66_s29, [#allocation6], %s3303_s30, %s3303_s30, %s3304_s16  }
   0x9   :  { %3293 = dma.done.wait [#allocation3], 4096  }
   0xa   :  { %3294 = vsyncadd [#allocation3], 4294963200 }
   0xb   :  { %3295 = dma.done.wait [#allocation6], 6144  }
   0xc   :  { %3296 = vsyncadd [#allocation6], 4294961152  ;;  %v3305_v0 = vmov 2   ;;  %v3306_v1 = vmov 1   ;;  %v89_v2 = vld [vmem:[%s5011_s2 + $0x30] sm:$0xff]  ;;  %v86_v3 = vld [vmem:[%s5011_s2 + $0x18] sm:$0xff] }
   0xd   :  { %3207 = vset.pattern.permute.xlu0 %v3305_v0  ;;  %3197 = vset.pattern.permute.xlu2 %v3305_v0  ;;  %v90_v4 = vld [vmem:[%s5011_s2 + $0x38] sm:$0xff]  ;;  %v88_v5 = vld [vmem:[%s5011_s2 + $0x28] sm:$0xff]  ;;  %v87_v6 = vld [vmem:[%s5011_s2 + $0x20] sm:$0xff]  ;;  %v3307_v8 = vmov 0   ;;  %vm491_vm0 = vcmask 523264   ;;  %vm1561_vm4 = vcmask 0  }
   0xe   :  { %3196 = vset.pattern.permute.xlu1 %v3306_v1  ;;  %287 = vperm.xlu2 %3197, %v89_v2   ;;  %v83_v7 = vld [vmem:[%s5011_s2] sm:$0xff]  ;;  %v97_v9 = vld [vmem:[%s5012_s3 + $0x30] sm:$0xff]  ;;  %v98_v10 = vld [vmem:[%s5012_s3 + $0x38] sm:$0xff]  ;;  %vm2385_vm8 = vcmask 1040384   ;;  %vm2387_vm9 = vcmask 1041408   ;;  %s2579_s26 = sshll.u32 %s5024_s15, 4  ;;  %s2580_s26 = int_to_ptr.hbm [resolvable:$true] %s2579_s26 }
   0xf   :  { %238 = vperm.xlu1 %3196, %v89_v2   ;;  %275 = vperm.xlu0 %3207, %v86_v3   ;;  %v85_v11 = vld [vmem:[%s5011_s2 + $0x10] sm:$0xff]  ;;  %v94_v12 = vld [vmem:[%s5012_s3 + $0x18] sm:$0xff]  ;;  %v95_v13 = vld [vmem:[%s5012_s3 + $0x20] sm:$0xff] }
  0x10   :  { %v96_v14 = vld [vmem:[%s5012_s3 + $0x28] sm:$0xff]  ;;  %v127_v15 = vld [vmem:[%s5014_s5 + $0x60] sm:$0xff]  ;;  %v126_v17 = vld [vmem:[%s5014_s5 + $0x58] sm:$0xff] }
  0x11   :  { %v84_v16 = vld [vmem:[%s5011_s2 + $0x8] sm:$0xff]  ;;  %v121_v18 = vld [vmem:[%s5014_s5 + $0x30] sm:$0xff]  ;;  %v91_v23 = vld [vmem:[%s5012_s3] sm:$0xff] }
  0x12   :  { %v93_v19 = vld [vmem:[%s5012_s3 + $0x10] sm:$0xff]  ;;  %v120_v20 = vld [vmem:[%s5014_s5 + $0x28] sm:$0xff]  ;;  %v115_v24 = vld [vmem:[%s5014_s5] sm:$0xff] }
  0x13   :  { %v92_v22 = vld [vmem:[%s5012_s3 + $0x8] sm:$0xff]  ;;  %v130_v26 = vld [vmem:[%s5014_s5 + $0x78] sm:$0xff]  ;;  %v129_v27 = vld [vmem:[%s5014_s5 + $0x70] sm:$0xff] }
  0x14   :  { %v148_v28 = vld [vmem:[%s5016_s7 + $0x8] sm:$0xff]  ;;  %v125_v30 = vld [vmem:[%s5014_s5 + $0x50] sm:$0xff]  ;;  %v151_v32 = vld [vmem:[%s5016_s7 + $0x20] sm:$0xff] }
  0x15   :  { %v128_v31 = vld [vmem:[%s5014_s5 + $0x68] sm:$0xff]  ;;  %v123_v37 = vld [vmem:[%s5014_s5 + $0x40] sm:$0xff]  ;;  %v154_v38 = vld [vmem:[%s5016_s7 + $0x38] sm:$0xff] }
  0x16   :  { %291 = vperm.xlu2 %3197, %v90_v4   ;;  %v124_v36 = vld [vmem:[%s5014_s5 + $0x48] sm:$0xff]  ;;  %v1059_v41 = vld [vmem:[%s5010_s1] sm:$0x7]  ;;  %v2681_v42 = vld [vmem:[%s5010_s1 + $0x4] sm:$0x7] }
  0x17   :  { %242 = vperm.xlu1 %3196, %v90_v4   ;;  %3208 = vset.pattern.permute.xlu0 %v3306_v1  ;;  %v119_v44 = vld [vmem:[%s5014_s5 + $0x20] sm:$0xff]  ;;  %v122_v45 = vld [vmem:[%s5014_s5 + $0x38] sm:$0xff]  ;;  %v3522_v46 = vperm.slane %v1059_v41, 1  ;;  %v3524_v47 = vperm.slane %v2681_v42, 1  ;;  %v157_v48 = vld [vmem:[%s5016_s7 + $0x50] sm:$0xff]  ;;  %v3529_v49 = vperm.slane %v1059_v41, 0 }
  0x18   :  { %234 = vperm.xlu0 %3208, %v88_v5   ;;  %v3531_v50 = vperm.slane %v2681_v42, 0  ;;  %v3537_v53 = vperm.slane %v1059_v41, 2  ;;  %v3541_v55 = vperm.slane %v2681_v42, 2  ;;  %v118_v63 = vld [vmem:[%s5014_s5 + $0x18] sm:$0xff] }
  0x1e   :  { %3199 = vset.pattern.permute.xlu2 %v3306_v1 }
  0x1f   :  { %3198 = vset.pattern.permute.xlu1 %v3307_v8  ;;  %230 = vperm.xlu2 %3199, %v87_v6  }
  0x20   :  { %191 = vperm.xlu1 %3198, %v88_v5   ;;  %214 = vperm.xlu0 %3208, %v83_v7  }
  0x27   :  { %3201 = vset.pattern.permute.xlu2 %v3305_v0 }
  0x28   :  { %3200 = vset.pattern.permute.xlu1 %v3305_v0  ;;  %3211 = vset.pattern.permute.xlu0 %v3307_v8 }
  0x29   :  { %279 = vperm.xlu1 %3200, %v87_v6   ;;  %283 = vperm.xlu2 %3201, %v88_v5   ;;  %v2664_v5 = vld [vmem:[%s5009_s0 + $0x4] sm:$0x7] }
  0x2a   :  { %196 = vperm.xlu0 %3211, %v89_v2   ;;  %v160_v2 = vld [vmem:[%s5016_s7 + $0x68] sm:$0xff] }
  0x31   :  { %3202 = vset.pattern.permute.xlu1 %v3307_v8  ;;  %3203 = vset.pattern.permute.xlu2 %v3307_v8 }
  0x32   :  { %201 = vperm.xlu0 %3211, %v90_v4   ;;  %343 = vperm.xlu1 %3202, %v97_v9   ;;  %v163_v4 = vld [vmem:[%s5009_s0] sm:$0x7]  ;;  %v3578_v9 = vperm.slane %v2664_v5, 2 }
  0x33   :  { %348 = vperm.xlu2 %3203, %v98_v10  }
  0x3a   :  { %186 = vperm.xlu0 %3211, %v87_v6   ;;  %181 = vperm.xlu1 %3202, %v86_v3  }
  0x3b   :  { %3204 = vset.pattern.permute.xlu2 %v3306_v1 }
  0x3c   :  { %222 = vperm.xlu2 %3204, %v85_v11  }
  0x42   :  { %176 = vperm.xlu0 %3211, %v85_v11   ;;  %3205 = vset.pattern.permute.xlu1 %v3306_v1 }
  0x43   :  { %226 = vperm.xlu1 %3205, %v86_v3  }
  0x44   :  { %3206 = vset.pattern.permute.xlu2 %v3305_v0 }
  0x45   :  { %271 = vperm.xlu2 %3206, %v85_v11  }
  0x4a   :  { %328 = vperm.xlu0 %3211, %v94_v12  }
  0x4b   :  { %3209 = vset.pattern.permute.xlu1 %v3307_v8 }
  0x4c   :  { %333 = vperm.xlu1 %3209, %v95_v13  }
  0x4d   :  { %3210 = vset.pattern.permute.xlu2 %v3307_v8 }
  0x4e   :  { %338 = vperm.xlu2 %3210, %v96_v14  }
  0x52   :  { %433 = vperm.xlu0 %3211, %v127_v15   ;;  %v147_v15 = vld [vmem:[%s5016_s7] sm:$0xff] }
  0x54   :  { %166 = vperm.xlu1 %3209, %v83_v7  }
  0x56   :  { %171 = vperm.xlu2 %3210, %v84_v16  }
  0x5a   :  { %428 = vperm.xlu0 %3211, %v126_v17   ;;  %v3591_v17 = vperm.slane %v2664_v5, 1 }
  0x5c   :  { %3212 = vset.pattern.permute.xlu1 %v3306_v1 }
  0x5d   :  { %218 = vperm.xlu1 %3212, %v84_v16  }
  0x5e   :  { %3213 = vset.pattern.permute.xlu2 %v3305_v0 }
  0x5f   :  { %263 = vperm.xlu2 %3213, %v83_v7  }
  0x62   :  { %403 = vperm.xlu0 %3211, %v121_v18   ;;  %v3593_v18 = vperm.slane %v163_v4, 0 }
  0x65   :  { %3214 = vset.pattern.permute.xlu1 %v3305_v0  ;;  %v117_v0 = vld [vmem:[%s5014_s5 + $0x10] sm:$0xff] }
  0x66   :  { %267 = vperm.xlu1 %3214, %v84_v16   ;;  %v3589_v16 = vperm.slane %v163_v4, 1 }
  0x67   :  { %3215 = vset.pattern.permute.xlu2 %v3307_v8 }
  0x68   :  { %323 = vperm.xlu2 %3215, %v93_v19   ;;  %v3456_v21 = vpop.permute.xlu2 %287  ;;  %v3595_v19 = vperm.slane %v2664_v5, 0  ;;  %v149_v5 = vld [vmem:[%s5016_s7 + $0x10] sm:$0xff] }
  0x6a   :  { %398 = vperm.xlu0 %3211, %v120_v20   ;;  %v116_v20 = vld [vmem:[%s5014_s5 + $0x8] sm:$0xff] }
  0x6e   :  { %3216 = vset.pattern.permute.xlu1 %v3307_v8  ;;  %v3576_v8 = vperm.slane %v163_v4, 2 }
  0x6f   :  { %313 = vperm.xlu1 %3216, %v91_v23   ;;  %v1333_v23 = vmul.f32 %v3541_v55, %v3456_v21 }
  0x70   :  { %318 = vperm.xlu2 %3215, %v92_v22   ;;  %v3467_v25 = vpop.permute.xlu2 %291  ;;  %v1093_v22 = vmul.f32 %v3537_v53, %v3456_v21 }
  0x71   :  { %v855_v41 = vmul.f32 %v3578_v9, %v3467_v25 }
  0x72   :  { %373 = vperm.xlu0 %3211, %v115_v24  }
  0x77   :  { %443 = vperm.xlu1 %3216, %v129_v27  }
  0x78   :  { %448 = vperm.xlu2 %3215, %v130_v26  }
  0x79   :  { %v3478_v29 = vpop.permute.xlu2 %230 }
  0x7a   :  { %596 = vperm.xlu0 %3211, %v148_v28   ;;  %v1074_v4 = vmul.f32 %v3522_v46, %v3478_v29 }
  0x7f   :  { %438 = vperm.xlu1 %3216, %v128_v31   ;;  %v301_v31 = vmul.f32 %v3576_v8, %v3456_v21 }
  0x80   :  { %423 = vperm.xlu2 %3215, %v125_v30  }
  0x81   :  { %v3489_v33 = vpop.permute.xlu1 %238  ;;  %v3491_v34 = vpop.permute.xlu0 %275 }
  0x82   :  { %611 = vperm.xlu0 %3211, %v151_v32   ;;  %v1076_v11 = vmul.f32 %v3522_v46, %v3489_v33  ;;  %v1316_v12 = vmul.f32 %v3524_v47, %v3489_v33  ;;  %v854_v32 = vmul.f32 %v3578_v9, %v3456_v21  ;;  %v252_v42 = vmul.f32 %v3589_v16, %v3489_v33 }
  0x83   :  { %v3493_v35 = vpop.permute.xlu2 %283  ;;  %v1334_v21 = vmul.f32 %v3541_v55, %v3467_v25 }
  0x84   :  { %v1092_v59 = vmul.f32 %v3537_v53, %v3493_v35  ;;  %v1332_v60 = vmul.f32 %v3541_v55, %v3493_v35 }
  0x87   :  { %413 = vperm.xlu1 %3216, %v123_v37  }
  0x88   :  { %418 = vperm.xlu2 %3215, %v124_v36  }
  0x89   :  { %v3504_v39 = vpop.permute.xlu1 %242 }
  0x8a   :  { %626 = vperm.xlu0 %3211, %v154_v38   ;;  %v3506_v40 = vpop.permute.xlu0 %234  ;;  %v302_v38 = vmul.f32 %v3576_v8, %v3467_v25 }
  0x8b   :  { %v1075_v51 = vmul.f32 %v3522_v46, %v3506_v40  ;;  %v1315_v52 = vmul.f32 %v3524_v47, %v3506_v40 }
  0x8d   :  { %v3514_v43 = vpop.permute.xlu2 %348 }
  0x8f   :  { %408 = vperm.xlu1 %3216, %v122_v45   ;;  %v1094_v45 = vmul.f32 %v3537_v53, %v3467_v25 }
  0x90   :  { %393 = vperm.xlu2 %3215, %v119_v44   ;;  %v837_v44 = vmul.f32 %v3591_v17, %v3489_v33 }
  0x92   :  { %641 = vperm.xlu0 %3211, %v157_v48   ;;  %v3539_v54 = vpop.permute.xlu1 %191  ;;  %v3547_v58 = vpop.permute.xlu0 %214  ;;  %v253_v48 = vmul.f32 %v3589_v16, %v3504_v39 }
  0x93   :  { %v1066_v56 = vmul.f32 %v3529_v49, %v3539_v54  ;;  %v1306_v57 = vmul.f32 %v3531_v50, %v3539_v54 }
  0x95   :  { %v1083_v61 = vadd.f32 %v1075_v51, %v1066_v56  ;;  %v1323_v62 = vadd.f32 %v1315_v52, %v1306_v57  ;;  %v838_v51 = vmul.f32 %v3591_v17, %v3504_v39  ;;  %v1077_v52 = vmul.f32 %v3522_v46, %v3504_v39 }
  0x96   :  { %v3559_v1 = vpop.permute.xlu2 %222  ;;  %v1317_v56 = vmul.f32 %v3524_v47, %v3504_v39  ;;  %v3645_v39 = vmul.f32 %v3591_v17, %v3478_v29 }
  0x97   :  { %383 = vperm.xlu1 %3216, %v117_v0   ;;  %v3564_v3 = vadd.f32 %v1092_v59, %v1083_v61  ;;  %v3572_v6 = vadd.f32 %v1332_v60, %v1323_v62  ;;  %v150_v0 = vld [vmem:[%s5016_s7 + $0x18] sm:$0xff] }
  0x98   :  { %388 = vperm.xlu2 %3215, %v118_v63  }
  0x9a   :  { %656 = vperm.xlu0 %3211, %v160_v2   ;;  %v3641_v2 = vmul.f32 %v3589_v16, %v3478_v29 }
  0x9b   :  { %v3574_v7 = vpop.permute.xlu1 %279 }
  0x9c   :  { %v197_v10 = vpop.permute.xlu0 %196 }
  0x9d   :  { %v1067_v13 = vmul.f32 %v3529_v49, %v197_v10  ;;  %v1307_v14 = vmul.f32 %v3531_v50, %v197_v10  ;;  %v211_v28 = vmul.f32 %v3593_v18, %v197_v10  ;;  %v828_v30 = vmul.f32 %v3595_v19, %v197_v10 }
  0x9f   :  { %v1084_v24 = vadd.f32 %v1076_v11, %v1067_v13  ;;  %v1324_v26 = vadd.f32 %v1316_v12, %v1307_v14  ;;  %v3604_v27 = vpop.permute.xlu2 %271  ;;  %378 = vperm.xlu1 %3216, %v116_v20   ;;  %v260_v33 = vadd.f32 %v252_v42, %v211_v28  ;;  %v845_v59 = vadd.f32 %v837_v44, %v828_v30 }
  0xa0   :  { %591 = vperm.xlu2 %3215, %v147_v15   ;;  %v1314_v15 = vmul.f32 %v3524_v47, %v3478_v29  ;;  %v251_v20 = vmul.f32 %v3589_v16, %v3506_v40  ;;  %v827_v29 = vmul.f32 %v3595_v19, %v3539_v54 }
  0xa1   :  { %v1101_v36 = vadd.f32 %v1093_v22, %v1084_v24  ;;  %v1341_v37 = vadd.f32 %v1333_v23, %v1324_v26  ;;  %v836_v22 = vmul.f32 %v3591_v17, %v3506_v40  ;;  %v210_v23 = vmul.f32 %v3593_v18, %v3539_v54 }
  0xa2   :  { %v309_v26 = vadd.f32 %v301_v31, %v260_v33  ;;  %v862_v30 = vadd.f32 %v854_v32, %v845_v59  ;;  %v300_v40 = vmul.f32 %v3576_v8, %v3493_v35 }
  0xa3   :  { %v259_v59 = vadd.f32 %v251_v20, %v210_v23  ;;  %v1091_v20 = vmul.f32 %v3537_v53, %v3574_v7 }
  0xa4   :  { %v202_v57 = vpop.permute.xlu0 %201  ;;  %v344_v63 = vpop.permute.xlu1 %343 }
  0xa5   :  { %v212_v60 = vmul.f32 %v3593_v18, %v202_v57  ;;  %v829_v61 = vmul.f32 %v3595_v19, %v202_v57  ;;  %v1068_v25 = vmul.f32 %v3529_v49, %v202_v57  ;;  %v1308_v62 = vmul.f32 %v3531_v50, %v202_v57 }
  0xa6   :  { %v1349_v10 = vadd.f32 %v1341_v37, %v344_v63  ;;  %v870_v31 = vadd.f32 %v862_v30, %v344_v63  ;;  %v3685_v57 = vmul.f32 %v3576_v8, %v3491_v34  ;;  %v1109_v33 = vadd.f32 %v1101_v36, %v344_v63 }
  0xa7   :  { %v1085_v11 = vadd.f32 %v1077_v52, %v1068_v25  ;;  %v1325_v12 = vadd.f32 %v1317_v56, %v1308_v62  ;;  %v261_v13 = vadd.f32 %v253_v48, %v212_v60  ;;  %v846_v14 = vadd.f32 %v838_v51, %v829_v61  ;;  %601 = vperm.xlu1 %3216, %v149_v5  }
  0xa8   :  { %v3660_v24 = vpop.permute.xlu2 %338  ;;  %606 = vperm.xlu2 %3215, %v150_v0   ;;  %v853_v51 = vmul.f32 %v3578_v9, %v3493_v35  ;;  %v357_v52 = vadd.f32 %v344_v63, %v309_v26  ;;  %v153_v35 = vld [vmem:[%s5016_s7 + $0x30] sm:$0xff]  ;;  %v844_v60 = vadd.f32 %v836_v22, %v827_v29  ;;  %v3692_v61 = vmul.f32 %v3578_v9, %v3491_v34 }
  0xa9   :  { %v310_v28 = vadd.f32 %v302_v38, %v261_v13  ;;  %v863_v37 = vadd.f32 %v855_v41, %v846_v14  ;;  %v1102_v42 = vadd.f32 %v1094_v45, %v1085_v11  ;;  %v1342_v44 = vadd.f32 %v1334_v21, %v1325_v12 }
  0xaa   :  { %v3666_v48 = vadd.f32 %v3572_v6, %v3660_v24  ;;  %v3696_v25 = vmul.f32 %v3541_v55, %v3491_v34  ;;  %v365_v5 = vmax.f32 %v357_v52, 0.0  ;;  %v878_v11 = vmax.f32 %v870_v31, 0.0 }
  0xab   :  { %v358_v32 = vadd.f32 %v3514_v43, %v310_v28  ;;  %v871_v41 = vadd.f32 %v863_v37, %v3514_v43  ;;  %v1110_v54 = vadd.f32 %v1102_v42, %v3514_v43  ;;  %v1350_v45 = vadd.f32 %v1342_v44, %v3514_v43  ;;  %v152_v43 = vld [vmem:[%s5016_s7 + $0x28] sm:$0xff] }
  0xac   :  { %v187_v38 = vpop.permute.xlu0 %186  ;;  %v3678_v56 = vpop.permute.xlu1 %181  ;;  %v1331_v22 = vmul.f32 %v3541_v55, %v3574_v7  ;;  %v1117_v23 = vmax.f32 %v1109_v33, 0.0  ;;  %v1357_v26 = vmax.f32 %v1349_v10, 0.0  ;;  %v1072_v52 = vmul.f32 %v3522_v46, %v3559_v1 }
  0xad   :  { %v1065_v6 = vmul.f32 %v3529_v49, %v187_v38  ;;  %v1305_v21 = vmul.f32 %v3531_v50, %v187_v38  ;;  %v366_v36 = vmax.f32 %v358_v32, 0.0  ;;  %v879_v63 = vmax.f32 %v871_v41, 0.0 }
  0xae   :  { %v1118_v13 = vmax.f32 %v1110_v54, 0.0  ;;  %v1358_v14 = vmax.f32 %v1350_v45, 0.0  ;;  %v1312_v10 = vmul.f32 %v3524_v47, %v3559_v1  ;;  %v1089_v31 = vmul.f32 %v3537_v53, %v3604_v27 }
  0xaf   :  { %v1082_v62 = vadd.f32 %v1074_v4, %v1065_v6  ;;  %v1322_v0 = vadd.f32 %v1314_v15, %v1305_v21  ;;  %616 = vperm.xlu1 %3216, %v152_v43   ;;  %v248_v4 = vmul.f32 %v3589_v16, %v3559_v1  ;;  %v833_v15 = vmul.f32 %v3591_v17, %v3559_v1  ;;  %v156_v21 = vld [vmem:[%s5016_s7 + $0x48] sm:$0xff]  ;;  %v155_v43 = vld [vmem:[%s5016_s7 + $0x40] sm:$0xff] }
  0xb0   :  { %621 = vperm.xlu2 %3215, %v153_v35   ;;  %v3698_v12 = vpop.permute.xlu2 %171  ;;  %v370_v28 = vpack.c.bf16 %v366_v36, %v365_v5  ;;  %v883_v30 = vpack.c.bf16 %v879_v63, %v878_v11  ;;  %v3708_v37 = vpack.c.bf16 %v1118_v13, %v1117_v23  ;;  %v3712_v42 = vpack.c.bf16 %v1358_v14, %v1357_v26 }
  0xb1   :  { %v3710_v29 = vadd.f32 %v1091_v20, %v1082_v62  ;;  %v3714_v44 = vadd.f32 %v1331_v22, %v1322_v0  ;;  %v1329_v41 = vmul.f32 %v3541_v55, %v3604_v27  ;;  %v209_v54 = vmul.f32 %v3593_v18, %v187_v38 }
  0xb2   :  { %520 = vmatpush.bf16.msra.mxu0 %v370_v28  ;;  %888 = vmatpush.bf16.msra.mxu2 %v883_v30  ;;  %v826_v1 = vmul.f32 %v3595_v19, %v187_v38  ;;  %v208_v35 = vmul.f32 %v3593_v18, %v3678_v56  ;;  %v308_v62 = vadd.f32 %v300_v40, %v259_v59 }
  0xb3   :  { %v861_v0 = vadd.f32 %v853_v51, %v844_v60  ;;  %v825_v5 = vmul.f32 %v3595_v19, %v3678_v56  ;;  %v1304_v11 = vmul.f32 %v3531_v50, %v3678_v56  ;;  %v258_v51 = vadd.f32 %v3641_v2, %v209_v54 }
  0xb4   :  { %v177_v32 = vpop.permute.xlu0 %176  ;;  %v843_v23 = vadd.f32 %v3645_v39, %v826_v1  ;;  %v297_v2 = vmul.f32 %v3576_v8, %v3604_v27 }
  0xb5   :  { %v1063_v45 = vmul.f32 %v3529_v49, %v177_v32  ;;  %v1303_v6 = vmul.f32 %v3531_v50, %v177_v32  ;;  %v3733_v33 = vpop.permute.xlu1 %226  ;;  %v207_v38 = vmul.f32 %v3593_v18, %v177_v32  ;;  %v824_v59 = vmul.f32 %v3595_v19, %v177_v32 }
  0xb6   :  { %v249_v13 = vmul.f32 %v3589_v16, %v3733_v33  ;;  %v834_v14 = vmul.f32 %v3591_v17, %v3733_v33  ;;  %v1313_v40 = vmul.f32 %v3524_v47, %v3733_v33  ;;  %v356_v32 = vadd.f32 %v3660_v24, %v308_v62 }
  0xb7   :  { %v1080_v36 = vadd.f32 %v1072_v52, %v1063_v45  ;;  %v1320_v63 = vadd.f32 %v1312_v10, %v1303_v6  ;;  %631 = vperm.xlu1 %3216, %v155_v43   ;;  %v299_v52 = vmul.f32 %v3576_v8, %v3574_v7  ;;  %v852_v10 = vmul.f32 %v3578_v9, %v3574_v7  ;;  %v159_v7 = vld [vmem:[%s5016_s7 + $0x60] sm:$0xff] }
  0xb8   :  { %636 = vperm.xlu2 %3215, %v156_v21   ;;  %v257_v26 = vadd.f32 %v249_v13, %v208_v35  ;;  %v842_v28 = vadd.f32 %v834_v14, %v825_v5  ;;  %v1321_v30 = vadd.f32 %v1313_v40, %v1304_v11  ;;  %v256_v54 = vadd.f32 %v248_v4, %v207_v38  ;;  %v158_v4 = vld [vmem:[%s5016_s7 + $0x58] sm:$0xff] }
  0xb9   :  { %v3751_v60 = vpop.permute.xlu2 %263  ;;  %v3753_v20 = vadd.f32 %v1089_v31, %v1080_v36  ;;  %v1337_v22 = vadd.f32 %v1329_v41, %v1320_v63  ;;  %v869_v41 = vadd.f32 %v861_v0, %v3660_v24  ;;  %v850_v6 = vmul.f32 %v3578_v9, %v3604_v27 }
  0xba   :  { %v306_v39 = vadd.f32 %v3685_v57, %v257_v26  ;;  %v1338_v45 = vadd.f32 %v3696_v25, %v1321_v30  ;;  %v841_v21 = vadd.f32 %v833_v15, %v824_v59  ;;  %v859_v1 = vadd.f32 %v3692_v61, %v842_v28 }
  0xbb   :  { %v307_v35 = vadd.f32 %v299_v52, %v258_v51  ;;  %v860_v43 = vadd.f32 %v852_v10, %v843_v23  ;;  %v1108_v57 = vadd.f32 %v3564_v3, %v3660_v24  ;;  %v364_v27 = vmax.f32 %v356_v32, 0.0 }
  0xbc   :  { %v3763_v31 = vpop.permute.xlu0 %328  ;;  %v877_v11 = vmax.f32 %v869_v41, 0.0  ;;  %v305_v61 = vadd.f32 %v297_v2, %v256_v54  ;;  %v858_v36 = vadd.f32 %v850_v6, %v841_v21  ;;  %v1356_v51 = vmax.f32 %v3666_v48, 0.0  ;;  %v161_v48 = vld [vmem:[%s5016_s7 + $0x70] sm:$0xff] }
  0xbd   :  { %v1346_v25 = vadd.f32 %v1338_v45, %v3763_v31  ;;  %v354_v15 = vadd.f32 %v3763_v31, %v306_v39  ;;  %v867_v63 = vadd.f32 %v859_v1, %v3763_v31  ;;  %v1116_v40 = vmax.f32 %v1108_v57, 0.0 }
  0xbe   :  { %v334_v62 = vpop.permute.xlu1 %333  ;;  %v1310_v1 = vmul.f32 %v3524_v47, %v3547_v58 }
  0xbf   :  { %v355_v0 = vadd.f32 %v334_v62, %v307_v35  ;;  %v868_v5 = vadd.f32 %v860_v43, %v334_v62  ;;  %646 = vperm.xlu1 %3216, %v158_v4   ;;  %v1107_v38 = vadd.f32 %v3710_v29, %v334_v62  ;;  %v1347_v13 = vadd.f32 %v3714_v44, %v334_v62  ;;  %v162_v44 = vld [vmem:[%s5016_s7 + $0x78] sm:$0xff] }
  0xc0   :  { %651 = vperm.xlu2 %3215, %v159_v7   ;;  %v362_v23 = vmax.f32 %v354_v15, 0.0  ;;  %v875_v54 = vmax.f32 %v867_v63, 0.0  ;;  %v1354_v7 = vmax.f32 %v1346_v25, 0.0  ;;  %v1327_v35 = vmul.f32 %v3541_v55, %v3751_v60 }
  0xc1   :  { %v363_v24 = vmax.f32 %v355_v0, 0.0  ;;  %v876_v14 = vmax.f32 %v868_v5, 0.0  ;;  %v1115_v28 = vmax.f32 %v1107_v38, 0.0  ;;  %v1355_v10 = vmax.f32 %v1347_v13, 0.0 }
  0xc2   :  { %v3784_v3 = vpop.permute.xlu2 %323  ;;  %v1302_v25 = vmul.f32 %v3531_v50, %v3698_v12 }
  0xc3   :  { %v353_v59 = vadd.f32 %v3784_v3, %v305_v61  ;;  %v866_v26 = vadd.f32 %v858_v36, %v3784_v3  ;;  %v369_v30 = vpack.c.bf16 %v364_v27, %v363_v24  ;;  %v882_v52 = vpack.c.bf16 %v877_v11, %v876_v14 }
  0xc4   :  { %v1345_v29 = vadd.f32 %v1337_v22, %v3784_v3  ;;  %v3793_v41 = vpack.c.bf16 %v1116_v40, %v1115_v28  ;;  %v3798_v39 = vpack.c.bf16 %v1356_v51, %v1355_v10  ;;  %v206_v61 = vmul.f32 %v3593_v18, %v3698_v12 }
  0xc5   :  { %v361_v2 = vmax.f32 %v353_v59, 0.0  ;;  %v874_v32 = vmax.f32 %v866_v26, 0.0  ;;  %521 = vmatpush.bf16.msra.mxu0 %v369_v30  ;;  %889 = vmatpush.bf16.msra.mxu2 %v882_v52  ;;  %v823_v36 = vmul.f32 %v3595_v19, %v3698_v12  ;;  %v246_v51 = vmul.f32 %v3589_v16, %v3547_v58 }
  0xc6   :  { %v1353_v45 = vmax.f32 %v1345_v29, 0.0  ;;  %v167_v6 = vpop.permute.xlu1 %166  ;;  %v831_v59 = vmul.f32 %v3591_v17, %v3547_v58  ;;  %v848_v28 = vmul.f32 %v3578_v9, %v3751_v60 }
  0xc7   :  { %v368_v22 = vpack.c.bf16 %v362_v23, %v361_v2  ;;  %v881_v21 = vpack.c.bf16 %v875_v54, %v874_v32  ;;  %v1301_v4 = vmul.f32 %v3531_v50, %v167_v6  ;;  %661 = vperm.xlu1 %3216, %v161_v48   ;;  %v205_v63 = vmul.f32 %v3593_v18, %v167_v6 }
  0xc8   :  { %666 = vperm.xlu2 %3215, %v162_v44   ;;  %v3805_v43 = vpack.c.bf16 %v1354_v7, %v1353_v45  ;;  %v822_v38 = vmul.f32 %v3595_v19, %v167_v6  ;;  %v295_v19 = vmul.f32 %v3576_v8, %v3751_v60  ;;  %v1070_v45 = vmul.f32 %v3522_v46, %v3547_v58 }
  0xc9   :  { %v1318_v57 = vadd.f32 %v1310_v1, %v1301_v4  ;;  %522 = vmatpush.bf16.msra.mxu0 %v368_v22  ;;  %890 = vmatpush.bf16.msra.mxu2 %v881_v21  ;;  %v254_v30 = vadd.f32 %v246_v51, %v205_v63  ;;  %v3912_v51 = vld [vmem:[%s5013_s4 + $0x30] sm:$0xff] }
  0xca   :  { %v839_v52 = vadd.f32 %v831_v59, %v822_v38  ;;  %v319_v10 = vpop.permute.xlu2 %318  ;;  %5082 = vst [vmem:[#allocation14_spill] sm:$0xff] %v3912_v51 }
  0xcb   :  { %v1335_v62 = vadd.f32 %v1327_v35, %v1318_v57  ;;  %v303_v2 = vadd.f32 %v295_v19, %v254_v30 }
  0xcc   :  { %v856_v32 = vadd.f32 %v848_v28, %v839_v52 }
  0xcf   :  { %v219_v27 = vpop.permute.xlu1 %218 }
  0xd0   :  { %v1311_v15 = vmul.f32 %v3524_v47, %v219_v27  ;;  %v247_v5 = vmul.f32 %v3589_v16, %v219_v27  ;;  %v832_v11 = vmul.f32 %v3591_v17, %v219_v27  ;;  %v1064_v16 = vmul.f32 %v3529_v49, %v3678_v56 }
  0xd1   :  { %v1062_v56 = vmul.f32 %v3529_v49, %v3698_v12  ;;  %v1071_v7 = vmul.f32 %v3522_v46, %v219_v27  ;;  %v1105_v12 = vadd.f32 %v3753_v20, %v3784_v3 }
  0xd2   :  { %v1319_v0 = vadd.f32 %v1311_v15, %v1302_v25  ;;  %v255_v13 = vadd.f32 %v247_v5, %v206_v61  ;;  %v840_v50 = vadd.f32 %v832_v11, %v823_v36  ;;  %v3929_v19 = vpop.permute.xlu2 %448 }
  0xd3   :  { %v1113_v61 = vmax.f32 %v1105_v12, 0.0 }
  0xd8   :  { %v268_v24 = vpop.permute.xlu1 %267 }
  0xd9   :  { %v296_v47 = vmul.f32 %v3576_v8, %v268_v24  ;;  %v849_v14 = vmul.f32 %v3578_v9, %v268_v24  ;;  %v1328_v40 = vmul.f32 %v3541_v55, %v268_v24  ;;  %v1073_v55 = vmul.f32 %v3522_v46, %v3733_v33  ;;  %v3849_v46 = vld [vmem:[%s5013_s4] sm:$0xff] }
  0xda   :  { %v1061_v8 = vmul.f32 %v3529_v49, %v167_v6  ;;  %v1090_v9 = vmul.f32 %v3537_v53, %v3491_v34  ;;  %v1087_v34 = vmul.f32 %v3537_v53, %v3751_v60  ;;  %v1088_v58 = vmul.f32 %v3537_v53, %v268_v24  ;;  %v3881_v24 = vld [vmem:[%s5013_s4 + $0x18] sm:$0xff]  ;;  %v3939_v52 = vpop.permute.xlu2 %423 }
  0xdb   :  { %v304_v23 = vadd.f32 %v296_v47, %v255_v13  ;;  %v857_v26 = vadd.f32 %v849_v14, %v840_v50  ;;  %v1336_v18 = vadd.f32 %v1328_v40, %v1319_v0  ;;  %v1081_v54 = vadd.f32 %v1073_v55, %v1064_v16  ;;  %5079 = vst [vmem:[#allocation11_spill] sm:$0xff] %v3881_v24  ;;  %v3890_v50 = vld [vmem:[%s5013_s4 + $0x20] sm:$0xff]  ;;  %v3899_v47 = vld [vmem:[%s5013_s4 + $0x28] sm:$0xff]  ;;  %v3907_v40 = vpop.permute.xlu0 %433 }
  0xdc   :  { %v1078_v15 = vadd.f32 %v1070_v45, %v1061_v8  ;;  %v1079_v49 = vadd.f32 %v1071_v7, %v1062_v56  ;;  %5080 = vst [vmem:[#allocation12_spill] sm:$0xff] %v3890_v50 }
  0xdd   :  { %v1344_v29 = vadd.f32 %v1336_v18, %v319_v10  ;;  %v352_v17 = vadd.f32 %v319_v10, %v304_v23  ;;  %v865_v44 = vadd.f32 %v857_v26, %v319_v10  ;;  %v1098_v0 = vadd.f32 %v1090_v9, %v1081_v54  ;;  %5081 = vst [vmem:[#allocation13_spill] sm:$0xff] %v3899_v47  ;;  %v3927_v18 = vld [vmem:[%s5013_s4 + $0x38] sm:$0xff] }
  0xde   :  { %v1095_v60 = vadd.f32 %v1087_v34, %v1078_v15  ;;  %v1096_v27 = vadd.f32 %v1088_v58, %v1079_v49  ;;  %5083 = vst [vmem:[#allocation15_spill] sm:$0xff] %v3927_v18 }
  0xdf   :  { %v360_v1 = vmax.f32 %v352_v17, 0.0  ;;  %v873_v4 = vmax.f32 %v865_v44, 0.0  ;;  %v1352_v25 = vmax.f32 %v1344_v29, 0.0  ;;  %v1106_v53 = vadd.f32 %v1098_v0, %v3763_v31  ;;  %v3863_v31 = vld [vmem:[%s5013_s4 + $0x8] sm:$0xff] }
  0xe0   :  { %v1104_v3 = vadd.f32 %v1096_v27, %v319_v10 }
  0xe1   :  { %v314_v48 = vpop.permute.xlu1 %313  ;;  %v1114_v20 = vmax.f32 %v1106_v53, 0.0 }
  0xe2   :  { %v351_v22 = vadd.f32 %v314_v48, %v303_v2  ;;  %v864_v33 = vadd.f32 %v856_v32, %v314_v48  ;;  %v1343_v21 = vadd.f32 %v1335_v62, %v314_v48  ;;  %v1103_v36 = vadd.f32 %v1095_v60, %v314_v48  ;;  %v3947_v16 = vpop.permute.xlu2 %418 }
  0xe3   :  { %v1120_v63 = vpack.c.bf16 %v1114_v20, %v1113_v61  ;;  %v3920_v23 = vpop.permute.xlu0 %428 }
  0xe4   :  { %v359_v35 = vmax.f32 %v351_v22, 0.0  ;;  %v872_v57 = vmax.f32 %v864_v33, 0.0  ;;  %v1351_v6 = vmax.f32 %v1343_v21, 0.0  ;;  %v1111_v38 = vmax.f32 %v1103_v36, 0.0 }
  0xe6   :  { %v367_v5 = vpack.c.bf16 %v360_v1, %v359_v35  ;;  %v880_v62 = vpack.c.bf16 %v873_v4, %v872_v57  ;;  %v3844_v11 = vpack.c.bf16 %v1352_v25, %v1351_v6 }
  0xe8   :  { %523 = vmatpush.bf16.msra.mxu0 %v367_v5  ;;  %891 = vmatpush.bf16.msra.mxu2 %v880_v62 }
  0xe9   :  { %v3905_v14 = vpop.permute.xlu1 %443 }
  0xea   :  { %v3959_v22 = vpop.permute.xlu2 %393 }
  0xeb   :  { %2624 = vmatmul.msk.bf16.vlgmr.msra.gmra.mxu0 %vm491_vm0, %v3849_v46  ;;  %2665 = vmatmul.msk.bf16.vlgmr.msra.gmra.mxu2 %vm491_vm0, %v3849_v46  ;;  %v3931_v28 = vpop.permute.xlu0 %403 }
  0xec   :  { %1127 = vmatpush.bf16.msrb.mxu0 %v3708_v37  ;;  %v1112_v37 = vmax.f32 %v1104_v3, 0.0 }
  0xee   :  { %v1119_v13 = vpack.c.bf16 %v1112_v37, %v1111_v38 }
  0xf0   :  { %1128 = vmatpush.bf16.msrb.mxu0 %v3793_v41  ;;  %v3872_v41 = vld [vmem:[%s5013_s4 + $0x10] sm:$0xff] }
  0xf1   :  { %v3914_v59 = vpop.permute.xlu1 %438 }
  0xf2   :  { %v3968_v1 = vpop.permute.xlu2 %388 }
  0xf3   :  { %v3941_v10 = vpop.permute.xlu0 %398 }
  0xf4   :  { %1129 = vmatpush.bf16.msrb.mxu0 %v1120_v63 }
  0xf8   :  { %1130 = vmatpush.bf16.msrb.mxu0 %v1119_v13 }
  0xf9   :  { %v3922_v26 = vpop.permute.xlu1 %413 }
  0xfb   :  { %2625 = vmatmul.msk.bf16.gmra.mxu0 %vm491_vm0, %v3863_v31  ;;  %2666 = vmatmul.msk.bf16.gmra.mxu2 %vm491_vm0, %v3863_v31  ;;  %v3949_v17 = vpop.permute.xlu0 %373 }
 0x101   :  { %v3937_v30 = vpop.permute.xlu1 %408 }
 0x109   :  { %v3943_v55 = vpop.permute.xlu1 %383 }
 0x10b   :  { %2626 = vmatmul.msk.bf16.gmra.mxu0 %vm491_vm0, %v3872_v41  ;;  %2667 = vmatmul.msk.bf16.gmra.mxu2 %vm491_vm0, %v3872_v41 }
 0x111   :  { %v3954_v32 = vpop.permute.xlu1 %378 }
 0x11b   :  { %2627 = vmatmul.msk.bf16.gmra.mxu0 %vm491_vm0, %v3881_v24  ;;  %2668 = vmatmul.msk.bf16.gmra.mxu2 %vm491_vm0, %v3881_v24 }
 0x12b   :  { %2628 = vmatmul.msk.bf16.gmra.mxu0 %vm491_vm0, %v3890_v50  ;;  %2669 = vmatmul.msk.bf16.gmra.mxu2 %vm491_vm0, %v3890_v50 }
 0x13b   :  { %2629 = vmatmul.msk.bf16.gmra.mxu0 %vm491_vm0, %v3899_v47  ;;  %2670 = vmatmul.msk.bf16.gmra.mxu2 %vm491_vm0, %v3899_v47 }
 0x14b   :  { %2630 = vmatmul.msk.bf16.gmra.mxu0 %vm491_vm0, %v3912_v51  ;;  %2671 = vmatmul.msk.bf16.gmra.mxu2 %vm491_vm0, %v3912_v51 }
 0x15b   :  { %2631 = vmatmul.msk.bf16.gmra.mxu0 %vm491_vm0, %v3927_v18  ;;  %2672 = vmatmul.msk.bf16.gmra.mxu2 %vm491_vm0, %v3927_v18 }
 0x168   :  { %v525_v29 = vpop.f32.mrf.mxu0 }
 0x169   :  { %v526_v2 = vadd.f32 %v525_v29, %v3949_v17 }
 0x16b   :  { %2673 = vmatmul.msk.bf16.vlgmr.msrb.gmra.mxu0 %vm491_vm0, %v3849_v46  ;;  %v565_v48 = vmax.f32 %v526_v2, 0.0 }
 0x16e   :  { %v3951_v44 = vpop.f32.mrf.mxu2 }
 0x170   :  { %v527_v54 = vpop.f32.mrf.mxu0 }
 0x171   :  { %v528_v8 = vadd.f32 %v527_v54, %v3954_v32 }
 0x173   :  { %v566_v9 = vmax.f32 %v528_v8, 0.0 }
 0x175   :  { %v3957_v45 = vpack.c.bf16 %v566_v9, %v565_v48 }
 0x176   :  { %v3961_v33 = vpop.f32.mrf.mxu2 }
 0x178   :  { %v530_v21 = vpop.f32.mrf.mxu0 }
 0x179   :  { %v531_v7 = vadd.f32 %v530_v21, %v3943_v55 }
 0x17b   :  { %2674 = vmatmul.msk.bf16.gmra.mxu0 %vm491_vm0, %v3863_v31  ;;  %v567_v57 = vmax.f32 %v531_v7, 0.0 }
 0x17e   :  { %v3965_v56 = vpop.f32.mrf.mxu2 }
 0x180   :  { %v532_v4 = vpop.f32.mrf.mxu0 }
 0x181   :  { %v533_v35 = vadd.f32 %v532_v4, %v3968_v1 }
 0x183   :  { %v568_v6 = vmax.f32 %v533_v35, 0.0 }
 0x185   :  { %v3971_v25 = vpack.c.bf16 %v568_v6, %v567_v57 }
 0x186   :  { %v3973_v34 = vpop.f32.mrf.mxu2 }
 0x188   :  { %v535_v15 = vpop.f32.mrf.mxu0 }
 0x189   :  { %v536_v0 = vadd.f32 %v535_v15, %v3959_v22 }
 0x18b   :  { %2675 = vmatmul.msk.bf16.gmra.mxu0 %vm491_vm0, %v3872_v41  ;;  %v569_v49 = vmax.f32 %v536_v0, 0.0 }
 0x18e   :  { %v3977_v58 = vpop.f32.mrf.mxu2 }
 0x190   :  { %v537_v5 = vpop.f32.mrf.mxu0 }
 0x191   :  { %v538_v62 = vadd.f32 %v537_v5, %v3941_v10 }
 0x193   :  { %v570_v12 = vmax.f32 %v538_v62, 0.0 }
 0x195   :  { %v3981_v53 = vpack.c.bf16 %v570_v12, %v569_v49 }
 0x196   :  { %v3983_v60 = vpop.f32.mrf.mxu2 }
 0x198   :  { %v540_v27 = vpop.f32.mrf.mxu0 }
 0x199   :  { %v541_v36 = vadd.f32 %v540_v27, %v3931_v28 }
 0x19b   :  { %2676 = vmatmul.msk.bf16.gmra.mxu0 %vm491_vm0, %v3881_v24  ;;  %v571_v63 = vmax.f32 %v541_v36, 0.0 }
 0x19e   :  { %v3987_v61 = vpop.f32.mrf.mxu2 }
 0x1a0   :  { %v542_v20 = vpop.f32.mrf.mxu0 }
 0x1a1   :  { %v543_v3 = vadd.f32 %v542_v20, %v3937_v30 }
 0x1a3   :  { %v572_v38 = vmax.f32 %v543_v3, 0.0 }
 0x1a5   :  { %v3991_v37 = vpack.c.bf16 %v572_v38, %v571_v63 }
 0x1a6   :  { %v3993_v13 = vpop.f32.mrf.mxu2 }
 0x1a8   :  { %v545_v29 = vpop.f32.mrf.mxu0 }
 0x1ab   :  { %2677 = vmatmul.msk.bf16.gmra.mxu0 %vm491_vm0, %v3890_v50 }
 0x1ae   :  { %v913_v2 = vpop.f32.mrf.mxu2 }
 0x1b0   :  { %v547_v54 = vpop.f32.mrf.mxu0 }
 0x1b6   :  { %v915_v8 = vpop.f32.mrf.mxu2 }
 0x1b8   :  { %v550_v48 = vpop.f32.mrf.mxu0 }
 0x1bb   :  { %2678 = vmatmul.msk.bf16.gmra.mxu0 %vm491_vm0, %v3899_v47 }
 0x1be   :  { %v918_v9 = vpop.f32.mrf.mxu2 }
 0x1c0   :  { %v552_v21 = vpop.f32.mrf.mxu0 }
 0x1c1   :  { %v553_v3 = vadd.f32 %v552_v21, %v3920_v23 }
 0x1c6   :  { %v920_v7 = vpop.f32.mrf.mxu2 }
 0x1c8   :  { %v555_v4 = vpop.f32.mrf.mxu0 }
 0x1c9   :  { %v556_v27 = vadd.f32 %v555_v4, %v3907_v40  ;;  %v576_v4 = vmax.f32 %v553_v3, 0.0 }
 0x1cb   :  { %2679 = vmatmul.msk.bf16.gmra.mxu0 %vm491_vm0, %v3912_v51  ;;  %v577_v50 = vmax.f32 %v556_v27, 0.0 }
 0x1ce   :  { %v923_v35 = vpop.f32.mrf.mxu2 }
 0x1cf   :  { %v924_v21 = vadd.f32 %v923_v35, %v3907_v40  ;;  %v916_v35 = vadd.f32 %v915_v8, %v3947_v16 }
 0x1d0   :  { %v557_v57 = vpop.f32.mrf.mxu0 }
 0x1d1   :  { %v558_v49 = vadd.f32 %v557_v57, %v3914_v59 }
 0x1d3   :  { %v578_v63 = vmax.f32 %v558_v49, 0.0 }
 0x1d6   :  { %v925_v6 = vpop.f32.mrf.mxu2 }
 0x1d8   :  { %v560_v15 = vpop.f32.mrf.mxu0 }
 0x1d9   :  { %v561_v5 = vadd.f32 %v560_v15, %v3905_v14  ;;  %v926_v15 = vadd.f32 %v925_v6, %v3914_v59 }
 0x1db   :  { %2680 = vmatmul.msk.bf16.gmra.mxu0 %vm491_vm0, %v3927_v18  ;;  %v579_v36 = vmax.f32 %v561_v5, 0.0  ;;  %v551_v18 = vadd.f32 %v550_v48, %v3939_v52  ;;  %v921_v48 = vadd.f32 %v920_v7, %v3920_v23  ;;  %v946_v27 = vmax.f32 %v926_v15, 0.0 }
 0x1dc   :  { %v911_v15 = vadd.f32 %v3993_v13, %v3937_v30 }
 0x1de   :  { %v928_v0 = vpop.f32.mrf.mxu2 }
 0x1df   :  { %v929_v38 = vadd.f32 %v928_v0, %v3905_v14 }
 0x1e0   :  { %v562_v62 = vpop.f32.mrf.mxu0 }
 0x1e1   :  { %v563_v12 = vadd.f32 %v562_v62, %v3929_v19  ;;  %v548_v62 = vadd.f32 %v547_v54, %v3947_v16  ;;  %v947_v49 = vmax.f32 %v929_v38, 0.0  ;;  %v945_v54 = vmax.f32 %v924_v21, 0.0 }
 0x1e2   :  { %v944_v38 = vmax.f32 %v921_v48, 0.0  ;;  %v940_v21 = vmax.f32 %v911_v15, 0.0 }
 0x1e3   :  { %v580_v20 = vmax.f32 %v563_v12, 0.0  ;;  %v587_v12 = vpack.c.bf16 %v578_v63, %v577_v50  ;;  %v955_v50 = vpack.c.bf16 %v946_v27, %v945_v54 }
 0x1e5   :  { %v588_v51 = vpack.c.bf16 %v580_v20, %v579_v36  ;;  %v546_v36 = vadd.f32 %v545_v29, %v3922_v26  ;;  %v575_v20 = vmax.f32 %v551_v18, 0.0  ;;  %v914_v18 = vadd.f32 %v913_v2, %v3922_v26 }
 0x1e6   :  { %v930_v47 = vpop.f32.mrf.mxu2 }
 0x1e7   :  { %v931_v57 = vadd.f32 %v930_v47, %v3929_v19  ;;  %717 = vmatpush.bf16.msra.mxu1 %v588_v51  ;;  %v574_v47 = vmax.f32 %v548_v62, 0.0  ;;  %v919_v51 = vadd.f32 %v918_v9, %v3939_v52  ;;  %v586_v3 = vpack.c.bf16 %v576_v4, %v575_v20 }
 0x1e8   :  { %v4013_v5 = vpop.f32.mrf.mxu0  ;;  %v573_v24 = vmax.f32 %v546_v36, 0.0  ;;  %v942_v9 = vmax.f32 %v916_v35, 0.0  ;;  %v909_v62 = vadd.f32 %v3987_v61, %v3931_v28  ;;  %v941_v8 = vmax.f32 %v914_v18, 0.0 }
 0x1e9   :  { %v948_v0 = vmax.f32 %v931_v57, 0.0  ;;  %v943_v29 = vmax.f32 %v919_v51, 0.0  ;;  %v906_v4 = vadd.f32 %v3983_v60, %v3941_v10  ;;  %v899_v60 = vadd.f32 %v3965_v56, %v3943_v55  ;;  %v4049_v56 = vld [vmem:[%s5015_s6] sm:$0xff] }
 0x1ea   :  { %v585_v7 = vpack.c.bf16 %v574_v47, %v573_v24  ;;  %v953_v2 = vpack.c.bf16 %v942_v9, %v941_v8  ;;  %v904_v24 = vadd.f32 %v3977_v58, %v3959_v22  ;;  %v939_v13 = vmax.f32 %v909_v62, 0.0 }
 0x1eb   :  { %718 = vmatpush.bf16.msra.mxu1 %v587_v12  ;;  %v956_v6 = vpack.c.bf16 %v948_v0, %v947_v49  ;;  %v954_v57 = vpack.c.bf16 %v944_v38, %v943_v29  ;;  %v901_v12 = vadd.f32 %v3973_v34, %v3968_v1  ;;  %v938_v61 = vmax.f32 %v906_v4, 0.0  ;;  %v4088_v4 = vld [vmem:[%s5015_s6 + $0x20] sm:$0xff] }
 0x1ec   :  { %v952_v0 = vpack.c.bf16 %v940_v21, %v939_v13  ;;  %v937_v36 = vmax.f32 %v904_v24, 0.0  ;;  %v894_v34 = vadd.f32 %v3951_v44, %v3949_v17  ;;  %v935_v27 = vmax.f32 %v899_v60, 0.0  ;;  %v4095_v24 = vld [vmem:[%s5015_s6 + $0x28] sm:$0xff] }
 0x1ed   :  { %957 = vmatpush.bf16.msra.mxu3 %v956_v6  ;;  %v936_v20 = vmax.f32 %v901_v12, 0.0 }
 0x1ee   :  { %v951_v58 = vpack.c.bf16 %v938_v61, %v937_v36  ;;  %v4105_v36 = vld [vmem:[%s5015_s6 + $0x30] sm:$0xff] }
 0x1ef   :  { %719 = vmatpush.bf16.msra.mxu1 %v586_v3 }
 0x1f0   :  { %v4020_v63 = vpop.f32.mrf.mxu0 }
 0x1f1   :  { %958 = vmatpush.bf16.msra.mxu3 %v955_v50  ;;  %v4074_v50 = vld [vmem:[%s5015_s6 + $0x10] sm:$0xff] }
 0x1f3   :  { %720 = vmatpush.bf16.msra.mxu1 %v585_v7 }
 0x1f5   :  { %959 = vmatpush.bf16.msra.mxu3 %v954_v57  ;;  %v4081_v57 = vld [vmem:[%s5015_s6 + $0x18] sm:$0xff] }
 0x1f7   :  { %721 = vmatpush.bf16.msra.mxu1 %v3991_v37  ;;  %v896_v37 = vadd.f32 %v3961_v33, %v3954_v32  ;;  %v950_v33 = vpack.c.bf16 %v936_v20, %v935_v27 }
 0x1f8   :  { %v4030_v49 = vpop.f32.mrf.mxu0 }
 0x1f9   :  { %960 = vmatpush.bf16.msra.mxu3 %v953_v2 }
 0x1fb   :  { %722 = vmatpush.bf16.msra.mxu1 %v3981_v53  ;;  %v934_v53 = vmax.f32 %v896_v37, 0.0 }
 0x1fd   :  { %961 = vmatpush.bf16.msra.mxu3 %v952_v0 }
 0x1ff   :  { %723 = vmatpush.bf16.msra.mxu1 %v3971_v25  ;;  %v933_v25 = vmax.f32 %v894_v34, 0.0 }
 0x200   :  { %v4042_v48 = vpop.f32.mrf.mxu0 }
 0x201   :  { %962 = vmatpush.bf16.msra.mxu3 %v951_v58  ;;  %v949_v6 = vpack.c.bf16 %v934_v53, %v933_v25 }
 0x203   :  { %724 = vmatpush.bf16.msra.mxu1 %v3957_v45  ;;  %v4063_v45 = vld [vmem:[%s5015_s6 + $0x8] sm:$0xff] }
 0x205   :  { %963 = vmatpush.bf16.msra.mxu3 %v950_v33 }
 0x206   :  { %725 = vmatmul.bf16.vlgmr.msra.gmra.mxu1 %v4049_v56 }
 0x207   :  { %1367 = vmatpush.bf16.msrb.mxu1 %v3712_v42 }
 0x208   :  { %v1142_v47 = vpop.f32.mrf.mxu0 }
 0x209   :  { %964 = vmatpush.bf16.msra.mxu3 %v949_v6  ;;  %v1143_v44 = vadd.f32 %v1142_v47, %v3959_v22 }
 0x20b   :  { %1368 = vmatpush.bf16.msrb.mxu1 %v3798_v39  ;;  %v1176_v54 = vmax.f32 %v1143_v44, 0.0 }
 0x20c   :  { %965 = vmatmul.bf16.vlgmr.msra.gmra.mxu3 %v4049_v56 }
 0x20f   :  { %1369 = vmatpush.bf16.msrb.mxu1 %v3805_v43 }
 0x210   :  { %v1144_v51 = vpop.f32.mrf.mxu0 }
 0x211   :  { %v1145_v42 = vadd.f32 %v1144_v51, %v3941_v10 }
 0x213   :  { %1370 = vmatpush.bf16.msrb.mxu1 %v3844_v11  ;;  %v1177_v3 = vmax.f32 %v1145_v42, 0.0 }
 0x215   :  { %v4065_v39 = vpack.c.bf16 %v1177_v3, %v1176_v54 }
 0x216   :  { %730 = vmatmul.bf16.gmra.mxu1 %v4063_v45 }
 0x218   :  { %v1147_v35 = vpop.f32.mrf.mxu0 }
 0x219   :  { %v1148_v43 = vadd.f32 %v1147_v35, %v3931_v28 }
 0x21b   :  { %v1178_v18 = vmax.f32 %v1148_v43, 0.0 }
 0x21c   :  { %970 = vmatmul.bf16.gmra.mxu3 %v4063_v45 }
 0x220   :  { %v1149_v38 = vpop.f32.mrf.mxu0 }
 0x221   :  { %v1150_v11 = vadd.f32 %v1149_v38, %v3937_v30  ;;  %v4117_v38 = vld [vmem:[%s5015_s6 + $0x38] sm:$0xff] }
 0x222   :  { %5084 = vst [vmem:[#allocation16_spill] sm:$0xff] %v4117_v38 }
 0x223   :  { %v1179_v29 = vmax.f32 %v1150_v11, 0.0  ;;  %v1140_v11 = vadd.f32 %v4042_v48, %v3968_v1 }
 0x225   :  { %v1191_v7 = vpack.c.bf16 %v1179_v29, %v1178_v18  ;;  %v1138_v18 = vadd.f32 %v4030_v49, %v3943_v55  ;;  %v1135_v29 = vadd.f32 %v4020_v63, %v3954_v32 }
 0x226   :  { %735 = vmatmul.bf16.gmra.mxu1 %v4074_v50 }
 0x228   :  { %v1152_v15 = vpop.f32.mrf.mxu0 }
 0x229   :  { %v1153_v51 = vadd.f32 %v1152_v15, %v3922_v26  ;;  %v1175_v15 = vmax.f32 %v1140_v11, 0.0 }
 0x22b   :  { %v1180_v35 = vmax.f32 %v1153_v51, 0.0 }
 0x22c   :  { %975 = vmatmul.bf16.gmra.mxu3 %v4074_v50 }
 0x230   :  { %v1154_v9 = vpop.f32.mrf.mxu0 }
 0x231   :  { %v1155_v6 = vadd.f32 %v1154_v9, %v3947_v16  ;;  %v1133_v9 = vadd.f32 %v4013_v5, %v3949_v17  ;;  %v4136_v5 = vpop.permute.xlu0 %596 }
 0x233   :  { %v1181_v54 = vmax.f32 %v1155_v6, 0.0 }
 0x235   :  { %v1192_v43 = vpack.c.bf16 %v1181_v54, %v1180_v35  ;;  %v5086_v35 = vld [vmem:[#allocation12_spill] sm:$0xff] }
 0x236   :  { %740 = vmatmul.bf16.gmra.mxu1 %v4081_v57 }
 0x238   :  { %v1157_v62 = vpop.f32.mrf.mxu0 }
 0x239   :  { %v1158_v33 = vadd.f32 %v1157_v62, %v3939_v52  ;;  %v1174_v62 = vmax.f32 %v1138_v18, 0.0 }
 0x23b   :  { %v1182_v42 = vmax.f32 %v1158_v33, 0.0  ;;  %v1189_v48 = vpack.c.bf16 %v1175_v15, %v1174_v62  ;;  %v5087_v62 = vld [vmem:[#allocation13_spill] sm:$0xff] }
 0x23c   :  { %980 = vmatmul.bf16.gmra.mxu3 %v4081_v57 }
 0x240   :  { %v1159_v8 = vpop.f32.mrf.mxu0 }
 0x241   :  { %v1160_v34 = vadd.f32 %v1159_v8, %v3920_v23  ;;  %v1173_v8 = vmax.f32 %v1135_v29, 0.0 }
 0x243   :  { %v1183_v47 = vmax.f32 %v1160_v34, 0.0 }
 0x245   :  { %v1193_v3 = vpack.c.bf16 %v1183_v47, %v1182_v42  ;;  %v5085_v47 = vld [vmem:[#allocation11_spill] sm:$0xff] }
 0x246   :  { %745 = vmatmul.bf16.gmra.mxu1 %v4088_v4 }
 0x248   :  { %v1162_v21 = vpop.f32.mrf.mxu0 }
 0x249   :  { %v1163_v37 = vadd.f32 %v1162_v21, %v3907_v40  ;;  %v1172_v21 = vmax.f32 %v1133_v9, 0.0 }
 0x24b   :  { %v1184_v25 = vmax.f32 %v1163_v37, 0.0 }
 0x24c   :  { %985 = vmatmul.bf16.gmra.mxu3 %v4088_v4 }
 0x250   :  { %v1164_v2 = vpop.f32.mrf.mxu0 }
 0x251   :  { %v1165_v0 = vadd.f32 %v1164_v2, %v3914_v59  ;;  %v1188_v2 = vpack.c.bf16 %v1173_v8, %v1172_v21 }
 0x253   :  { %v1185_v27 = vmax.f32 %v1165_v0, 0.0 }
 0x255   :  { %v1194_v44 = vpack.c.bf16 %v1185_v27, %v1184_v25 }
 0x256   :  { %750 = vmatmul.bf16.gmra.mxu1 %v4095_v24 }
 0x258   :  { %v1167_v13 = vpop.f32.mrf.mxu0 }
 0x259   :  { %v1168_v12 = vadd.f32 %v1167_v13, %v3905_v14  ;;  %v4130_v13 = vpop.permute.xlu2 %591 }
 0x25b   :  { %v1186_v20 = vmax.f32 %v1168_v12, 0.0  ;;  %v4139_v12 = vpop.permute.xlu1 %601 }
 0x25c   :  { %990 = vmatmul.bf16.gmra.mxu3 %v4095_v24 }
 0x260   :  { %v1169_v61 = vpop.f32.mrf.mxu0 }
 0x261   :  { %v1170_v60 = vadd.f32 %v1169_v61, %v3929_v19 }
 0x263   :  { %v1187_v58 = vmax.f32 %v1170_v60, 0.0  ;;  %v4145_v60 = vpop.permute.xlu2 %606  ;;  %v4154_v27 = vpop.permute.xlu1 %616 }
 0x265   :  { %v1195_v53 = vpack.c.bf16 %v1187_v58, %v1186_v20  ;;  %v4148_v20 = vpop.permute.xlu0 %611 }
 0x266   :  { %755 = vmatmul.bf16.gmra.mxu1 %v4105_v36 }
 0x267   :  { %1196 = vmatpush.bf16.msrb.mxu2 %v1195_v53 }
 0x26b   :  { %1197 = vmatpush.bf16.msrb.mxu2 %v1194_v44  ;;  %v4157_v33 = vpop.permute.xlu2 %621  ;;  %v4166_v42 = vpop.permute.xlu1 %631 }
 0x26c   :  { %995 = vmatmul.bf16.gmra.mxu3 %v4105_v36 }
 0x26d   :  { %v4163_v44 = vpop.permute.xlu0 %626 }
 0x26f   :  { %1198 = vmatpush.bf16.msrb.mxu2 %v1193_v3 }
 0x273   :  { %1199 = vmatpush.bf16.msrb.mxu2 %v1192_v43  ;;  %v4172_v43 = vpop.permute.xlu2 %636  ;;  %v4181_v8 = vpop.permute.xlu1 %646 }
 0x275   :  { %v4175_v29 = vpop.permute.xlu0 %641 }
 0x276   :  { %760 = vmatmul.bf16.gmra.mxu1 %v4117_v38 }
 0x277   :  { %1200 = vmatpush.bf16.msrb.mxu2 %v1191_v7 }
 0x27b   :  { %1201 = vmatpush.bf16.msrb.mxu2 %v4065_v39 }
 0x27c   :  { %1000 = vmatmul.bf16.gmra.mxu3 %v4117_v38 }
 0x27f   :  { %1202 = vmatpush.bf16.msrb.mxu2 %v1189_v48 }
 0x283   :  { %v726_v49 = vpop.f32.mrf.mxu1  ;;  %1203 = vmatpush.bf16.msrb.mxu2 %v1188_v2  ;;  %v4184_v2 = vpop.permute.xlu2 %651 }
 0x284   :  { %v727_v63 = vadd.f32 %v726_v49, %v4130_v13 }
 0x286   :  { %1204 = vmatmul.bf16.vlgmr.msrb.gmra.mxu2 %v4049_v56  ;;  %2682 = vmatmul.msk.bf16.vlgmr.msrb.gmra.mxu1 %vm491_vm0, %v3849_v46 }
 0x287   :  { %766 = vxpose.xlu2.b32.start [1/16] %v727_v63, 128 }
 0x28b   :  { %v728_v39 = vpop.f32.mrf.mxu1 }
 0x28c   :  { %v729_v7 = vadd.f32 %v728_v39, %v4136_v5  ;;  %v5088_v39 = vld [vmem:[#allocation14_spill] sm:$0xff] }
 0x28f   :  { %767 = vxpose.xlu2.b32.cont [2/16] %v729_v7, 128  ;;  %v4190_v7 = vpop.permute.xlu0 %656 }
 0x293   :  { %v731_v61 = vpop.f32.mrf.mxu1 }
 0x294   :  { %v732_v0 = vadd.f32 %v731_v61, %v4139_v12 }
 0x296   :  { %1209 = vmatmul.bf16.gmra.mxu2 %v4063_v45  ;;  %2683 = vmatmul.msk.bf16.gmra.mxu1 %vm491_vm0, %v3863_v31 }
 0x297   :  { %768 = vxpose.xlu2.b32.cont [3/16] %v732_v0, 128 }
 0x29b   :  { %v733_v46 = vpop.f32.mrf.mxu1 }
 0x29c   :  { %v734_v37 = vadd.f32 %v733_v46, %v4145_v60  ;;  %v4193_v46 = vpop.permute.xlu1 %661 }
 0x29f   :  { %769 = vxpose.xlu2.b32.cont [4/16] %v734_v37, 128 }
 0x2a3   :  { %v736_v58 = vpop.f32.mrf.mxu1 }
 0x2a4   :  { %v737_v34 = vadd.f32 %v736_v58, %v4148_v20 }
 0x2a6   :  { %1214 = vmatmul.bf16.gmra.mxu2 %v4074_v50  ;;  %2684 = vmatmul.msk.bf16.gmra.mxu1 %vm491_vm0, %v3872_v41 }
 0x2a7   :  { %770 = vxpose.xlu2.b32.cont [5/16] %v737_v34, 128  ;;  %v5089_v34 = vld [vmem:[#allocation15_spill] sm:$0xff] }
 0x2ab   :  { %v738_v31 = vpop.f32.mrf.mxu1 }
 0x2ac   :  { %v739_v53 = vadd.f32 %v738_v31, %v4154_v27  ;;  %v4199_v31 = vpop.permute.xlu2 %666 }
 0x2af   :  { %771 = vxpose.xlu2.b32.cont [6/16] %v739_v53, 128 }
 0x2b3   :  { %v741_v25 = vpop.f32.mrf.mxu1 }
 0x2b4   :  { %v742_v6 = vadd.f32 %v741_v25, %v4157_v33 }
 0x2b6   :  { %1219 = vmatmul.bf16.gmra.mxu2 %v4081_v57  ;;  %2685 = vmatmul.msk.bf16.gmra.mxu1 %vm491_vm0, %v5085_v47 }
 0x2b7   :  { %772 = vxpose.xlu2.b32.cont [7/16] %v742_v6, 128 }
 0x2bb   :  { %v743_v41 = vpop.f32.mrf.mxu1 }
 0x2bc   :  { %v744_v51 = vadd.f32 %v743_v41, %v4163_v44 }
 0x2bf   :  { %773 = vxpose.xlu2.b32.cont [8/16] %v744_v51, 128 }
 0x2c3   :  { %v746_v54 = vpop.f32.mrf.mxu1 }
 0x2c4   :  { %v747_v3 = vadd.f32 %v746_v54, %v4166_v42 }
 0x2c6   :  { %1224 = vmatmul.bf16.gmra.mxu2 %v4088_v4  ;;  %2686 = vmatmul.msk.bf16.gmra.mxu1 %vm491_vm0, %v5086_v35 }
 0x2c7   :  { %774 = vxpose.xlu2.b32.cont [9/16] %v747_v3, 128 }
 0x2cb   :  { %v748_v11 = vpop.f32.mrf.mxu1 }
 0x2cc   :  { %v749_v18 = vadd.f32 %v748_v11, %v4172_v43 }
 0x2cf   :  { %775 = vxpose.xlu2.b32.cont [10/16] %v749_v18, 128 }
 0x2d3   :  { %v751_v15 = vpop.f32.mrf.mxu1 }
 0x2d4   :  { %v752_v9 = vadd.f32 %v751_v15, %v4175_v29 }
 0x2d6   :  { %1229 = vmatmul.bf16.gmra.mxu2 %v4095_v24  ;;  %2687 = vmatmul.msk.bf16.gmra.mxu1 %vm491_vm0, %v5087_v62 }
 0x2d7   :  { %776 = vxpose.xlu2.b32.cont [11/16] %v752_v9, 128 }
 0x2db   :  { %v753_v48 = vpop.f32.mrf.mxu1 }
 0x2dc   :  { %v754_v21 = vadd.f32 %v753_v48, %v4181_v8 }
 0x2df   :  { %777 = vxpose.xlu2.b32.cont [12/16] %v754_v21, 128 }
 0x2e3   :  { %v756_v49 = vpop.f32.mrf.mxu1 }
 0x2e4   :  { %v757_v63 = vadd.f32 %v756_v49, %v4184_v2 }
 0x2e6   :  { %1234 = vmatmul.bf16.gmra.mxu2 %v4105_v36  ;;  %2688 = vmatmul.msk.bf16.gmra.mxu1 %vm491_vm0, %v5088_v39 }
 0x2e7   :  { %778 = vxpose.xlu2.b32.cont [13/16] %v757_v63, 128 }
 0x2eb   :  { %v758_v61 = vpop.f32.mrf.mxu1 }
 0x2ec   :  { %v759_v0 = vadd.f32 %v758_v61, %v4190_v7 }
 0x2ef   :  { %779 = vxpose.xlu2.b32.cont [14/16] %v759_v0, 128 }
 0x2f3   :  { %v761_v37 = vpop.f32.mrf.mxu1 }
 0x2f4   :  { %v762_v58 = vadd.f32 %v761_v37, %v4193_v46 }
 0x2f6   :  { %1239 = vmatmul.bf16.gmra.mxu2 %v4117_v38  ;;  %2689 = vmatmul.msk.bf16.gmra.mxu1 %vm491_vm0, %v5089_v34 }
 0x2f7   :  { %780 = vxpose.xlu2.b32.cont [15/16] %v762_v58, 128 }
 0x2fb   :  { %v763_v53 = vpop.f32.mrf.mxu1 }
 0x2fc   :  { %v764_v25 = vadd.f32 %v763_v53, %v4199_v31 }
 0x2ff   :  { %781 = vxpose.xlu2.b32.end [16/16] %v764_v25, 128 }
 0x303   :  { %v4202_v6 = vpop.f32.mrf.mxu1 }
 0x309   :  { %v1205_v47 = vpop.f32.mrf.mxu2 }
 0x30a   :  { %v1206_v41 = vadd.f32 %v1205_v47, %v4130_v13 }
 0x30b   :  { %v4205_v51 = vpop.f32.mrf.mxu1 }
 0x30c   :  { %1245 = vxpose.xlu0.b32.start [1/16] %v1206_v41, 128 }
 0x311   :  { %v1207_v54 = vpop.f32.mrf.mxu2 }
 0x312   :  { %v1208_v3 = vadd.f32 %v1207_v54, %v4136_v5 }
 0x313   :  { %v4208_v35 = vpop.f32.mrf.mxu1 }
 0x314   :  { %1246 = vxpose.xlu0.b32.cont [2/16] %v1208_v3, 128 }
 0x319   :  { %v1210_v11 = vpop.f32.mrf.mxu2 }
 0x31a   :  { %v1211_v18 = vadd.f32 %v1210_v11, %v4139_v12 }
 0x31b   :  { %v4211_v15 = vpop.f32.mrf.mxu1 }
 0x31c   :  { %1247 = vxpose.xlu0.b32.cont [3/16] %v1211_v18, 128 }
 0x321   :  { %v1212_v9 = vpop.f32.mrf.mxu2 }
 0x322   :  { %v1213_v62 = vadd.f32 %v1212_v9, %v4145_v60 }
 0x323   :  { %v1382_v48 = vpop.f32.mrf.mxu1 }
 0x324   :  { %1248 = vxpose.xlu0.b32.cont [4/16] %v1213_v62, 128  ;;  %v1383_v49 = vadd.f32 %v1382_v48, %v3959_v22 }
 0x326   :  { %v1416_v0 = vmax.f32 %v1383_v49, 0.0 }
 0x329   :  { %v1215_v21 = vpop.f32.mrf.mxu2 }
 0x32a   :  { %v1216_v63 = vadd.f32 %v1215_v21, %v4148_v20 }
 0x32b   :  { %v1384_v39 = vpop.f32.mrf.mxu1 }
 0x32c   :  { %v1385_v61 = vadd.f32 %v1384_v39, %v3941_v10  ;;  %1249 = vxpose.xlu0.b32.cont [5/16] %v1216_v63, 128 }
 0x32e   :  { %v1417_v37 = vmax.f32 %v1385_v61, 0.0 }
 0x330   :  { %v4217_v58 = vpack.c.bf16 %v1417_v37, %v1416_v0 }
 0x331   :  { %v1217_v34 = vpop.f32.mrf.mxu2 }
 0x332   :  { %v1218_v53 = vadd.f32 %v1217_v34, %v4154_v27 }
 0x333   :  { %v1387_v25 = vpop.f32.mrf.mxu1 }
 0x334   :  { %1250 = vxpose.xlu0.b32.cont [6/16] %v1218_v53, 128  ;;  %v1388_v41 = vadd.f32 %v1387_v25, %v3931_v28 }
 0x336   :  { %v1418_v10 = vmax.f32 %v1388_v41, 0.0 }
 0x339   :  { %v1220_v47 = vpop.f32.mrf.mxu2 }
 0x33a   :  { %v1221_v22 = vadd.f32 %v1220_v47, %v4157_v33  ;;  %v966_v47 = vpop.f32.mrf.mxu3 }
 0x33b   :  { %v1389_v54 = vpop.f32.mrf.mxu1 }
 0x33c   :  { %v1390_v3 = vadd.f32 %v1389_v54, %v3937_v30  ;;  %1251 = vxpose.xlu0.b32.cont [7/16] %v1221_v22, 128 }
 0x33e   :  { %v1419_v11 = vmax.f32 %v1390_v3, 0.0 }
 0x340   :  { %v4223_v18 = vpack.c.bf16 %v1419_v11, %v1418_v10 }
 0x341   :  { %v1222_v9 = vpop.f32.mrf.mxu2 }
 0x342   :  { %v1223_v62 = vadd.f32 %v1222_v9, %v4163_v44  ;;  %v968_v11 = vpop.f32.mrf.mxu3 }
 0x343   :  { %v1392_v48 = vpop.f32.mrf.mxu1 }
 0x344   :  { %1252 = vxpose.xlu0.b32.cont [8/16] %v1223_v62, 128 }
 0x349   :  { %v1225_v21 = vpop.f32.mrf.mxu2 }
 0x34a   :  { %v1226_v49 = vadd.f32 %v1225_v21, %v4166_v42 }
 0x34b   :  { %v1394_v63 = vpop.f32.mrf.mxu1 }
 0x34c   :  { %1253 = vxpose.xlu0.b32.cont [9/16] %v1226_v49, 128 }
 0x351   :  { %v1227_v28 = vpop.f32.mrf.mxu2 }
 0x352   :  { %v1228_v39 = vadd.f32 %v1227_v28, %v4172_v43 }
 0x353   :  { %v1397_v61 = vpop.f32.mrf.mxu1 }
 0x354   :  { %1254 = vxpose.xlu0.b32.cont [10/16] %v1228_v39, 128 }
 0x359   :  { %v1230_v30 = vpop.f32.mrf.mxu2 }
 0x35a   :  { %v1231_v0 = vadd.f32 %v1230_v30, %v4175_v29 }
 0x35b   :  { %v1399_v37 = vpop.f32.mrf.mxu1 }
 0x35c   :  { %1255 = vxpose.xlu0.b32.cont [11/16] %v1231_v0, 128  ;;  %v971_v0 = vpop.f32.mrf.mxu3 }
 0x361   :  { %v1232_v34 = vpop.f32.mrf.mxu2 }
 0x362   :  { %v1233_v53 = vadd.f32 %v1232_v34, %v4181_v8 }
 0x363   :  { %v1402_v25 = vpop.f32.mrf.mxu1 }
 0x364   :  { %1256 = vxpose.xlu0.b32.cont [12/16] %v1233_v53, 128  ;;  %v1403_v34 = vadd.f32 %v1402_v25, %v3907_v40  ;;  %v1393_v40 = vadd.f32 %v1392_v48, %v3922_v26  ;;  %v969_v26 = vadd.f32 %v968_v11, %v4136_v5  ;;  %v1378_v48 = vadd.f32 %v4208_v35, %v3943_v55 }
 0x365   :  { %v972_v11 = vadd.f32 %v971_v0, %v4139_v12 }
 0x369   :  { %v1235_v41 = vpop.f32.mrf.mxu2 }
 0x36a   :  { %v1236_v22 = vadd.f32 %v1235_v41, %v4184_v2 }
 0x36b   :  { %v1404_v54 = vpop.f32.mrf.mxu1 }
 0x36c   :  { %1257 = vxpose.xlu0.b32.cont [13/16] %v1236_v22, 128  ;;  %v1405_v39 = vadd.f32 %v1404_v54, %v3914_v59  ;;  %v1400_v22 = vadd.f32 %v1399_v37, %v3920_v23  ;;  %v1395_v59 = vadd.f32 %v1394_v63, %v3947_v16  ;;  %v1380_v16 = vadd.f32 %v4211_v15, %v3968_v1 }
 0x36e   :  { %v1421_v23 = vmax.f32 %v1395_v59, 0.0 }
 0x371   :  { %v1237_v3 = vpop.f32.mrf.mxu2 }
 0x372   :  { %v1238_v10 = vadd.f32 %v1237_v3, %v4190_v7  ;;  %v1425_v3 = vmax.f32 %v1405_v39, 0.0  ;;  %v1373_v39 = vadd.f32 %v4202_v6, %v3949_v17 }
 0x373   :  { %v1407_v9 = vpop.f32.mrf.mxu1 }
 0x374   :  { %1258 = vxpose.xlu0.b32.cont [14/16] %v1238_v10, 128  ;;  %v1408_v21 = vadd.f32 %v1407_v9, %v3905_v14  ;;  %v1398_v14 = vadd.f32 %v1397_v61, %v3939_v52  ;;  %v1424_v9 = vmax.f32 %v1403_v34, 0.0  ;;  %v1375_v61 = vadd.f32 %v4205_v51, %v3954_v32 }
 0x375   :  { %v1412_v55 = vmax.f32 %v1373_v39, 0.0 }
 0x376   :  { %v1426_v53 = vmax.f32 %v1408_v21, 0.0  ;;  %v1434_v54 = vpack.c.bf16 %v1425_v3, %v1424_v9  ;;  %v1422_v25 = vmax.f32 %v1398_v14, 0.0  ;;  %v973_v21 = vpop.f32.mrf.mxu3  ;;  %v1413_v1 = vmax.f32 %v1375_v61, 0.0 }
 0x377   :  { %v974_v17 = vadd.f32 %v973_v21, %v4145_v60 }
 0x379   :  { %v1240_v62 = vpop.f32.mrf.mxu2 }
 0x37a   :  { %v1241_v49 = vadd.f32 %v1240_v62, %v4193_v46 }
 0x37b   :  { %v1409_v28 = vpop.f32.mrf.mxu1 }
 0x37c   :  { %v1410_v30 = vadd.f32 %v1409_v28, %v3929_v19  ;;  %1259 = vxpose.xlu0.b32.cont [15/16] %v1241_v49, 128  ;;  %v1423_v19 = vmax.f32 %v1400_v22, 0.0  ;;  %v967_v49 = vadd.f32 %v966_v47, %v4130_v13  ;;  %v1420_v28 = vmax.f32 %v1393_v40, 0.0 }
 0x37d   :  { %v1415_v47 = vmax.f32 %v1380_v16, 0.0 }
 0x37e   :  { %v1427_v41 = vmax.f32 %v1410_v30, 0.0  ;;  %v1433_v37 = vpack.c.bf16 %v1423_v19, %v1422_v25  ;;  %v1432_v52 = vpack.c.bf16 %v1421_v23, %v1420_v28  ;;  %v976_v63 = vpop.f32.mrf.mxu3  ;;  %v1414_v30 = vmax.f32 %v1378_v48, 0.0 }
 0x380   :  { %v1435_v10 = vpack.c.bf16 %v1427_v41, %v1426_v53  ;;  %v1429_v15 = vpack.c.bf16 %v1415_v47, %v1414_v30 }
 0x381   :  { %v1242_v38 = vpop.f32.mrf.mxu2 }
 0x382   :  { %v1243_v62 = vadd.f32 %v1242_v38, %v4199_v31  ;;  %1436 = vmatpush.bf16.msrb.mxu3 %v1435_v10  ;;  %v4245_v38 = vpop.trf.xlu2 }
 0x384   :  { %1260 = vxpose.xlu0.b32.end [16/16] %v1243_v62, 128 }
 0x386   :  { %1437 = vmatpush.bf16.msrb.mxu3 %v1434_v54  ;;  %v978_v35 = vpop.f32.mrf.mxu3 }
 0x387   :  { %v979_v22 = vadd.f32 %v978_v35, %v4154_v27 }
 0x38a   :  { %1438 = vmatpush.bf16.msrb.mxu3 %v1433_v37  ;;  %v4256_v34 = vpop.trf.xlu2 }
 0x38c   :  { %1006 = vxpose.xlu0.b32.start [1/16] %v967_v49, 128 }
 0x38e   :  { %1439 = vmatpush.bf16.msrb.mxu3 %v1432_v52  ;;  %v981_v6 = vpop.f32.mrf.mxu3 }
 0x38f   :  { %v982_v9 = vadd.f32 %v981_v6, %v4157_v33 }
 0x392   :  { %1440 = vmatpush.bf16.msrb.mxu3 %v4223_v18  ;;  %v1428_v18 = vpack.c.bf16 %v1413_v1, %v1412_v55  ;;  %v4259_v32 = vpop.trf.xlu2 }
 0x394   :  { %1007 = vxpose.xlu0.b32.cont [2/16] %v969_v26, 128 }
 0x396   :  { %1441 = vmatpush.bf16.msrb.mxu3 %v4217_v58  ;;  %v977_v58 = vadd.f32 %v976_v63, %v4148_v20  ;;  %v983_v0 = vpop.f32.mrf.mxu3 }
 0x397   :  { %v984_v19 = vadd.f32 %v983_v0, %v4163_v44 }
 0x39a   :  { %1442 = vmatpush.bf16.msrb.mxu3 %v1429_v15  ;;  %v4263_v51 = vpop.trf.xlu2 }
 0x39c   :  { %1008 = vxpose.xlu0.b32.cont [3/16] %v972_v11, 128 }
 0x39e   :  { %1443 = vmatpush.bf16.msrb.mxu3 %v1428_v18  ;;  %v986_v10 = vpop.f32.mrf.mxu3 }
 0x39f   :  { %v987_v23 = vadd.f32 %v986_v10, %v4166_v42  ;;  %v2748_v10 = vld [vmem:[%s5017_s8 + $0x70] sm:$0xf] }
 0x3a1   :  { %1444 = vmatmul.bf16.vlgmr.msrb.gmra.mxu3 %v4049_v56 }
 0x3a2   :  { %v786_v41 = vpop.trf.xlu2 }
 0x3a3   :  { %v798_v3 = vmax.f32 %v4245_v38, %v786_v41 }
 0x3a4   :  { %1009 = vxpose.xlu0.b32.cont [4/16] %v974_v17, 128 }
 0x3a6   :  { %v988_v40 = vpop.f32.mrf.mxu3 }
 0x3a7   :  { %v989_v52 = vadd.f32 %v988_v40, %v4172_v43 }
 0x3aa   :  { %v787_v14 = vpop.trf.xlu2 }
 0x3ab   :  { %v799_v62 = vmax.f32 %v4256_v34, %v787_v14  ;;  %v3104_v14 = vld [vmem:[%s5017_s8 + $0x74] sm:$0xf] }
 0x3ac   :  { %1010 = vxpose.xlu0.b32.cont [5/16] %v977_v58, 128 }
 0x3ae   :  { %v991_v37 = vpop.f32.mrf.mxu3 }
 0x3af   :  { %v992_v48 = vadd.f32 %v991_v37, %v4175_v29 }
 0x3b0   :  { %v4266_v53 = vpop.trf.xlu0 }
 0x3b1   :  { %1449 = vmatmul.bf16.gmra.mxu3 %v4063_v45 }
 0x3b2   :  { %v4278_v45 = vpop.trf.xlu2 }
 0x3b3   :  { %v800_v54 = vmax.f32 %v4259_v32, %v4278_v45  ;;  %v3098_v32 = vld [vmem:[%s5017_s8 + $0x44] sm:$0xf] }
 0x3b4   :  { %1011 = vxpose.xlu0.b32.cont [6/16] %v979_v22, 128 }
 0x3b6   :  { %v993_v16 = vpop.f32.mrf.mxu3 }
 0x3b7   :  { %v994_v30 = vadd.f32 %v993_v16, %v4181_v8  ;;  %v3102_v16 = vld [vmem:[%s5017_s8 + $0x64] sm:$0xf] }
 0x3b8   :  { %v4271_v56 = vpop.trf.xlu0 }
 0x3ba   :  { %v4285_v21 = vpop.trf.xlu2 }
 0x3bc   :  { %1012 = vxpose.xlu0.b32.cont [7/16] %v982_v9, 128 }
 0x3be   :  { %v996_v47 = vpop.f32.mrf.mxu3 }
 0x3bf   :  { %v997_v34 = vadd.f32 %v996_v47, %v4184_v2 }
 0x3c0   :  { %v4275_v59 = vpop.trf.xlu0 }
 0x3c1   :  { %1454 = vmatmul.bf16.gmra.mxu3 %v4074_v50 }
 0x3c2   :  { %v790_v28 = vpop.trf.xlu2 }
 0x3c3   :  { %v802_v17 = vmax.f32 %v798_v3, %v790_v28  ;;  %v2740_v28 = vld [vmem:[%s5017_s8 + $0x60] sm:$0xf] }
 0x3c4   :  { %1013 = vxpose.xlu0.b32.cont [8/16] %v984_v19, 128 }
 0x3c6   :  { %v998_v11 = vpop.f32.mrf.mxu3 }
 0x3c7   :  { %v999_v18 = vadd.f32 %v998_v11, %v4190_v7  ;;  %v2732_v11 = vld [vmem:[%s5017_s8 + $0x50] sm:$0xf] }
 0x3c8   :  { %v4283_v25 = vpop.trf.xlu0 }
 0x3ca   :  { %v791_v26 = vpop.trf.xlu2 }
 0x3cb   :  { %v803_v58 = vmax.f32 %v799_v62, %v791_v26  ;;  %v2750_v62 = vld [vmem:[%s5017_s8 + $0x78] sm:$0xf0] }
 0x3cc   :  { %1014 = vxpose.xlu0.b32.cont [9/16] %v987_v23, 128  ;;  %v4329_v19 = vor.u32 %v3104_v14, %v2750_v62  ;;  %v3097_v62 = vld [vmem:[%s5017_s8 + $0x34] sm:$0xf0] }
 0x3ce   :  { %1801 = vmatpush.bf16.msra.mxu2 %v4329_v19 }
 0x3d0   :  { %v4288_v49 = vpop.trf.xlu0 }
 0x3d1   :  { %v1277_v50 = vmax.f32 %v4266_v53, %v4288_v49  ;;  %1459 = vmatmul.bf16.gmra.mxu3 %v4081_v57  ;;  %v3092_v53 = vld [vmem:[%s5017_s8 + $0x14] sm:$0xf] }
 0x3d2   :  { %v792_v39 = vpop.trf.xlu2 }
 0x3d4   :  { %1015 = vxpose.xlu0.b32.cont [10/16] %v989_v52, 128  ;;  %v3103_v52 = vld [vmem:[%s5017_s8 + $0x64] sm:$0xf0] }
 0x3d8   :  { %v4294_v38 = vpop.trf.xlu0 }
 0x3d9   :  { %v1278_v63 = vmax.f32 %v4271_v56, %v4294_v38  ;;  %v2702_v56 = vld [vmem:[%s5017_s8 + $0x18] sm:$0xf0] }
 0x3da   :  { %v793_v15 = vpop.trf.xlu2 }
 0x3dc   :  { %1016 = vxpose.xlu0.b32.cont [11/16] %v992_v48, 128  ;;  %v4346_v48 = vor.u32 %v3103_v52, %v2740_v28 }
 0x3e0   :  { %v4299_v61 = vpop.trf.xlu0 }
 0x3e1   :  { %v1279_v57 = vmax.f32 %v4275_v59, %v4299_v61  ;;  %1464 = vmatmul.bf16.gmra.mxu3 %v4088_v4  ;;  %v1001_v4 = vpop.f32.mrf.mxu3 }
 0x3e2   :  { %v794_v35 = vpop.trf.xlu2  ;;  %v1002_v0 = vadd.f32 %v1001_v4, %v4193_v46 }
 0x3e3   :  { %v806_v41 = vmax.f32 %v802_v17, %v794_v35  ;;  %v3101_v35 = vld [vmem:[%s5017_s8 + $0x54] sm:$0xf0] }
 0x3e4   :  { %1017 = vxpose.xlu0.b32.cont [12/16] %v994_v30, 128  ;;  %v4366_v4 = vor.u32 %v3101_v35, %v2732_v11  ;;  %v3095_v11 = vld [vmem:[%s5017_s8 + $0x24] sm:$0xf0] }
 0x3e8   :  { %v4305_v1 = vpop.trf.xlu0 }
 0x3e9   :  { %v1003_v23 = vpop.f32.mrf.mxu3 }
 0x3ea   :  { %v795_v22 = vpop.trf.xlu2  ;;  %v1004_v26 = vadd.f32 %v1003_v23, %v4199_v31  ;;  %v3096_v23 = vld [vmem:[%s5017_s8 + $0x34] sm:$0xf] }
 0x3eb   :  { %v807_v3 = vmax.f32 %v803_v58, %v795_v22  ;;  %v2724_v22 = vld [vmem:[%s5017_s8 + $0x40] sm:$0xf] }
 0x3ec   :  { %1018 = vxpose.xlu0.b32.cont [13/16] %v997_v34, 128  ;;  %v801_v34 = vmax.f32 %v4263_v51, %v4285_v21  ;;  %v2734_v51 = vld [vmem:[%s5017_s8 + $0x58] sm:$0xf0]  ;;  %v804_v21 = vmax.f32 %v800_v54, %v792_v39  ;;  %v2726_v39 = vld [vmem:[%s5017_s8 + $0x48] sm:$0xf0] }
 0x3ed   :  { %v810_v40 = vmax.f32 %v806_v41, %v807_v3  ;;  %v2716_v3 = vld [vmem:[%s5017_s8 + $0x30] sm:$0xf] }
 0x3ee   :  { %v4407_v52 = vor.u32 %v3097_v62, %v2716_v3 }
 0x3f0   :  { %v4308_v55 = vpop.trf.xlu0 }
 0x3f1   :  { %1469 = vmatmul.bf16.gmra.mxu3 %v4095_v24  ;;  %v3105_v24 = vld [vmem:[%s5017_s8 + $0x74] sm:$0xf0] }
 0x3f2   :  { %v4324_v9 = vor.u32 %v3105_v24, %v2748_v10  ;;  %v796_v47 = vpop.trf.xlu2  ;;  %v3099_v10 = vld [vmem:[%s5017_s8 + $0x44] sm:$0xf0]  ;;  %v4394_v24 = vor.u32 %v3098_v32, %v2726_v39  ;;  %v3090_v32 = vld [vmem:[%s5017_s8 + $0x4] sm:$0xf]  ;;  %v2694_v39 = vld [vmem:[%s5017_s8 + $0x8] sm:$0xf0] }
 0x3f3   :  { %v808_v41 = vmax.f32 %v804_v21, %v796_v47  ;;  %v4389_v54 = vor.u32 %v3099_v10, %v2724_v22  ;;  %v1281_v21 = vmax.f32 %v1277_v50, %v4308_v55  ;;  %v3093_v22 = vld [vmem:[%s5017_s8 + $0x14] sm:$0xf0]  ;;  %v4457_v55 = vor.u32 %v3092_v53, %v2702_v56  ;;  %v3091_v10 = vld [vmem:[%s5017_s8 + $0x4] sm:$0xf0] }
 0x3f4   :  { %1019 = vxpose.xlu0.b32.cont [14/16] %v999_v18, 128  ;;  %1788 = vmatpush.bf16.msra.mxu0 %v4324_v9  ;;  %v3100_v18 = vld [vmem:[%s5017_s8 + $0x54] sm:$0xf] }
 0x3f5   :  { %v4374_v17 = vor.u32 %v3100_v18, %v2734_v51  ;;  %v2710_v18 = vld [vmem:[%s5017_s8 + $0x28] sm:$0xf0] }
 0x3f8   :  { %v4312_v6 = vpop.trf.xlu0  ;;  %1789 = vmatpush.bf16.msra.mxu0 %v4346_v48 }
 0x3fa   :  { %v797_v45 = vpop.trf.xlu2 }
 0x3fc   :  { %1020 = vxpose.xlu0.b32.cont [15/16] %v1002_v0, 128  ;;  %1790 = vmatpush.bf16.msra.mxu0 %v4366_v4  ;;  %v805_v0 = vmax.f32 %v801_v34, %v793_v15  ;;  %v2708_v34 = vld [vmem:[%s5017_s8 + $0x20] sm:$0xf] }
 0x3fd   :  { %v4423_v35 = vor.u32 %v3095_v11, %v2708_v34 }
 0x3fe   :  { %v809_v15 = vmax.f32 %v805_v0, %v797_v45  ;;  %v1282_v0 = vmax.f32 %v1278_v63, %v4312_v6  ;;  %v2692_v6 = vld [vmem:[%s5017_s8] sm:$0xf] }
 0x3ff   :  { %v4469_v45 = vor.u32 %v3091_v10, %v2692_v6 }
 0x400   :  { %v4333_v37 = vpop.trf.xlu0  ;;  %1791 = vmatpush.bf16.msra.mxu0 %v4389_v54  ;;  %v811_v14 = vmax.f32 %v808_v41, %v809_v15  ;;  %v2700_v41 = vld [vmem:[%s5017_s8 + $0x10] sm:$0xf] }
 0x401   :  { %1474 = vmatmul.bf16.gmra.mxu3 %v4105_v36  ;;  %v2742_v36 = vld [vmem:[%s5017_s8 + $0x68] sm:$0xf0]  ;;  %v4452_v50 = vor.u32 %v3093_v22, %v2700_v41 }
 0x402   :  { %v4351_v30 = vor.u32 %v3102_v16, %v2742_v36  ;;  %v2718_v16 = vld [vmem:[%s5017_s8 + $0x38] sm:$0xf0]  ;;  %v812_v36 = vmax.f32 %v810_v40, %v811_v14  ;;  %v3094_v40 = vld [vmem:[%s5017_s8 + $0x24] sm:$0xf]  ;;  %v4475_v14 = vor.u32 %v3090_v32, %v2694_v39 }
 0x403   :  { %v4413_v47 = vor.u32 %v3096_v23, %v2718_v16  ;;  %v4431_v51 = vor.u32 %v3094_v40, %v2710_v18 }
 0x404   :  { %1021 = vxpose.xlu0.b32.end [16/16] %v1004_v26, 128  ;;  %1802 = vmatpush.bf16.msra.mxu2 %v4351_v30  ;;  %v5090_v26 = vld [vmem:[#allocation16_spill] sm:$0xff]  ;;  %v813_v62 = vrot.slane %v812_v36, 4 }
 0x405   :  { %1792 = vmatpush.bf16.msra.mxu0 %v4407_v52 }
 0x406   :  { %v814_v11 = vmax.f32 %v812_v36, %v813_v62 }
 0x408   :  { %v4376_v58 = vpop.trf.xlu0  ;;  %1803 = vmatpush.bf16.msra.mxu2 %v4374_v17  ;;  %v815_v41 = vrot.slane %v814_v11, 2 }
 0x409   :  { %1793 = vmatpush.bf16.msra.mxu0 %v4423_v35 }
 0x40c   :  { %1804 = vmatpush.bf16.msra.mxu2 %v4394_v24 }
 0x40d   :  { %1794 = vmatpush.bf16.msra.mxu0 %v4452_v50 }
 0x410   :  { %v1273_v28 = vpop.trf.xlu0  ;;  %1805 = vmatpush.bf16.msra.mxu2 %v4413_v47 }
 0x411   :  { %1479 = vmatmul.bf16.gmra.mxu3 %v5090_v26  ;;  %v1285_v38 = vmax.f32 %v1281_v21, %v1273_v28  ;;  %1795 = vmatpush.bf16.msra.mxu0 %v4469_v45  ;;  %v1280_v28 = vmax.f32 %v4283_v25, %v4305_v1  ;;  %v1283_v26 = vmax.f32 %v1279_v57, %v4333_v37 }
 0x413   :  { %v1284_v34 = vmax.f32 %v1280_v28, %v4376_v58 }
 0x414   :  { %1806 = vmatpush.bf16.msra.mxu2 %v4431_v51 }
 0x418   :  { %v1274_v49 = vpop.trf.xlu0  ;;  %1807 = vmatpush.bf16.msra.mxu2 %v4457_v55 }
 0x419   :  { %v1286_v63 = vmax.f32 %v1282_v0, %v1274_v49 }
 0x41b   :  { %v1289_v15 = vmax.f32 %v1285_v38, %v1286_v63 }
 0x41c   :  { %1808 = vmatpush.bf16.msra.mxu2 %v4475_v14 }
 0x420   :  { %v1275_v3 = vpop.trf.xlu0 }
 0x421   :  { %v1287_v18 = vmax.f32 %v1283_v26, %v1275_v3 }
 0x424   :  { %v1445_v23 = vpop.f32.mrf.mxu3 }
 0x425   :  { %v1446_v16 = vadd.f32 %v1445_v23, %v4130_v13  ;;  %v816_v13 = vmax.f32 %v814_v11, %v815_v41  ;;  %v2812_v41 = vld [vmem:[#allocation2 + $0x70] sm:$0xf] }
 0x427   :  { %1485 = vxpose.xlu1.b32.start [1/16] %v1446_v16, 128  ;;  %v817_v59 = vrot.slane %v816_v13, 1 }
 0x428   :  { %v1276_v40 = vpop.trf.xlu0 }
 0x429   :  { %v1288_v21 = vmax.f32 %v1284_v34, %v1276_v40  ;;  %v4489_v36 = vmax.f32 %v816_v13, %v817_v59  ;;  %v2804_v13 = vld [vmem:[#allocation2 + $0x60] sm:$0xf]  ;;  %v3118_v59 = vld [vmem:[#allocation2 + $0x64] sm:$0xf] }
 0x42b   :  { %v1290_v0 = vmax.f32 %v1287_v18, %v1288_v21  ;;  %v2838_v21 = vld [vmem:[#allocation2 + $0xa8] sm:$0xf0] }
 0x42c   :  { %v1447_v22 = vpop.f32.mrf.mxu3 }
 0x42d   :  { %v1291_v53 = vmax.f32 %v1289_v15, %v1290_v0  ;;  %v1448_v25 = vadd.f32 %v1447_v22, %v4136_v5  ;;  %v3121_v22 = vld [vmem:[#allocation2 + $0x74] sm:$0xf0] }
 0x42f   :  { %v1292_v1 = vrot.slane %v1291_v53, 4  ;;  %1486 = vxpose.xlu1.b32.cont [2/16] %v1448_v25, 128  ;;  %v4522_v25 = vor.u32 %v3121_v22, %v2812_v41  ;;  %v2860_v22 = vld [vmem:[#allocation2 + $0xd0] sm:$0xf] }
 0x430   :  { %v4503_v23 = vpop.trf.xlu0 }
 0x431   :  { %v1293_v49 = vmax.f32 %v1291_v53, %v1292_v1  ;;  %v3120_v53 = vld [vmem:[#allocation2 + $0x74] sm:$0xf]  ;;  %v2814_v1 = vld [vmem:[#allocation2 + $0x78] sm:$0xf0]  ;;  %1983 = vmatpush.bf16.msra.mxu1 %v4522_v25 }
 0x433   :  { %v1294_v56 = vrot.slane %v1293_v49, 2 }
 0x434   :  { %v1450_v61 = vpop.f32.mrf.mxu3 }
 0x435   :  { %v1295_v57 = vmax.f32 %v1293_v49, %v1294_v56  ;;  %v1451_v37 = vadd.f32 %v1450_v61, %v4139_v12  ;;  %v3119_v49 = vld [vmem:[#allocation2 + $0x64] sm:$0xf0]  ;;  %v4526_v56 = vor.u32 %v3120_v53, %v2814_v1  ;;  %v2806_v61 = vld [vmem:[#allocation2 + $0x68] sm:$0xf0]  ;;  %v3133_v53 = vld [vmem:[#allocation2 + $0xd4] sm:$0xf0] }
 0x436   :  { %v3132_v1 = vld [vmem:[#allocation2 + $0xd4] sm:$0xf] }
 0x437   :  { %v1296_v58 = vrot.slane %v1295_v57, 1  ;;  %1487 = vxpose.xlu1.b32.cont [3/16] %v1451_v37, 128  ;;  %v3137_v37 = vld [vmem:[#allocation2 + $0xf4] sm:$0xf0]  ;;  %2009 = vmatpush.bf16.msrb.mxu0 %v4526_v56 }
 0x438   :  { %v4506_v16 = vpop.trf.xlu0 }
 0x439   :  { %v4491_v38 = vmax.f32 %v1295_v57, %v1296_v58  ;;  %v2876_v57 = vld [vmem:[#allocation2 + $0xf0] sm:$0xf]  ;;  %v3136_v58 = vld [vmem:[#allocation2 + $0xf4] sm:$0xf] }
 0x43b   :  { %v1702_v63 = vpack.c.bf16 %v4491_v38, %v4491_v38  ;;  %v4497_v5 = vmul.f32 %v4491_v38, %v4489_v36 }
 0x43c   :  { %v1452_v6 = vpop.f32.mrf.mxu3 }
 0x43d   :  { %v1453_v10 = vadd.f32 %v1452_v6, %v4145_v60  ;;  %1796 = vmatmul.bf16.vlgmr.msra.gmra.mxu0 %v1702_v63  ;;  %1809 = vmatmul.bf16.vlgmr.msra.gmra.mxu2 %v1702_v63  ;;  %v2878_v63 = vld [vmem:[#allocation2 + $0xf8] sm:$0xf0]  ;;  %v4532_v6 = vor.u32 %v3118_v59, %v2806_v61  ;;  %v2790_v59 = vld [vmem:[#allocation2 + $0x48] sm:$0xf0] }
 0x43e   :  { %v2862_v61 = vld [vmem:[#allocation2 + $0xd8] sm:$0xf0] }
 0x43f   :  { %1488 = vxpose.xlu1.b32.cont [4/16] %v1453_v10, 128  ;;  %v4534_v10 = vor.u32 %v3137_v37, %v2876_v57  ;;  %2010 = vmatpush.bf16.msrb.mxu0 %v4532_v6  ;;  %v4557_v57 = vor.u32 %v3133_v53, %v2860_v22  ;;  %v4559_v37 = vor.u32 %v3132_v1, %v2862_v61  ;;  %v2844_v22 = vld [vmem:[#allocation2 + $0xb0] sm:$0xf]  ;;  %v3129_v1 = vld [vmem:[#allocation2 + $0xb4] sm:$0xf0]  ;;  %v2772_v61 = vld [vmem:[#allocation2 + $0x20] sm:$0xf] }
 0x440   :  { %v4509_v34 = vpop.trf.xlu0 }
 0x441   :  { %1996 = vmatpush.bf16.msra.mxu3 %v4534_v10 }
 0x444   :  { %v1455_v12 = vpop.f32.mrf.mxu3 }
 0x445   :  { %v1456_v32 = vadd.f32 %v1455_v12, %v4148_v20  ;;  %v4536_v12 = vor.u32 %v3136_v58, %v2878_v63  ;;  %v2852_v58 = vld [vmem:[#allocation2 + $0xc0] sm:$0xf] }
 0x447   :  { %1489 = vxpose.xlu1.b32.cont [5/16] %v1456_v32, 128  ;;  %v2796_v32 = vld [vmem:[#allocation2 + $0x50] sm:$0xf]  ;;  %2022 = vmatpush.bf16.msrb.mxu2 %v4536_v12 }
 0x44c   :  { %v1457_v39 = vpop.f32.mrf.mxu3 }
 0x44d   :  { %v1458_v15 = vadd.f32 %v1457_v39, %v4154_v27  ;;  %v3117_v39 = vld [vmem:[#allocation2 + $0x54] sm:$0xf0] }
 0x44f   :  { %1490 = vxpose.xlu1.b32.cont [6/16] %v1458_v15, 128  ;;  %v3116_v15 = vld [vmem:[#allocation2 + $0x54] sm:$0xf] }
 0x454   :  { %v1460_v3 = vpop.f32.mrf.mxu3 }
 0x455   :  { %v1461_v62 = vadd.f32 %v1460_v3, %v4157_v33  ;;  %v4512_v33 = vpop.trf.xlu0 }
 0x457   :  { %1491 = vxpose.xlu1.b32.cont [7/16] %v1461_v62, 128  ;;  %v2798_v62 = vld [vmem:[#allocation2 + $0x58] sm:$0xf0] }
 0x45c   :  { %v1462_v28 = vpop.f32.mrf.mxu3 }
 0x45d   :  { %v1463_v60 = vadd.f32 %v1462_v28, %v4163_v44  ;;  %v4515_v44 = vpop.trf.xlu0  ;;  %v2868_v28 = vld [vmem:[#allocation2 + $0xe0] sm:$0xf] }
 0x45f   :  { %1492 = vxpose.xlu1.b32.cont [8/16] %v1463_v60, 128  ;;  %v3135_v60 = vld [vmem:[#allocation2 + $0xe4] sm:$0xf0] }
 0x464   :  { %v1465_v26 = vpop.f32.mrf.mxu3 }
 0x465   :  { %v1466_v20 = vadd.f32 %v1465_v26, %v4166_v42 }
 0x467   :  { %1493 = vxpose.xlu1.b32.cont [9/16] %v1466_v20, 128  ;;  %v4541_v20 = vor.u32 %v3135_v60, %v2868_v28  ;;  %v3113_v28 = vld [vmem:[#allocation2 + $0x34] sm:$0xf0] }
 0x469   :  { %1997 = vmatpush.bf16.msra.mxu3 %v4541_v20 }
 0x46c   :  { %v1467_v27 = vpop.f32.mrf.mxu3 }
 0x46d   :  { %v1468_v11 = vadd.f32 %v1467_v27, %v4172_v43  ;;  %v4520_v43 = vpop.trf.xlu0  ;;  %v3134_v27 = vld [vmem:[#allocation2 + $0xe4] sm:$0xf]  ;;  %1998 = vmatpush.bf16.msra.mxu3 %v4557_v57 }
 0x46f   :  { %1494 = vxpose.xlu1.b32.cont [10/16] %v1468_v11, 128  ;;  %v2870_v11 = vld [vmem:[#allocation2 + $0xe8] sm:$0xf0] }
 0x474   :  { %v1470_v40 = vpop.f32.mrf.mxu3 }
 0x475   :  { %v1471_v18 = vadd.f32 %v1470_v40, %v4175_v29  ;;  %v4544_v40 = vor.u32 %v3117_v39, %v2796_v32  ;;  %v4551_v41 = vpop.trf.xlu0  ;;  %v3131_v32 = vld [vmem:[#allocation2 + $0xc4] sm:$0xf0]  ;;  %v3130_v39 = vld [vmem:[#allocation2 + $0xc4] sm:$0xf] }
 0x477   :  { %1495 = vxpose.xlu1.b32.cont [11/16] %v1471_v18, 128  ;;  %v4546_v18 = vor.u32 %v3134_v27, %v2870_v11  ;;  %v2782_v27 = vld [vmem:[#allocation2 + $0x38] sm:$0xf0] }
 0x479   :  { %2023 = vmatpush.bf16.msrb.mxu2 %v4546_v18 }
 0x47c   :  { %v1472_v0 = vpop.f32.mrf.mxu3 }
 0x47d   :  { %v1473_v42 = vadd.f32 %v1472_v0, %v4181_v8  ;;  %v4529_v8 = vor.u32 %v3119_v49, %v2804_v13  ;;  %v2788_v0 = vld [vmem:[#allocation2 + $0x40] sm:$0xf]  ;;  %v3114_v49 = vld [vmem:[#allocation2 + $0x44] sm:$0xf]  ;;  %2024 = vmatpush.bf16.msrb.mxu2 %v4559_v37 }
 0x47e   :  { %v3110_v13 = vld [vmem:[#allocation2 + $0x24] sm:$0xf] }
 0x47f   :  { %1496 = vxpose.xlu1.b32.cont [12/16] %v1473_v42, 128  ;;  %1984 = vmatpush.bf16.msra.mxu1 %v4529_v8  ;;  %v3115_v42 = vld [vmem:[#allocation2 + $0x44] sm:$0xf0] }
 0x480   :  { %v4562_v63 = vor.u32 %v3115_v42, %v2788_v0  ;;  %v4570_v0 = vor.u32 %v3131_v32, %v2852_v58  ;;  %v2774_v58 = vld [vmem:[#allocation2 + $0x28] sm:$0xf0]  ;;  %v4582_v32 = vor.u32 %v3129_v1, %v2844_v22  ;;  %v3109_v22 = vld [vmem:[#allocation2 + $0x14] sm:$0xf0]  ;;  %v3108_v1 = vld [vmem:[#allocation2 + $0x14] sm:$0xf] }
 0x482   :  { %1999 = vmatpush.bf16.msra.mxu3 %v4570_v0  ;;  %5093 = vst [vmem:[#allocation13_spill] sm:$0xff] %v4582_v32 }
 0x483   :  { %1985 = vmatpush.bf16.msra.mxu1 %v4544_v40 }
 0x484   :  { %v1475_v3 = vpop.f32.mrf.mxu3 }
 0x485   :  { %v1476_v26 = vadd.f32 %v1475_v3, %v4184_v2  ;;  %v4549_v2 = vor.u32 %v3116_v15, %v2798_v62  ;;  %v2854_v15 = vld [vmem:[#allocation2 + $0xc8] sm:$0xf0]  ;;  %v4565_v3 = vor.u32 %v3114_v49, %v2790_v59  ;;  %v2780_v62 = vld [vmem:[#allocation2 + $0x30] sm:$0xf]  ;;  %v3128_v49 = vld [vmem:[#allocation2 + $0xb4] sm:$0xf] }
 0x486   :  { %v4572_v42 = vor.u32 %v3130_v39, %v2854_v15  ;;  %v4575_v53 = vor.u32 %v3113_v28, %v2780_v62  ;;  %v2846_v59 = vld [vmem:[#allocation2 + $0xb8] sm:$0xf0]  ;;  %v4590_v62 = vor.u32 %v3110_v13, %v2774_v58  ;;  %2000 = vmatpush.bf16.msra.mxu3 %v4582_v32  ;;  %v3127_v58 = vld [vmem:[#allocation2 + $0xa4] sm:$0xf0] }
 0x487   :  { %1497 = vxpose.xlu1.b32.cont [13/16] %v1476_v26, 128  ;;  %2011 = vmatpush.bf16.msrb.mxu0 %v4549_v2  ;;  %v3112_v26 = vld [vmem:[#allocation2 + $0x34] sm:$0xf]  ;;  %v4584_v39 = vor.u32 %v3128_v49, %v2846_v59  ;;  %v2766_v59 = vld [vmem:[#allocation2 + $0x18] sm:$0xf0] }
 0x488   :  { %5091 = vst [vmem:[#allocation11_spill] sm:$0xff] %v4572_v42  ;;  %1986 = vmatpush.bf16.msra.mxu1 %v4562_v63  ;;  %2025 = vmatpush.bf16.msrb.mxu2 %v4572_v42 }
 0x489   :  { %5094 = vst [vmem:[#allocation14_spill] sm:$0xff] %v4584_v39 }
 0x48a   :  { %5096 = vst [vmem:[#allocation16_spill] sm:$0xff] %v4590_v62 }
 0x48b   :  { %2012 = vmatpush.bf16.msrb.mxu0 %v4565_v3 }
 0x48c   :  { %v1477_v60 = vpop.f32.mrf.mxu3  ;;  %1987 = vmatpush.bf16.msra.mxu1 %v4575_v53  ;;  %2026 = vmatpush.bf16.msrb.mxu2 %v4584_v39 }
 0x48d   :  { %v1478_v11 = vadd.f32 %v1477_v60, %v4190_v7  ;;  %v4578_v7 = vor.u32 %v3112_v26, %v2782_v27  ;;  %v3111_v60 = vld [vmem:[#allocation2 + $0x24] sm:$0xf0]  ;;  %v4592_v26 = vpop.trf.xlu0 }
 0x48e   :  { %v4587_v15 = vor.u32 %v3111_v60, %v2772_v61  ;;  %v4602_v60 = vor.u32 %v3108_v1, %v2766_v59  ;;  %v2758_v1 = vld [vmem:[#allocation2 + $0x8] sm:$0xf0]  ;;  %v2828_v59 = vld [vmem:[#allocation2 + $0x90] sm:$0xf] }
 0x48f   :  { %1498 = vxpose.xlu1.b32.cont [14/16] %v1478_v11, 128  ;;  %5092 = vst [vmem:[#allocation12_spill] sm:$0xff] %v4578_v7  ;;  %2013 = vmatpush.bf16.msrb.mxu0 %v4578_v7  ;;  %v2764_v11 = vld [vmem:[#allocation2 + $0x10] sm:$0xf] }
 0x490   :  { %5095 = vst [vmem:[#allocation15_spill] sm:$0xff] %v4587_v15  ;;  %1988 = vmatpush.bf16.msra.mxu1 %v4587_v15  ;;  %v4599_v13 = vor.u32 %v3109_v22, %v2764_v11  ;;  %v2756_v11 = vld [vmem:[#allocation2] sm:$0xf]  ;;  %v3107_v22 = vld [vmem:[#allocation2 + $0x4] sm:$0xf0] }
 0x491   :  { %5098 = vst [vmem:[#allocation18_spill] sm:$0xff] %v4602_v60 }
 0x492   :  { %5097 = vst [vmem:[#allocation17_spill] sm:$0xff] %v4599_v13 }
 0x493   :  { %2014 = vmatpush.bf16.msrb.mxu0 %v4590_v62  ;;  %v3106_v62 = vld [vmem:[#allocation2 + $0x4] sm:$0xf] }
 0x494   :  { %v1480_v28 = vpop.f32.mrf.mxu3  ;;  %1989 = vmatpush.bf16.msra.mxu1 %v4599_v13 }
 0x495   :  { %v1481_v27 = vadd.f32 %v1480_v28, %v4193_v46  ;;  %v2836_v46 = vld [vmem:[#allocation2 + $0xa0] sm:$0xf]  ;;  %v3126_v28 = vld [vmem:[#allocation2 + $0xa4] sm:$0xf]  ;;  %v1030_v29 = vpop.trf.xlu0 }
 0x496   :  { %v4608_v39 = vor.u32 %v3126_v28, %v2838_v21  ;;  %v2830_v21 = vld [vmem:[#allocation2 + $0x98] sm:$0xf0] }
 0x497   :  { %1499 = vxpose.xlu1.b32.cont [15/16] %v1481_v27, 128  ;;  %v4605_v27 = vor.u32 %v3127_v58, %v2836_v46  ;;  %2015 = vmatpush.bf16.msrb.mxu0 %v4602_v60  ;;  %v3125_v46 = vld [vmem:[#allocation2 + $0x94] sm:$0xf0]  ;;  %v3124_v58 = vld [vmem:[#allocation2 + $0x94] sm:$0xf]  ;;  %v2822_v60 = vld [vmem:[#allocation2 + $0x88] sm:$0xf0] }
 0x498   :  { %5100 = vst [vmem:[#allocation20_spill] sm:$0xff] %v4608_v39  ;;  %2027 = vmatpush.bf16.msrb.mxu2 %v4608_v39  ;;  %v4620_v28 = vor.u32 %v3124_v58, %v2830_v21 }
 0x499   :  { %5099 = vst [vmem:[#allocation19_spill] sm:$0xff] %v4605_v27  ;;  %2001 = vmatpush.bf16.msra.mxu3 %v4605_v27 }
 0x49a   :  { %5104 = vst [vmem:[#allocation24_spill] sm:$0xff] %v4620_v28 }
 0x49c   :  { %v1482_v49 = vpop.f32.mrf.mxu3  ;;  %2028 = vmatpush.bf16.msrb.mxu2 %v4620_v28 }
 0x49d   :  { %v1483_v61 = vadd.f32 %v1482_v49, %v4199_v31  ;;  %v4611_v31 = vor.u32 %v3107_v22, %v2756_v11  ;;  %v4614_v49 = vor.u32 %v3106_v62, %v2758_v1  ;;  %v2820_v11 = vld [vmem:[#allocation2 + $0x80] sm:$0xf]  ;;  %v3123_v22 = vld [vmem:[#allocation2 + $0x84] sm:$0xf0]  ;;  %v3122_v62 = vld [vmem:[#allocation2 + $0x84] sm:$0xf]  ;;  %v1031_v1 = vpop.trf.xlu0 }
 0x49e   :  { %v4624_v39 = vor.u32 %v3123_v22, %v2820_v11  ;;  %v4626_v13 = vor.u32 %v3122_v62, %v2822_v60 }
 0x49f   :  { %1500 = vxpose.xlu1.b32.end [16/16] %v1483_v61, 128  ;;  %5101 = vst [vmem:[#allocation21_spill] sm:$0xff] %v4611_v31  ;;  %1990 = vmatpush.bf16.msra.mxu1 %v4611_v31  ;;  %v4617_v61 = vor.u32 %v3125_v46, %v2828_v59  ;;  %v4633_v46 = vld [vmem:[%s5018_s9] sm:$0x3] }
 0x4a0   :  { %5102 = vst [vmem:[#allocation22_spill] sm:$0xff] %v4614_v49  ;;  %2016 = vmatpush.bf16.msrb.mxu0 %v4614_v49  ;;  %2029 = vmatpush.bf16.msrb.mxu2 %v4626_v13  ;;  %v5044_v21 = vperm.slane %v4633_v46, 0  ;;  %v5048_v60 = vperm.slane %v4633_v46, 1 }
 0x4a1   :  { %5103 = vst [vmem:[#allocation23_spill] sm:$0xff] %v4617_v61  ;;  %2002 = vmatpush.bf16.msra.mxu3 %v4617_v61 }
 0x4a2   :  { %5105 = vst [vmem:[#allocation25_spill] sm:$0xff] %v4624_v39 }
 0x4a3   :  { %5106 = vst [vmem:[#allocation26_spill] sm:$0xff] %v4626_v13  ;;  %v5108_v13 = vmax.f32 %v4503_v23, %v4515_v44 }
 0x4a4   :  { %5107 = vst [vmem:[#allocation27_spill] sm:$0xff] %v4633_v46 }
 0x4a5   :  { %2003 = vmatpush.bf16.msra.mxu3 %v4624_v39  ;;  %v1032_v59 = vpop.trf.xlu0  ;;  %v1042_v31 = vmax.f32 %v5108_v13, %v1030_v29  ;;  %v5110_v13 = vmax.f32 %v4509_v34, %v4551_v41  ;;  %v2932_v41 = vld [vmem:[#allocation5 + $0x60] sm:$0xf] }
 0x4ad   :  { %v1033_v58 = vpop.trf.xlu0 }
 0x4b5   :  { %v1034_v62 = vpop.trf.xlu0 }
 0x4b6   :  { %v1046_v32 = vmax.f32 %v1042_v31, %v1034_v62 }
 0x4ba   :  { %v1797_v28 = vpop.f32.mrf.mxu0 }
 0x4bb   :  { %v1798_v11 = vadd.f32 %v1797_v28, %v5044_v21  ;;  %v5109_v28 = vmax.f32 %v4506_v16, %v4520_v43 }
 0x4bd   :  { %v1814_v22 = vmax.f32 %v1798_v11, 0.0  ;;  %v1043_v11 = vmax.f32 %v5109_v28, %v1031_v1  ;;  %v1035_v42 = vpop.trf.xlu0 }
 0x4bf   :  { %v1816_v39 = vpack.c.bf16 %v1814_v22, %v1814_v22  ;;  %v1047_v22 = vmax.f32 %v1043_v11, %v1035_v42  ;;  %v3177_v11 = vld [vmem:[#allocation5 + $0x13c] sm:$0xf] }
 0x4c0   :  { %v1810_v49 = vpop.f32.mrf.mxu2 }
 0x4c1   :  { %v1811_v61 = vadd.f32 %v1810_v49, %v5048_v60  ;;  %1991 = vmatmul.bf16.vlgmr.msra.gmra.mxu1 %v1816_v39  ;;  %2017 = vmatmul.bf16.vlgmr.msrb.gmra.mxu0 %v1816_v39  ;;  %v1050_v23 = vmax.f32 %v1046_v32, %v1047_v22  ;;  %v1041_v39 = vmax.f32 %v4512_v33, %v4592_v26  ;;  %v2946_v60 = vld [vmem:[#allocation5 + $0x84] sm:$0xf0] }
 0x4c2   :  { %v1799_v27 = vpop.f32.mrf.mxu0  ;;  %v1541_v32 = vmul.f32 %v4489_v36, %v4489_v36  ;;  %v1544_v22 = vmul.f32 %v4491_v38, %v4491_v38  ;;  %v3183_v38 = vld [vmem:[#allocation5 + $0x16c] sm:$0xf] }
 0x4c3   :  { %v1815_v15 = vmax.f32 %v1811_v61, 0.0  ;;  %v1044_v27 = vmax.f32 %v5110_v13, %v1032_v59  ;;  %v1045_v16 = vmax.f32 %v1041_v39, %v1033_v58  ;;  %v2968_v13 = vld [vmem:[#allocation5 + $0xa8] sm:$0xf] }
 0x4c4   :  { %1542 = vadd.xlane.f32.xlu2 %v1541_v32 }
 0x4c5   :  { %v1817_v21 = vpack.c.bf16 %v1815_v15, %v1815_v15  ;;  %v1036_v29 = vpop.trf.xlu0 }
 0x4c6   :  { %v1048_v15 = vmax.f32 %v1044_v27, %v1036_v29  ;;  %v3160_v27 = vld [vmem:[#allocation5 + $0xb0] sm:$0xf0] }
 0x4c7   :  { %2004 = vmatmul.bf16.vlgmr.msra.gmra.mxu3 %v1817_v21  ;;  %2030 = vmatmul.bf16.vlgmr.msrb.gmra.mxu2 %v1817_v21  ;;  %v3042_v21 = vld [vmem:[#allocation5 + $0x144] sm:$0xf0] }
 0x4c8   :  { %v1812_v7 = vpop.f32.mrf.mxu2  ;;  %v4716_v46 = vor.u32 %v3177_v11, %v3042_v21  ;;  %v3030_v21 = vld [vmem:[#allocation5 + $0x12c] sm:$0xf0] }
 0x4ca   :  { %5122 = vst [vmem:[#allocation39_spill] sm:$0xff] %v4716_v46 }
 0x4cb   :  { %v4647_v44 = vpop.trf.xlu1 }
 0x4cd   :  { %v1037_v31 = vpop.trf.xlu0 }
 0x4ce   :  { %v1049_v49 = vmax.f32 %v1045_v16, %v1037_v31  ;;  %v3064_v16 = vld [vmem:[#allocation5 + $0x168] sm:$0xf]  ;;  %v3184_v31 = vld [vmem:[#allocation5 + $0x170] sm:$0xf0] }
 0x4d0   :  { %v1051_v61 = vmax.f32 %v1048_v15, %v1049_v49  ;;  %v4682_v15 = vor.u32 %v3160_v27, %v2968_v13  ;;  %v3159_v49 = vld [vmem:[#allocation5 + $0xac] sm:$0xf] }
 0x4d2   :  { %v1052_v7 = vmax.f32 %v1050_v23, %v1051_v61  ;;  %5111 = vst [vmem:[#allocation28_spill] sm:$0xff] %v4682_v15  ;;  %v2970_v61 = vld [vmem:[#allocation5 + $0xb4] sm:$0xf0]  ;;  %2302 = vmatpush.bf16.msrb.mxu1 %v4682_v15 }
 0x4d3   :  { %v4654_v43 = vpop.trf.xlu1  ;;  %v4686_v32 = vor.u32 %v3159_v49, %v2970_v61  ;;  %v3180_v49 = vld [vmem:[#allocation5 + $0x154] sm:$0xf]  ;;  %v3054_v61 = vld [vmem:[#allocation5 + $0x15c] sm:$0xf0] }
 0x4d4   :  { %v1053_v34 = vrot.slane %v1052_v7, 4 }
 0x4d5   :  { %5113 = vst [vmem:[#allocation30_spill] sm:$0xff] %v4686_v32  ;;  %2328 = vmatpush.bf16.msra.mxu0 %v4686_v32  ;;  %v3138_v32 = vld [vmem:[#allocation5 + $0x4] sm:$0xf] }
 0x4d6   :  { %v1054_v26 = vmax.f32 %v1052_v7, %v1053_v34  ;;  %v4684_v7 = vor.u32 %v3184_v31, %v3064_v16  ;;  %v3066_v34 = vld [vmem:[#allocation5 + $0x174] sm:$0xf0]  ;;  %v3156_v16 = vld [vmem:[#allocation5 + $0x94] sm:$0xf]  ;;  %v2958_v31 = vld [vmem:[#allocation5 + $0x9c] sm:$0xf0] }
 0x4d8   :  { %v1055_v58 = vrot.slane %v1054_v26, 2  ;;  %5112 = vst [vmem:[#allocation29_spill] sm:$0xff] %v4684_v7  ;;  %2315 = vmatpush.bf16.msrb.mxu3 %v4684_v7 }
 0x4da   :  { %v1056_v62 = vmax.f32 %v1054_v26, %v1055_v58  ;;  %v2956_v26 = vld [vmem:[#allocation5 + $0x90] sm:$0xf]  ;;  %v4689_v58 = vor.u32 %v3183_v38, %v3066_v34  ;;  %v4700_v38 = vor.u32 %v3180_v49, %v3054_v61 }
 0x4db   :  { %v4656_v42 = vpop.trf.xlu1 }
 0x4dc   :  { %v1057_v36 = vrot.slane %v1056_v62, 1  ;;  %5114 = vst [vmem:[#allocation31_spill] sm:$0xff] %v4689_v58  ;;  %2341 = vmatpush.bf16.msra.mxu2 %v4689_v58  ;;  %v3169_v58 = vld [vmem:[#allocation5 + $0xf8] sm:$0xf0] }
 0x4dd   :  { %5118 = vst [vmem:[#allocation35_spill] sm:$0xff] %v4700_v38 }
 0x4de   :  { %v4676_v23 = vmax.f32 %v1056_v62, %v1057_v36  ;;  %v3157_v62 = vld [vmem:[#allocation5 + $0x98] sm:$0xf0]  ;;  %v3052_v36 = vld [vmem:[#allocation5 + $0x150] sm:$0xf] }
 0x4df   :  { %v4693_v13 = vor.u32 %v3157_v62, %v2956_v26  ;;  %v2944_v26 = vld [vmem:[#allocation5 + $0x78] sm:$0xf]  ;;  %v3154_v62 = vld [vmem:[#allocation5 + $0x80] sm:$0xf0] }
 0x4e0   :  { %v1566_v39 = vmul.f32 %v4676_v23, %v4676_v23  ;;  %2342 = vmatpush.bf16.msra.mxu2 %v4700_v38  ;;  %v3028_v38 = vld [vmem:[#allocation5 + $0x120] sm:$0xf] }
 0x4e1   :  { %5115 = vst [vmem:[#allocation32_spill] sm:$0xff] %v4693_v13  ;;  %2303 = vmatpush.bf16.msrb.mxu1 %v4693_v13  ;;  %v2992_v13 = vld [vmem:[#allocation5 + $0xd8] sm:$0xf] }
 0x4e3   :  { %v4660_v1 = vpop.trf.xlu1 }
 0x4e4   :  { %2343 = vmatpush.bf16.msra.mxu2 %v4716_v46  ;;  %v2922_v46 = vld [vmem:[#allocation5 + $0x54] sm:$0xf0] }
 0x4eb   :  { %v4662_v33 = vpop.trf.xlu1 }
 0x4f3   :  { %v4666_v59 = vpop.trf.xlu1 }
 0x4fb   :  { %v4670_v28 = vpop.trf.xlu1 }
 0x4ff   :  { %1545 = vadd.xlane.f32.xlu1 %v1544_v22  ;;  %v3181_v22 = vld [vmem:[#allocation5 + $0x158] sm:$0xf0] }
 0x500   :  { %v4695_v27 = vor.u32 %v3181_v22, %v3052_v36  ;;  %v3040_v36 = vld [vmem:[#allocation5 + $0x138] sm:$0xf]  ;;  %v4708_v22 = vor.u32 %v3154_v62, %v2944_v26  ;;  %v3175_v26 = vld [vmem:[#allocation5 + $0x128] sm:$0xf0] }
 0x502   :  { %5116 = vst [vmem:[#allocation33_spill] sm:$0xff] %v4695_v27  ;;  %2316 = vmatpush.bf16.msrb.mxu3 %v4695_v27  ;;  %2304 = vmatpush.bf16.msrb.mxu1 %v4708_v22  ;;  %v2896_v27 = vld [vmem:[#allocation5 + $0x18] sm:$0xf] }
 0x503   :  { %v4678_v29 = vpop.trf.xlu1  ;;  %5119 = vst [vmem:[#allocation36_spill] sm:$0xff] %v4708_v22 }
 0x507   :  { %1567 = vadd.xlane.f32.xlu1 %v1566_v39  ;;  %v4698_v39 = vor.u32 %v3156_v16, %v2958_v31  ;;  %v3178_v16 = vld [vmem:[#allocation5 + $0x140] sm:$0xf0]  ;;  %v3153_v31 = vld [vmem:[#allocation5 + $0x7c] sm:$0xf] }
 0x508   :  { %v4710_v49 = vor.u32 %v3178_v16, %v3040_v36  ;;  %v4712_v61 = vor.u32 %v3153_v31, %v2946_v60  ;;  %v4722_v60 = vor.u32 %v3175_v26, %v3028_v38  ;;  %v3150_v36 = vld [vmem:[#allocation5 + $0x64] sm:$0xf]  ;;  %v2934_v16 = vld [vmem:[#allocation5 + $0x6c] sm:$0xf0]  ;;  %v3016_v38 = vld [vmem:[#allocation5 + $0x108] sm:$0xf] }
 0x509   :  { %5117 = vst [vmem:[#allocation34_spill] sm:$0xff] %v4698_v39  ;;  %2329 = vmatpush.bf16.msra.mxu0 %v4698_v39  ;;  %v3151_v39 = vld [vmem:[#allocation5 + $0x68] sm:$0xf0]  ;;  %v3174_v31 = vld [vmem:[#allocation5 + $0x124] sm:$0xf] }
 0x50a   :  { %5120 = vst [vmem:[#allocation37_spill] sm:$0xff] %v4710_v49  ;;  %2317 = vmatpush.bf16.msrb.mxu3 %v4710_v49  ;;  %v4720_v62 = vor.u32 %v3151_v39, %v2932_v41  ;;  %v4727_v11 = vor.u32 %v3174_v31, %v3030_v21  ;;  %v2920_v41 = vld [vmem:[#allocation5 + $0x48] sm:$0xf]  ;;  %v3148_v39 = vld [vmem:[#allocation5 + $0x50] sm:$0xf0] }
 0x50b   :  { %v4702_v34 = vpop.trf.xlu1  ;;  %5121 = vst [vmem:[#allocation38_spill] sm:$0xff] %v4712_v61  ;;  %v4735_v26 = vor.u32 %v3148_v39, %v2920_v41  ;;  %v2908_v49 = vld [vmem:[#allocation5 + $0x30] sm:$0xf] }
 0x50c   :  { %5123 = vst [vmem:[#allocation40_spill] sm:$0xff] %v4720_v62  ;;  %2305 = vmatpush.bf16.msrb.mxu1 %v4720_v62  ;;  %2344 = vmatpush.bf16.msra.mxu2 %v4727_v11  ;;  %v3018_v62 = vld [vmem:[#allocation5 + $0x114] sm:$0xf0] }
 0x50d   :  { %2330 = vmatpush.bf16.msra.mxu0 %v4712_v61  ;;  %5124 = vst [vmem:[#allocation41_spill] sm:$0xff] %v4722_v60  ;;  %v3171_v61 = vld [vmem:[#allocation5 + $0x10c] sm:$0xf] }
 0x50e   :  { %5126 = vst [vmem:[#allocation43_spill] sm:$0xff] %v4727_v11  ;;  %2318 = vmatpush.bf16.msrb.mxu3 %v4722_v60  ;;  %v3145_v11 = vld [vmem:[#allocation5 + $0x38] sm:$0xf0]  ;;  %v3004_v60 = vld [vmem:[#allocation5 + $0xf0] sm:$0xf] }
 0x50f   :  { %1539 = vadd.xlane.f32.xlu1 %v4497_v5  ;;  %v4725_v5 = vor.u32 %v3150_v36, %v2934_v16  ;;  %5127 = vst [vmem:[#allocation44_spill] sm:$0xff] %v4735_v26  ;;  %v3172_v36 = vld [vmem:[#allocation5 + $0x110] sm:$0xf0]  ;;  %v3147_v16 = vld [vmem:[#allocation5 + $0x4c] sm:$0xf]  ;;  %v4746_v41 = vor.u32 %v3145_v11, %v2908_v49  ;;  %v4748_v39 = vor.u32 %v3169_v58, %v3004_v60 }
 0x510   :  { %v4737_v31 = vor.u32 %v3172_v36, %v3016_v38  ;;  %v4739_v21 = vor.u32 %v3147_v16, %v2922_v46  ;;  %2306 = vmatpush.bf16.msrb.mxu1 %v4735_v26  ;;  %v3144_v46 = vld [vmem:[#allocation5 + $0x34] sm:$0xf]  ;;  %v2910_v38 = vld [vmem:[#allocation5 + $0x3c] sm:$0xf0]  ;;  %v3166_v58 = vld [vmem:[#allocation5 + $0xe0] sm:$0xf0] }
 0x511   :  { %5125 = vst [vmem:[#allocation42_spill] sm:$0xff] %v4725_v5  ;;  %2331 = vmatpush.bf16.msra.mxu0 %v4725_v5  ;;  %v4742_v5 = vor.u32 %v3171_v61, %v3018_v62  ;;  %v3168_v36 = vld [vmem:[#allocation5 + $0xf4] sm:$0xf]  ;;  %v4753_v61 = vor.u32 %v3144_v46, %v2910_v38  ;;  %v3006_v62 = vld [vmem:[#allocation5 + $0xfc] sm:$0xf0] }
 0x512   :  { %5128 = vst [vmem:[#allocation45_spill] sm:$0xff] %v4737_v31  ;;  %2319 = vmatpush.bf16.msrb.mxu3 %v4737_v31  ;;  %v4755_v26 = vor.u32 %v3168_v36, %v3006_v62  ;;  %v3142_v31 = vld [vmem:[#allocation5 + $0x20] sm:$0xf0]  ;;  %v3141_v60 = vld [vmem:[#allocation5 + $0x1c] sm:$0xf] }
 0x513   :  { %v4729_v22 = vpop.trf.xlu1  ;;  %5129 = vst [vmem:[#allocation46_spill] sm:$0xff] %v4739_v21  ;;  %2345 = vmatpush.bf16.msra.mxu2 %v4742_v5  ;;  %v4758_v49 = vor.u32 %v3142_v31, %v2896_v27  ;;  %v2898_v11 = vld [vmem:[#allocation5 + $0x24] sm:$0xf0]  ;;  %v3165_v38 = vld [vmem:[#allocation5 + $0xdc] sm:$0xf] }
 0x514   :  { %5130 = vst [vmem:[#allocation47_spill] sm:$0xff] %v4742_v5  ;;  %2307 = vmatpush.bf16.msrb.mxu1 %v4746_v41  ;;  %v4762_v5 = vor.u32 %v3166_v58, %v2992_v13  ;;  %v4764_v46 = vor.u32 %v3141_v60, %v2898_v11  ;;  %v2994_v36 = vld [vmem:[#allocation5 + $0xe4] sm:$0xf0]  ;;  %v3139_v27 = vld [vmem:[#allocation5 + $0x8] sm:$0xf0] }
 0x515   :  { %2332 = vmatpush.bf16.msra.mxu0 %v4739_v21  ;;  %5131 = vst [vmem:[#allocation48_spill] sm:$0xff] %v4746_v41  ;;  %v4767_v62 = vor.u32 %v3165_v38, %v2994_v36  ;;  %v2884_v41 = vld [vmem:[#allocation5] sm:$0xf]  ;;  %v3163_v21 = vld [vmem:[#allocation5 + $0xc8] sm:$0xf0] }
 0x516   :  { %5132 = vst [vmem:[#allocation49_spill] sm:$0xff] %v4748_v39  ;;  %2320 = vmatpush.bf16.msrb.mxu3 %v4748_v39  ;;  %v2980_v31 = vld [vmem:[#allocation5 + $0xc0] sm:$0xf]  ;;  %v4770_v39 = vor.u32 %v3139_v27, %v2884_v41  ;;  %v3162_v13 = vld [vmem:[#allocation5 + $0xc4] sm:$0xf] }
 0x517   :  { %5133 = vst [vmem:[#allocation50_spill] sm:$0xff] %v4753_v61  ;;  %2346 = vmatpush.bf16.msra.mxu2 %v4755_v26  ;;  %v2982_v58 = vld [vmem:[#allocation5 + $0xcc] sm:$0xf0]  ;;  %v4774_v60 = vor.u32 %v3163_v21, %v2980_v31  ;;  %v3161_v36 = vld [vmem:[#allocation5 + $0xb8] sm:$0xf0] }
 0x518   :  { %5134 = vst [vmem:[#allocation51_spill] sm:$0xff] %v4755_v26  ;;  %2308 = vmatpush.bf16.msrb.mxu1 %v4758_v49  ;;  %v2976_v38 = vld [vmem:[#allocation5 + $0xb0] sm:$0xf]  ;;  %v4781_v41 = vor.u32 %v3162_v13, %v2982_v58  ;;  %v3158_v21 = vld [vmem:[#allocation5 + $0xa0] sm:$0xf0] }
 0x519   :  { %5135 = vst [vmem:[#allocation52_spill] sm:$0xff] %v4758_v49  ;;  %2333 = vmatpush.bf16.msra.mxu0 %v4753_v61  ;;  %v2886_v61 = vld [vmem:[#allocation5 + $0xc] sm:$0xf0]  ;;  %v4783_v27 = vor.u32 %v3161_v36, %v2976_v38  ;;  %v3185_v49 = vld [vmem:[#allocation5 + $0x178] sm:$0xf0] }
 0x51a   :  { %2321 = vmatpush.bf16.msrb.mxu3 %v4762_v5  ;;  %v4776_v11 = vor.u32 %v3138_v32, %v2886_v61  ;;  %v3072_v26 = vld [vmem:[#allocation5 + $0x170] sm:$0xf]  ;;  %v2964_v32 = vld [vmem:[#allocation5 + $0x98] sm:$0xf]  ;;  %v2952_v58 = vld [vmem:[#allocation5 + $0x80] sm:$0xf] }
 0x51b   :  { %v4750_v16 = vpop.trf.xlu1  ;;  %2347 = vmatpush.bf16.msra.mxu2 %v4767_v62  ;;  %v4785_v15 = vor.u32 %v3185_v49, %v3072_v26  ;;  %v3060_v61 = vld [vmem:[#allocation5 + $0x158] sm:$0xf]  ;;  %v4794_v31 = vor.u32 %v3158_v21, %v2964_v32  ;;  %v3182_v26 = vld [vmem:[#allocation5 + $0x160] sm:$0xf0]  ;;  %v3155_v38 = vld [vmem:[#allocation5 + $0x88] sm:$0xf0] }
 0x51c   :  { %2309 = vmatpush.bf16.msrb.mxu1 %v4770_v39  ;;  %v4797_v49 = vor.u32 %v3182_v26, %v3060_v61  ;;  %v3048_v36 = vld [vmem:[#allocation5 + $0x140] sm:$0xf]  ;;  %v3152_v21 = vld [vmem:[#allocation5 + $0x70] sm:$0xf0]  ;;  %v3036_v61 = vld [vmem:[#allocation5 + $0x128] sm:$0xf] }
 0x51d   :  { %2334 = vmatpush.bf16.msra.mxu0 %v4764_v46  ;;  %5136 = vst [vmem:[#allocation53_spill] sm:$0xff] %v4785_v15 }
 0x51e   :  { %2322 = vmatpush.bf16.msrb.mxu3 %v4774_v60  ;;  %5137 = vst [vmem:[#allocation54_spill] sm:$0xff] %v4797_v49 }
 0x51f   :  { %2348 = vmatpush.bf16.msra.mxu2 %v4781_v41 }
 0x520   :  { %2354 = vmatpush.bf16.msra.mxu1 %v4783_v27 }
 0x521   :  { %2335 = vmatpush.bf16.msra.mxu0 %v4776_v11 }
 0x522   :  { %2367 = vmatpush.bf16.msra.mxu3 %v4785_v15  ;;  %v4802_v15 = vor.u32 %v3155_v38, %v2952_v58  ;;  %v5140_v38 = vmax.f32 %v4654_v43, %v4666_v59  ;;  %v3146_v43 = vld [vmem:[#allocation5 + $0x40] sm:$0xf0]  ;;  %v3012_v59 = vld [vmem:[#allocation5 + $0xf8] sm:$0xf] }
 0x523   :  { %v4778_v7 = vpop.trf.xlu1  ;;  %2409 = vmatpush.bf16.msrb.mxu2 %v4329_v19  ;;  %v2940_v19 = vld [vmem:[#allocation5 + $0x68] sm:$0xf] }
 0x524   :  { %2355 = vmatpush.bf16.msra.mxu1 %v4794_v31  ;;  %v4810_v26 = vor.u32 %v3152_v21, %v2940_v19 }
 0x525   :  { %2396 = vmatpush.bf16.msrb.mxu0 %v4324_v9  ;;  %v3179_v9 = vld [vmem:[#allocation5 + $0x148] sm:$0xf0] }
 0x526   :  { %2368 = vmatpush.bf16.msra.mxu3 %v4797_v49  ;;  %v4805_v32 = vor.u32 %v3179_v9, %v3048_v36  ;;  %v3176_v49 = vld [vmem:[#allocation5 + $0x130] sm:$0xf0]  ;;  %v1522_v36 = vmax.f32 %v5140_v38, %v4729_v22  ;;  %v2928_v9 = vld [vmem:[#allocation5 + $0x50] sm:$0xf]  ;;  %v3167_v38 = vld [vmem:[#allocation5 + $0xe8] sm:$0xf0] }
 0x527   :  { %2410 = vmatpush.bf16.msrb.mxu2 %v4351_v30  ;;  %v5139_v30 = vmax.f32 %v4647_v44, %v4662_v33  ;;  %v2916_v33 = vld [vmem:[#allocation5 + $0x38] sm:$0xf] }
 0x528   :  { %5138 = vst [vmem:[#allocation55_spill] sm:$0xff] %v4805_v32  ;;  %2356 = vmatpush.bf16.msra.mxu1 %v4802_v15 }
 0x529   :  { %2397 = vmatpush.bf16.msrb.mxu0 %v4346_v48  ;;  %v4813_v48 = vor.u32 %v3176_v49, %v3036_v61  ;;  %v1521_v58 = vmax.f32 %v5139_v30, %v4702_v34  ;;  %v3170_v34 = vld [vmem:[#allocation5 + $0x100] sm:$0xf0]  ;;  %v3143_v30 = vld [vmem:[#allocation5 + $0x28] sm:$0xf0] }
 0x52a   :  { %2369 = vmatpush.bf16.msra.mxu3 %v4805_v32  ;;  %v3149_v32 = vld [vmem:[#allocation5 + $0x58] sm:$0xf0] }
 0x52b   :  { %v1513_v13 = vpop.trf.xlu1  ;;  %2411 = vmatpush.bf16.msrb.mxu2 %v4374_v17  ;;  %v4824_v21 = vor.u32 %v3149_v32, %v2928_v9  ;;  %v3173_v17 = vld [vmem:[#allocation5 + $0x118] sm:$0xf0]  ;;  %v4832_v32 = vor.u32 %v3146_v43, %v2916_v33  ;;  %v1520_v33 = vmax.f32 %v4660_v1, %v4678_v29 }
 0x52c   :  { %2357 = vmatpush.bf16.msra.mxu1 %v4810_v26  ;;  %v1525_v49 = vmax.f32 %v1521_v58, %v1513_v13  ;;  %v4836_v13 = vor.u32 %v3170_v34, %v3012_v59  ;;  %v3000_v58 = vld [vmem:[#allocation5 + $0xe0] sm:$0xf] }
 0x52d   :  { %2398 = vmatpush.bf16.msrb.mxu0 %v4366_v4  ;;  %v3024_v4 = vld [vmem:[#allocation5 + $0x110] sm:$0xf]  ;;  %v4844_v9 = vor.u32 %v3167_v38, %v3000_v58  ;;  %v1524_v59 = vmax.f32 %v1520_v33, %v4778_v7  ;;  %v4865_v34 = vld [vmem:[%s5020_s11] sm:$0x3] }
 0x52e   :  { %2370 = vmatpush.bf16.msra.mxu3 %v4813_v48  ;;  %v4828_v44 = vor.u32 %v3173_v17, %v3024_v4  ;;  %v3140_v4 = vld [vmem:[#allocation5 + $0x10] sm:$0xf0] }
 0x52f   :  { %2412 = vmatpush.bf16.msrb.mxu2 %v4394_v24  ;;  %v3164_v17 = vld [vmem:[#allocation5 + $0xd0] sm:$0xf0] }
 0x530   :  { %2358 = vmatpush.bf16.msra.mxu1 %v4824_v21 }
 0x531   :  { %2399 = vmatpush.bf16.msrb.mxu0 %v4389_v54  ;;  %v2904_v54 = vld [vmem:[#allocation5 + $0x20] sm:$0xf] }
 0x532   :  { %2371 = vmatpush.bf16.msra.mxu3 %v4828_v44 }
 0x533   :  { %v1514_v19 = vpop.trf.xlu1  ;;  %2413 = vmatpush.bf16.msrb.mxu2 %v4413_v47 }
 0x534   :  { %v1526_v61 = vmax.f32 %v1522_v36, %v1514_v19  ;;  %2359 = vmatpush.bf16.msra.mxu1 %v4832_v32  ;;  %v4840_v36 = vor.u32 %v3143_v30, %v2904_v54  ;;  %v2988_v19 = vld [vmem:[#allocation5 + $0xc8] sm:$0xf] }
 0x535   :  { %2400 = vmatpush.bf16.msrb.mxu0 %v4407_v52  ;;  %v2892_v52 = vld [vmem:[#allocation5 + $0x8] sm:$0xf] }
 0x536   :  { %v1529_v22 = vmax.f32 %v1525_v49, %v1526_v61  ;;  %2372 = vmatpush.bf16.msra.mxu3 %v4836_v13  ;;  %v4848_v61 = vor.u32 %v3140_v4, %v2892_v52 }
 0x537   :  { %2414 = vmatpush.bf16.msrb.mxu2 %v4431_v51  ;;  %v5141_v51 = vmax.f32 %v4656_v42, %v4670_v28  ;;  %v1980_v42 = vperm.slane %v4865_v34, 1 }
 0x538   :  { %2360 = vmatpush.bf16.msra.mxu1 %v4840_v36 }
 0x539   :  { %2401 = vmatpush.bf16.msrb.mxu0 %v4423_v35  ;;  %v4854_v35 = vor.u32 %v3164_v17, %v2988_v19  ;;  %v1523_v43 = vmax.f32 %v5141_v51, %v4750_v16 }
 0x53a   :  { %2373 = vmatpush.bf16.msra.mxu3 %v4844_v9 }
 0x53b   :  { %v1515_v24 = vpop.trf.xlu1  ;;  %2415 = vmatpush.bf16.msrb.mxu2 %v4457_v55  ;;  %v1979_v55 = vperm.slane %v4865_v34, 0 }
 0x53c   :  { %2361 = vmatpush.bf16.msra.mxu1 %v4848_v61 }
 0x53d   :  { %2402 = vmatpush.bf16.msrb.mxu0 %v4452_v50  ;;  %v1527_v50 = vmax.f32 %v1523_v43, %v1515_v24 }
 0x53e   :  { %v1992_v47 = vpop.f32.mrf.mxu1  ;;  %v2018_v49 = vpop.f32.mrf.mxu0  ;;  %2374 = vmatpush.bf16.msra.mxu3 %v4854_v35 }
 0x53f   :  { %2416 = vmatpush.bf16.msrb.mxu2 %v4475_v14  ;;  %v1993_v30 = vadd.f32 %v1992_v47, %v1979_v55  ;;  %v2019_v58 = vadd.f32 %v2018_v49, %v1980_v42 }
 0x541   :  { %2403 = vmatpush.bf16.msrb.mxu0 %v4469_v45 }
 0x543   :  { %v1516_v1 = vpop.trf.xlu1 }
 0x544   :  { %v1528_v29 = vmax.f32 %v1524_v59, %v1516_v1 }
 0x546   :  { %v1530_v28 = vmax.f32 %v1527_v50, %v1528_v29  ;;  %v1994_v7 = vpop.f32.mrf.mxu1  ;;  %v2020_v16 = vpop.f32.mrf.mxu0  ;;  %v5156_v29 = vld [vmem:[#allocation25_spill] sm:$0xff] }
 0x547   :  { %v5157_v7 = vld [vmem:[#allocation28_spill] sm:$0xff]  ;;  %v5158_v16 = vld [vmem:[#allocation29_spill] sm:$0xff] }
 0x548   :  { %v1531_v54 = vmax.f32 %v1529_v22, %v1530_v28 }
 0x54a   :  { %v1532_v38 = vrot.slane %v1531_v54, 4  ;;  %v2005_v24 = vpop.f32.mrf.mxu3  ;;  %v2031_v52 = vpop.f32.mrf.mxu2 }
 0x54b   :  { %v2006_v45 = vadd.f32 %v2005_v24, %v1993_v30  ;;  %v2032_v4 = vadd.f32 %v2031_v52, %v2019_v58  ;;  %v5159_v30 = vld [vmem:[#allocation30_spill] sm:$0xff]  ;;  %v5161_v52 = vld [vmem:[#allocation32_spill] sm:$0xff] }
 0x54c   :  { %v1533_v19 = vmax.f32 %v1531_v54, %v1532_v38  ;;  %v5160_v38 = vld [vmem:[#allocation26_spill] sm:$0xff] }
 0x54d   :  { %v2035_v17 = vmax.f32 %v2006_v45, 0.0  ;;  %v2036_v33 = vmax.f32 %v2032_v4, 0.0  ;;  %v5162_v45 = vld [vmem:[#allocation33_spill] sm:$0xff]  ;;  %v5163_v4 = vld [vmem:[#allocation31_spill] sm:$0xff] }
 0x54e   :  { %v1534_v51 = vrot.slane %v1533_v19, 2 }
 0x54f   :  { %v2037_v14 = vpack.c.bf16 %v2035_v17, %v2035_v17  ;;  %v2038_v43 = vpack.c.bf16 %v2036_v33, %v2036_v33  ;;  %v5165_v17 = vld [vmem:[#allocation36_spill] sm:$0xff]  ;;  %v5166_v33 = vld [vmem:[#allocation37_spill] sm:$0xff] }
 0x550   :  { %v1535_v59 = vmax.f32 %v1533_v19, %v1534_v51  ;;  %v5164_v19 = vld [vmem:[#allocation34_spill] sm:$0xff]  ;;  %v5167_v51 = vld [vmem:[#allocation35_spill] sm:$0xff] }
 0x551   :  { %2310 = vmatmul.bf16.vlgmr.msrb.gmra.mxu1 %v2037_v14  ;;  %2323 = vmatmul.bf16.vlgmr.msrb.gmra.mxu3 %v2038_v43 }
 0x552   :  { %2336 = vmatmul.bf16.vlgmr.msra.gmra.mxu0 %v2037_v14  ;;  %2349 = vmatmul.bf16.vlgmr.msra.gmra.mxu2 %v2038_v43  ;;  %v2007_v22 = vpop.f32.mrf.mxu3  ;;  %v2033_v47 = vpop.f32.mrf.mxu2  ;;  %v1536_v1 = vrot.slane %v1535_v59, 1 }
 0x553   :  { %2426 = vmatpush.bf16.msrb.mxu1 %v4522_v25  ;;  %2452 = vmatpush.bf16.msra.mxu0 %v4526_v56  ;;  %v5170_v22 = vld [vmem:[#allocation41_spill] sm:$0xff] }
 0x554   :  { %v1537_v49 = vmax.f32 %v1535_v59, %v1536_v1  ;;  %2439 = vmatpush.bf16.msrb.mxu3 %v4534_v10  ;;  %2465 = vmatpush.bf16.msra.mxu2 %v4536_v12  ;;  %v5144_v10 = vld [vmem:[#allocation13_spill] sm:$0xff]  ;;  %v5145_v12 = vld [vmem:[#allocation15_spill] sm:$0xff]  ;;  %v5169_v59 = vld [vmem:[#allocation40_spill] sm:$0xff] }
 0x556   :  { %v1569_v50 = vmul.f32 %v1537_v49, %v1537_v49  ;;  %v1563_v25 = vmul.f32 %v1537_v49, %v4676_v23  ;;  %v2395_v56 = vpack.c.bf16 %v1537_v49, %v1537_v49  ;;  %v5155_v23 = vld [vmem:[#allocation24_spill] sm:$0xff]  ;;  %v5171_v49 = vld [vmem:[#allocation39_spill] sm:$0xff] }
 0x557   :  { %2427 = vmatpush.bf16.msrb.mxu1 %v4529_v8  ;;  %2453 = vmatpush.bf16.msra.mxu0 %v4532_v6  ;;  %v5142_v8 = vld [vmem:[#allocation12_spill] sm:$0xff]  ;;  %v5143_v6 = vld [vmem:[#allocation11_spill] sm:$0xff] }
 0x558   :  { %1570 = vadd.xlane.f32.xlu2 %v1569_v50  ;;  %2440 = vmatpush.bf16.msrb.mxu3 %v4541_v20  ;;  %v5146_v20 = vld [vmem:[#allocation16_spill] sm:$0xff]  ;;  %v5172_v50 = vld [vmem:[#allocation42_spill] sm:$0xff] }
 0x559   :  { %2466 = vmatpush.bf16.msra.mxu2 %v4546_v18  ;;  %v5148_v18 = vld [vmem:[#allocation19_spill] sm:$0xff] }
 0x55b   :  { %2428 = vmatpush.bf16.msrb.mxu1 %v4544_v40  ;;  %2454 = vmatpush.bf16.msra.mxu0 %v4549_v2  ;;  %v5147_v40 = vld [vmem:[#allocation14_spill] sm:$0xff]  ;;  %v5149_v2 = vld [vmem:[#allocation17_spill] sm:$0xff] }
 0x55c   :  { %2441 = vmatpush.bf16.msrb.mxu3 %v4557_v57  ;;  %v5150_v57 = vld [vmem:[#allocation18_spill] sm:$0xff] }
 0x55d   :  { %2467 = vmatpush.bf16.msra.mxu2 %v4559_v37  ;;  %v5151_v37 = vld [vmem:[#allocation20_spill] sm:$0xff] }
 0x55f   :  { %2429 = vmatpush.bf16.msrb.mxu1 %v4562_v63  ;;  %2455 = vmatpush.bf16.msra.mxu0 %v4565_v3  ;;  %v5152_v63 = vld [vmem:[#allocation23_spill] sm:$0xff]  ;;  %v1543_v3 = vpop.xlane.xlu2 %1542 }
 0x560   :  { %1564 = vadd.xlane.f32.xlu2 %v1563_v25  ;;  %2442 = vmatpush.bf16.msrb.mxu3 %v4570_v0  ;;  %v5153_v0 = vld [vmem:[#allocation21_spill] sm:$0xff]  ;;  %v1547_v28 = vmax.f32 %v1543_v3, 1e-16 }
 0x561   :  { %2362 = vmatmul.bf16.vlgmr.msra.gmra.mxu1 %v2037_v14  ;;  %2375 = vmatmul.bf16.vlgmr.msra.gmra.mxu3 %v2038_v43  ;;  %v5168_v14 = vld [vmem:[#allocation38_spill] sm:$0xff] }
 0x562   :  { %2404 = vmatmul.bf16.vlgmr.msrb.gmra.mxu0 %v2395_v56  ;;  %2417 = vmatmul.bf16.vlgmr.msrb.gmra.mxu2 %v2395_v56  ;;  %v5173_v56 = vld [vmem:[#allocation44_spill] sm:$0xff] }
 0x563   :  { %2430 = vmatpush.bf16.msrb.mxu1 %v4575_v53  ;;  %2456 = vmatpush.bf16.msra.mxu0 %v5142_v8  ;;  %v5154_v53 = vld [vmem:[#allocation22_spill] sm:$0xff]  ;;  %v5174_v8 = vld [vmem:[#allocation45_spill] sm:$0xff] }
 0x564   :  { %2468 = vmatpush.bf16.msra.mxu2 %v5143_v6  ;;  %2443 = vmatpush.bf16.msrb.mxu3 %v5144_v10  ;;  %v5175_v10 = vld [vmem:[#allocation43_spill] sm:$0xff] }
 0x567   :  { %2431 = vmatpush.bf16.msrb.mxu1 %v5145_v12  ;;  %2457 = vmatpush.bf16.msra.mxu0 %v5146_v20  ;;  %v5176_v12 = vld [vmem:[#allocation46_spill] sm:$0xff] }
 0x568   :  { %2469 = vmatpush.bf16.msra.mxu2 %v5147_v40  ;;  %2444 = vmatpush.bf16.msrb.mxu3 %v5148_v18  ;;  %v5177_v40 = vld [vmem:[#allocation48_spill] sm:$0xff]  ;;  %v5178_v18 = vld [vmem:[#allocation49_spill] sm:$0xff] }
 0x56b   :  { %2432 = vmatpush.bf16.msrb.mxu1 %v5149_v2  ;;  %2458 = vmatpush.bf16.msra.mxu0 %v5150_v57  ;;  %v5179_v57 = vld [vmem:[#allocation47_spill] sm:$0xff] }
 0x56c   :  { %2470 = vmatpush.bf16.msra.mxu2 %v5151_v37  ;;  %2445 = vmatpush.bf16.msrb.mxu3 %v5152_v63  ;;  %v5180_v37 = vld [vmem:[#allocation50_spill] sm:$0xff] }
 0x56f   :  { %2433 = vmatpush.bf16.msrb.mxu1 %v5153_v0  ;;  %2459 = vmatpush.bf16.msra.mxu0 %v5154_v53  ;;  %v5181_v53 = vld [vmem:[#allocation52_spill] sm:$0xff] }
 0x570   :  { %2471 = vmatpush.bf16.msra.mxu2 %v5155_v23  ;;  %2446 = vmatpush.bf16.msrb.mxu3 %v5156_v29  ;;  %v5182_v23 = vld [vmem:[#allocation51_spill] sm:$0xff] }
 0x572   :  { %v1546_v54 = vpop.xlane.xlu1 %1545 }
 0x573   :  { %2482 = vmatpush.bf16.msra.mxu1 %v5157_v7  ;;  %2508 = vmatpush.bf16.msrb.mxu0 %v5159_v30  ;;  %v1548_v58 = vmax.f32 %v1546_v54, 1e-16 }
 0x574   :  { %2495 = vmatpush.bf16.msra.mxu3 %v5158_v16  ;;  %2472 = vmatpush.bf16.msra.mxu2 %v5160_v38 }
 0x575   :  { %v1549_v24 = vmul.f32 %v1548_v58, %v1547_v28 }
 0x577   :  { %2483 = vmatpush.bf16.msra.mxu1 %v5161_v52  ;;  %2509 = vmatpush.bf16.msrb.mxu0 %v5164_v19  ;;  %3217 = vrsqrt.f32 %v1549_v24  ;;  %vm1556_vm2 = vweird.f32 %v1549_v24 }
 0x578   :  { %2496 = vmatpush.bf16.msra.mxu3 %v5162_v45  ;;  %2521 = vmatpush.bf16.msrb.mxu2 %v5163_v4 }
 0x57a   :  { %v1568_v1 = vpop.xlane.xlu1 %1567 }
 0x57b   :  { %2484 = vmatpush.bf16.msra.mxu1 %v5165_v17  ;;  %2510 = vmatpush.bf16.msrb.mxu0 %v5168_v14 }
 0x57c   :  { %2497 = vmatpush.bf16.msra.mxu3 %v5166_v33  ;;  %2522 = vmatpush.bf16.msrb.mxu2 %v5167_v51 }
 0x57d   :  { %v3218_v43 = vpop.eup %3217 }
 0x57e   :  { %v1551_v47 = vmul.f32 %v3218_v43, %v1549_v24  ;;  %vm1557_vm1 = vweird.f32 %v3218_v43 }
 0x57f   :  { %2485 = vmatpush.bf16.msra.mxu1 %v5169_v59  ;;  %2511 = vmatpush.bf16.msrb.mxu0 %v5172_v50  ;;  %vm1558_vm3 = vmor %vm1556_vm2, %vm1557_vm1 }
 0x580   :  { %2498 = vmatpush.bf16.msra.mxu3 %v5170_v22  ;;  %2523 = vmatpush.bf16.msrb.mxu2 %v5171_v49  ;;  %v1552_v25 = vmul.f32 %v3218_v43, %v1551_v47  ;;  %v5183_v22 = vld [vmem:[#allocation27_spill] sm:$0xff] }
 0x581   :  { %v5184_v47 = vperm.slane %v5183_v22, 0 }
 0x582   :  { %v1553_v6 = vmul.f32 0.5, %v1552_v25  ;;  %v1540_v3 = vpop.xlane.xlu1 %1539 }
 0x583   :  { %2486 = vmatpush.bf16.msra.mxu1 %v5173_v56  ;;  %2512 = vmatpush.bf16.msrb.mxu0 %v5176_v12 }
 0x584   :  { %2499 = vmatpush.bf16.msra.mxu3 %v5174_v8  ;;  %2524 = vmatpush.bf16.msrb.mxu2 %v5175_v10  ;;  %v1554_v20 = vsub.f32 1.5, %v1553_v6  ;;  %v2390_v6 = vlaneseq }
 0x586   :  { %v1555_v2 = vmul.f32 %v3218_v43, %v1554_v20  ;;  %vm4969_vm10 = vcmp.lt.s32.totalorder %v2390_v6, 384 }
 0x587   :  { %2487 = vmatpush.bf16.msra.mxu1 %v5177_v40  ;;  %2513 = vmatpush.bf16.msrb.mxu0 %v5180_v37  ;;  %v5185_v37 = vperm.slane %v5183_v22, 1 }
 0x588   :  { %2500 = vmatpush.bf16.msra.mxu3 %v5178_v18  ;;  %2525 = vmatpush.bf16.msrb.mxu2 %v5179_v57  ;;  %v1559_v63 = vsel %vm1558_vm3, %v3218_v43, %v1555_v2 }
 0x589   :  { %v1560_v0 = vmul.f32 %v1559_v63, %v1540_v3 }
 0x58b   :  { %2488 = vmatpush.bf16.msra.mxu1 %v5181_v53  ;;  %2514 = vmatpush.bf16.msrb.mxu0 %v4764_v46  ;;  %1562 = vst.msk [vmem:[%s5023_s14] sm:$0x1] %vm1561_vm4, %v1560_v0 }
 0x58c   :  { %2501 = vmatpush.bf16.msra.mxu3 %v4762_v5  ;;  %2526 = vmatpush.bf16.msrb.mxu2 %v5182_v23  ;;  %v1572_v5 = vmax.f32 %v1568_v1, 1e-16 }
 0x58f   :  { %2489 = vmatpush.bf16.msra.mxu1 %v4770_v39  ;;  %2515 = vmatpush.bf16.msrb.mxu0 %v4776_v11 }
 0x590   :  { %2502 = vmatpush.bf16.msra.mxu3 %v4774_v60  ;;  %2527 = vmatpush.bf16.msrb.mxu2 %v4767_v62  ;;  %v4949_v62 = vld [vmem:[%s5022_s13] sm:$0x7] }
 0x591   :  { %v2298_v51 = vperm.slane %v4949_v62, 2  ;;  %v2296_v43 = vperm.slane %v4949_v62, 0 }
 0x594   :  { %2528 = vmatpush.bf16.msrb.mxu2 %v4781_v41  ;;  %v2297_v41 = vperm.slane %v4949_v62, 1 }
 0x5cb   :  { %v1571_v29 = vpop.xlane.xlu2 %1570 }
 0x5cc   :  { %v1573_v28 = vmax.f32 %v1571_v29, 1e-16 }
 0x5ce   :  { %v1574_v7 = vmul.f32 %v1573_v28, %v1572_v5  ;;  %v2311_v46 = vpop.f32.mrf.mxu1 }
 0x5cf   :  { %v2337_v16 = vpop.f32.mrf.mxu0  ;;  %v2312_v10 = vadd.f32 %v2311_v46, %v2296_v43 }
 0x5d0   :  { %3219 = vrsqrt.f32 %v1574_v7  ;;  %v2338_v19 = vadd.f32 %v2337_v16, %v2297_v41  ;;  %vm1581_vm6 = vweird.f32 %v1574_v7 }
 0x5d3   :  { %v1565_v50 = vpop.xlane.xlu2 %1564 }
 0x5d4   :  { %v2324_v54 = vpop.f32.mrf.mxu3 }
 0x5d5   :  { %v2350_v30 = vpop.f32.mrf.mxu2  ;;  %v2325_v57 = vadd.f32 %v2324_v54, %v2312_v10  ;;  %v5189_v54 = vld [vmem:[#allocation54_spill] sm:$0xff] }
 0x5d6   :  { %v3220_v58 = vpop.eup %3219  ;;  %v2313_v38 = vpop.f32.mrf.mxu1  ;;  %v2351_v59 = vadd.f32 %v2350_v30, %v2338_v19  ;;  %v5190_v30 = vld [vmem:[#allocation55_spill] sm:$0xff] }
 0x5d7   :  { %v1576_v39 = vmul.f32 %v3220_v58, %v1574_v7  ;;  %v2339_v60 = vpop.f32.mrf.mxu0  ;;  %vm1582_vm5 = vweird.f32 %v3220_v58 }
 0x5d8   :  { %vm1583_vm7 = vmor %vm1581_vm6, %vm1582_vm5  ;;  %v2383_v12 = vrot.slane %v2351_v59, 7 }
 0x5d9   :  { %v1577_v11 = vmul.f32 %v3220_v58, %v1576_v39 }
 0x5da   :  { %v2386_v5 = vsel %vm2385_vm8, %v2325_v57, %v2383_v12 }
 0x5db   :  { %v1578_v24 = vmul.f32 0.5, %v1577_v11 }
 0x5dc   :  { %v2326_v52 = vpop.f32.mrf.mxu3 }
 0x5dd   :  { %v1579_v45 = vsub.f32 1.5, %v1578_v24  ;;  %v2352_v4 = vpop.f32.mrf.mxu2 }
 0x5de   :  { %v2363_v17 = vpop.f32.mrf.mxu1 }
 0x5df   :  { %v1580_v33 = vmul.f32 %v3220_v58, %v1579_v45  ;;  %v2405_v14 = vpop.f32.mrf.mxu0  ;;  %v2364_v8 = vadd.f32 %v2363_v17, %v2298_v51 }
 0x5e0   :  { %v2406_v1 = vadd.f32 %v2405_v14, %v5184_v47 }
 0x5e1   :  { %v1584_v49 = vsel %vm1583_vm7, %v3220_v58, %v1580_v33 }
 0x5e2   :  { %v1585_v25 = vmul.f32 %v1584_v49, %v1565_v50  ;;  %v2422_v56 = vmax.f32 %v2406_v1, 0.0 }
 0x5e4   :  { %1586 = vst.msk [vmem:[%s5023_s14 + $0x1] sm:$0x1] %vm1561_vm4, %v1585_v25  ;;  %v2424_v20 = vpack.c.bf16 %v2422_v56, %v2422_v56  ;;  %v2376_v40 = vpop.f32.mrf.mxu3  ;;  %s3308_s14 = smov [#allocation7]  }
 0x5e5   :  { %v2377_v18 = vadd.f32 %v2376_v40, %v2364_v8  ;;  %v2418_v2 = vpop.f32.mrf.mxu2  ;;  %s2577_s5 = sshll.u32 %s3308_s14, 4  ;;  %s2578_s5 = int_to_ptr.vmem [resolvable:$true] %s2577_s5 }
 0x5e6   :  { %v2419_v63 = vadd.f32 %v2418_v2, %v5185_v37  ;;  %2434 = vmatmul.bf16.vlgmr.msrb.gmra.mxu1 %v2424_v20  ;;  %2460 = vmatmul.bf16.vlgmr.msra.gmra.mxu0 %v2424_v20  ;;  %v2365_v3 = vpop.f32.mrf.mxu1 }
 0x5e7   :  { %v2384_v0 = vrot.slane %v2377_v18, 6  ;;  %v2407_v53 = vpop.f32.mrf.mxu0  ;;  %2534 = vmatpush.bf16.msrb.mxu1 %v4783_v27  ;;  %v5188_v27 = vld [vmem:[#allocation53_spill] sm:$0xff] }
 0x5e8   :  { %v2423_v29 = vmax.f32 %v2419_v63, 0.0 }
 0x5e9   :  { %v2388_v28 = vsel %vm2387_vm9, %v2386_v5, %v2384_v0 }
 0x5ea   :  { %v2425_v7 = vpack.c.bf16 %v2423_v29, %v2423_v29  ;;  %2394 = vst.msk [vmem:[#allocation7] ss:$2 sm:$0x7] %vm4969_vm10, %v2388_v28 }
 0x5eb   :  { %2535 = vmatpush.bf16.msrb.mxu1 %v4794_v31 }
 0x5ec   :  { %2447 = vmatmul.bf16.vlgmr.msrb.gmra.mxu3 %v2425_v7  ;;  %2473 = vmatmul.bf16.vlgmr.msra.gmra.mxu2 %v2425_v7  ;;  %v2378_v46 = vpop.f32.mrf.mxu3 }
 0x5ed   :  { %v2420_v16 = vpop.f32.mrf.mxu2  ;;  %2547 = vmatpush.bf16.msrb.mxu3 %v5188_v27 }
 0x5ef   :  { %2536 = vmatpush.bf16.msrb.mxu1 %v4802_v15 }
 0x5f1   :  { %2548 = vmatpush.bf16.msrb.mxu3 %v5189_v54 }
 0x5f3   :  { %2537 = vmatpush.bf16.msrb.mxu1 %v4810_v26 }
 0x5f5   :  { %2549 = vmatpush.bf16.msrb.mxu3 %v5190_v30 }
 0x5f7   :  { %2538 = vmatpush.bf16.msrb.mxu1 %v4824_v21 }
 0x5f9   :  { %2550 = vmatpush.bf16.msrb.mxu3 %v4813_v48 }
 0x5fb   :  { %2539 = vmatpush.bf16.msrb.mxu1 %v4832_v32 }
 0x5fd   :  { %2551 = vmatpush.bf16.msrb.mxu3 %v4828_v44 }
 0x5ff   :  { %2540 = vmatpush.bf16.msrb.mxu1 %v4840_v36 }
 0x601   :  { %2552 = vmatpush.bf16.msrb.mxu3 %v4836_v13 }
 0x603   :  { %2541 = vmatpush.bf16.msrb.mxu1 %v4848_v61 }
 0x605   :  { %2553 = vmatpush.bf16.msrb.mxu3 %v4844_v9 }
 0x609   :  { %2554 = vmatpush.bf16.msrb.mxu3 %v4854_v35 }
 0x663   :  { %v2435_v15 = vpop.f32.mrf.mxu1  ;;  %v2461_v31 = vpop.f32.mrf.mxu0 }
 0x664   :  { %v2436_v48 = vadd.f32 %v2435_v15, %v1979_v55  ;;  %v2462_v44 = vadd.f32 %v2461_v31, %v1980_v42 }
 0x66b   :  { %v2437_v26 = vpop.f32.mrf.mxu1  ;;  %v2463_v21 = vpop.f32.mrf.mxu0 }
 0x66f   :  { %v2448_v32 = vpop.f32.mrf.mxu3  ;;  %v2474_v36 = vpop.f32.mrf.mxu2 }
 0x670   :  { %v2449_v58 = vadd.f32 %v2448_v32, %v2436_v48  ;;  %v2475_v13 = vadd.f32 %v2474_v36, %v2462_v44 }
 0x672   :  { %v2478_v38 = vmax.f32 %v2449_v58, 0.0  ;;  %v2479_v61 = vmax.f32 %v2475_v13, 0.0 }
 0x674   :  { %v2480_v39 = vpack.c.bf16 %v2478_v38, %v2478_v38  ;;  %v2481_v9 = vpack.c.bf16 %v2479_v61, %v2479_v61 }
 0x676   :  { %2490 = vmatmul.bf16.vlgmr.msra.gmra.mxu1 %v2480_v39  ;;  %2503 = vmatmul.bf16.vlgmr.msra.gmra.mxu3 %v2481_v9 }
 0x677   :  { %2516 = vmatmul.bf16.vlgmr.msrb.gmra.mxu0 %v2480_v39  ;;  %2529 = vmatmul.bf16.vlgmr.msrb.gmra.mxu2 %v2481_v9  ;;  %v2450_v35 = vpop.f32.mrf.mxu3  ;;  %v2476_v60 = vpop.f32.mrf.mxu2 }
 0x686   :  { %2542 = vmatmul.bf16.vlgmr.msrb.gmra.mxu1 %v2480_v39  ;;  %2555 = vmatmul.bf16.vlgmr.msrb.gmra.mxu3 %v2481_v9 }
 0x6f3   :  { %v2491_v55 = vpop.f32.mrf.mxu1 }
 0x6f4   :  { %v2517_v11 = vpop.f32.mrf.mxu0  ;;  %v2492_v59 = vadd.f32 %v2491_v55, %v2296_v43 }
 0x6f5   :  { %v2518_v19 = vadd.f32 %v2517_v11, %v2297_v41 }
 0x6f9   :  { %v2504_v34 = vpop.f32.mrf.mxu3 }
 0x6fa   :  { %v2530_v42 = vpop.f32.mrf.mxu2  ;;  %v2505_v49 = vadd.f32 %v2504_v34, %v2492_v59 }
 0x6fb   :  { %v2493_v24 = vpop.f32.mrf.mxu1  ;;  %v2531_v33 = vadd.f32 %v2530_v42, %v2518_v19 }
 0x6fc   :  { %v2519_v52 = vpop.f32.mrf.mxu0 }
 0x6fd   :  { %v2563_v22 = vrot.slane %v2531_v33, 7 }
 0x6ff   :  { %v2565_v25 = vsel %vm2385_vm8, %v2505_v49, %v2563_v22 }
 0x701   :  { %v2506_v45 = vpop.f32.mrf.mxu3 }
 0x702   :  { %v2532_v4 = vpop.f32.mrf.mxu2 }
 0x703   :  { %v2543_v17 = vpop.f32.mrf.mxu1 }
 0x704   :  { %v2544_v14 = vadd.f32 %v2543_v17, %v2298_v51 }
 0x709   :  { %v2556_v47 = vpop.f32.mrf.mxu3 }
 0x70a   :  { %v2557_v1 = vadd.f32 %v2556_v47, %v2544_v14 }
 0x70b   :  { %v2545_v50 = vpop.f32.mrf.mxu1 }
 0x70c   :  { %v2564_v41 = vrot.slane %v2557_v1, 6 }
 0x70e   :  { %v2566_v51 = vsel %vm2387_vm9, %v2565_v25, %v2564_v41 }
 0x70f   :  { %2569 = vst.msk [vmem:[#allocation7 + $0x1] ss:$2 sm:$0x7] %vm4969_vm10, %v2566_v51 }
 0x710   :  { %2582 = dma.vmem_to_hbm [thread:$0]  %s2578_s5, 96, %s2580_s26, [#allocation4]  }
 0x711   :  { %v2558_v62 = vpop.f32.mrf.mxu3 }
 0x712   :  { %3297 = dma.done.wait [#allocation4], 96  }
 0x713   :  { %3298 = vsyncadd [#allocation4], 4294967200 }
 0x714   :  { %2589 = vsyncpa [#allocation3], 1 }
 0x715   :  { %2590 = vsyncpa [#allocation6], 1 }
 0x716   :  { %2591 = vsyncpa [#allocation4], 1 }

</bundles_post_ra>
